<compile_context>
chip_gen: v6e
topology: v6e:2x2x1
jax: 0.10.0
libtpu: 0.0.40
codegen_flags: <defaults>
</compile_context>

<pallas_src>
import math
import functools

import jax
import jax.numpy as jnp
from jax import lax
from jax.experimental import pallas as pl
from jax.experimental.pallas import tpu as pltpu

# ---------------------------------------------------------------------------
# Model hyper-parameters (small, consistent with the module's __init__ args)
# ---------------------------------------------------------------------------
BATCH = 2
SEQ = 16
HIDDEN = 32
HEADS = 4
DH = HIDDEN // HEADS          # per-head size
FFN = 64
LAYERS = 2
EPS = 1e-6                    # UER LayerNorm eps
CROSS_NEG = -1e9              # additive bias for cross-batch / cross-head blocks

BS = BATCH * SEQ              # 32  (fused batch*seq rows)
BHS = BATCH * HEADS * SEQ     # 128 (fused batch*heads*seq rows for attention)


# ---------------------------------------------------------------------------
# Mask generation (plain-JAX glue, jitted together with the kernel call).
# TODO(synk): exact `generate_mask` source for row-wise/col-wise/cross-wise was
# not provided; 'row-wise' is implemented as same-segment visibility over
# non-pad tokens, `additional_ban` is assumed 0.
# ---------------------------------------------------------------------------
def generate_mask(seg, mask_mode="row-wise", additional_ban=0):
    # seg: [B, S] int32, 0 = padding, >0 = row/segment id
    assert mask_mode in ["row-wise", "col-wise", "cross-wise", "cross-and-hier-wise"]
    valid = (seg > 0)
    same = (seg[:, :, None] == seg[:, None, :])
    mask = jnp.logical_and(same, valid[:, None, :])
    return mask.astype(jnp.float32)          # [B, S, S]


# ---------------------------------------------------------------------------
# In-kernel helpers
# ---------------------------------------------------------------------------
def _layer_norm(x, gamma, beta):
    # UER LayerNorm: gamma * (x - mean) / (std + eps) + beta, unbiased std.
    mean = jnp.mean(x, axis=-1, keepdims=True)
    centered = x - mean
    var = jnp.sum(centered * centered, axis=-1, keepdims=True) / (x.shape[-1] - 1)
    std = jnp.sqrt(var)
    return gamma * centered / (std + EPS) + beta


def _gelu(x):
    # UER gelu: x * 0.5 * (1 + erf(x / sqrt(2)))
    return x * 0.5 * (1.0 + lax.erf(x * (1.0 / math.sqrt(2.0))))


# ---------------------------------------------------------------------------
# One fused Pallas kernel: all LAYERS layers, batch fused on sublanes. No grid.
#
# Packed operand layouts (built in _pack_params):
#   w_ref : (LAYERS, HIDDEN, 256) f32
#       cols [  0: 96] = Wqkv (Q columns pre-scaled by 1/sqrt(DH))
#       cols [ 96:128] = Wo
#       cols [128:192] = W1  (FFN in)
#       cols [192:224] = W2 rows 0..31     (FFN out, top half)
#       cols [224:256] = W2 rows 32..63    (FFN out, bottom half)
#   v_ref : (LAYERS, 8, 128) f32, one vector per row (zero padded):
#       row 0 bqkv(96, Q part pre-scaled) | 1 bo(32) | 2 g1 | 3 be1
#       row 4 bf1(64) | 5 bf2(32) | 6 g2 | 7 be2
#   bias_ref : (BHS, BHS) f32 block-diagonal additive attention bias,
#              row/col order (b, h, s); cross-block entries = CROSS_NEG.
# ---------------------------------------------------------------------------
def encoder_kernel(x_ref, bias_ref, w_ref, v_ref, out_ref):
    x = x_ref[...]                                    # (BS, H) f32

    for l in range(LAYERS):                           # static unroll (L=2)
        W = w_ref[l]                                  # (H, 256)   loaded per layer
        VEC = v_ref[l]                                # (8, 128)

        # ---- fused QKV projection: one (BS,H) @ (H,3H) matmul --------------
        qkv = jnp.dot(x, W[:, 0:3 * HIDDEN],
                      preferred_element_type=jnp.float32) + VEC[0:1, 0:3 * HIDDEN]

        # ---- stack heads+batch on sublanes: (BS,H)-slices -> (BHS, DH) -----
        def stack_heads(col0):
            return jnp.concatenate(
                [qkv[b * SEQ:(b + 1) * SEQ, col0 + h * DH: col0 + (h + 1) * DH]
                 for b in range(BATCH) for h in range(HEADS)], axis=0)

        q_s = stack_heads(0).astype(jnp.bfloat16)                 # (BHS, DH)
        k_t = stack_heads(HIDDEN).T.astype(jnp.bfloat16)          # (DH, BHS)

        # ---- block-diagonal attention: one matmul, one lane-dense softmax --
        scores = jnp.dot(q_s, k_t, preferred_element_type=jnp.float32) + bias_ref[...]
        scores = scores - jnp.max(scores, axis=-1, keepdims=True)
        e = jnp.exp(scores)
        probs = e * pl.reciprocal(jnp.sum(e, axis=-1, keepdims=True), approx=True)

        v_s = stack_heads(2 * HIDDEN).astype(jnp.bfloat16)        # (BHS, DH)
        ctx_s = jnp.dot(probs.astype(jnp.bfloat16), v_s,
                        preferred_element_type=jnp.float32)       # (BHS, DH) f32

        # ---- un-stack heads back onto lanes: (BHS, DH) -> (BS, H) ----------
        ctx = jnp.concatenate(
            [jnp.concatenate(
                [ctx_s[(b * HEADS + h) * SEQ:(b * HEADS + h + 1) * SEQ, :]
                 for h in range(HEADS)], axis=1)
             for b in range(BATCH)], axis=0)                      # (BS, H)

        # ---- output projection + residual + LayerNorm 1 ---------------------
        attn = jnp.dot(ctx, W[:, 3 * HIDDEN:4 * HIDDEN],
                       preferred_element_type=jnp.float32) + VEC[1:2, 0:HIDDEN]
        inter = _layer_norm(attn + x, VEC[2:3, 0:HIDDEN], VEC[3:4, 0:HIDDEN])

        # ---- position-wise feed-forward -------------------------------------
        ff = jnp.dot(inter, W[:, 4 * HIDDEN:4 * HIDDEN + FFN],
                     preferred_element_type=jnp.float32) + VEC[4:5, 0:FFN]
        ff = _gelu(ff)
        w2 = jnp.concatenate([W[:, 4 * HIDDEN + FFN:4 * HIDDEN + FFN + HIDDEN],
                              W[:, 4 * HIDDEN + FFN + HIDDEN:4 * HIDDEN + FFN + 2 * HIDDEN]],
                             axis=0)                              # (FFN, H)
        ff = jnp.dot(ff, w2, preferred_element_type=jnp.float32) + VEC[5:6, 0:HIDDEN]

        # ---- residual + LayerNorm 2 -----------------------------------------
        x = _layer_norm(ff + inter, VEC[6:7, 0:HIDDEN], VEC[7:8, 0:HIDDEN])

    out_ref[...] = x.astype(out_ref.dtype)


# ---------------------------------------------------------------------------
# Wrapper-side packing of the 14 parameter arrays into two VMEM buffers.
# ---------------------------------------------------------------------------
def _pad_row(v, n):
    return jnp.pad(v, ((0, 0), (0, n - v.shape[1])))


def _pack_params(p):
    scale = 1.0 / math.sqrt(DH)
    w_layers, v_layers = [], []
    for l in range(LAYERS):
        wqkv = p["wqkv"][l].at[:, :HIDDEN].multiply(scale)   # fold softmax scale into Q
        bqkv = p["bqkv"][l].at[:, :HIDDEN].multiply(scale)
        w2 = p["w2"][l]
        w_l = jnp.concatenate(
            [wqkv, p["wo"][l], p["w1"][l], w2[:HIDDEN, :], w2[HIDDEN:, :]], axis=1)  # (32,256)
        v_l = jnp.concatenate(
            [_pad_row(bqkv, 128), _pad_row(p["bo"][l], 128),
             _pad_row(p["g1"][l], 128), _pad_row(p["be1"][l], 128),
             _pad_row(p["bf1"][l], 128), _pad_row(p["bf2"][l], 128),
             _pad_row(p["g2"][l], 128), _pad_row(p["be2"][l], 128)], axis=0)         # (8,128)
        w_layers.append(w_l)
        v_layers.append(v_l)
    return jnp.stack(w_layers), jnp.stack(v_layers)


def _cost_estimate():
    per_layer = (2 * BS * HIDDEN * 3 * HIDDEN        # fused QKV
                 + 2 * BHS * DH * BHS                # block-diag QK^T
                 + 2 * BHS * BHS * DH                # probs @ V
                 + 2 * BS * HIDDEN * HIDDEN          # output projection
                 + 2 * 2 * BS * HIDDEN * FFN)        # FFN (two matmuls)
    transcend = (BHS * BHS + BS * FFN) * LAYERS      # exp + erf
    bytes_accessed = 4 * (2 * BS * HIDDEN + BHS * BHS
                          + LAYERS * (HIDDEN * 256 + 8 * 128))
    return pl.CostEstimate(flops=per_layer * LAYERS,
                           transcendentals=transcend,
                           bytes_accessed=bytes_accessed)


@functools.partial(jax.jit, static_argnames=("mask_mode", "additional_ban"))
def bert_tab_encoder(emb, seg, params, mask_mode="row-wise", additional_ban=0):
    # mask -> additive bias (plain JAX prologue, fused into the same XLA program)
    mask = generate_mask(seg, mask_mode, additional_ban)
    mask = (mask > 0).astype(jnp.float32)
    bias = (1.0 - mask) * -10000.0                                   # (B, S, S)

    # Block-diagonal (BHS, BHS) additive bias, row/col order (b, h, s):
    #   in-block  -> original per-batch attention bias
    #   cross-block (different batch OR head) -> CROSS_NEG (prob underflows to 0)
    bh = BATCH * HEADS
    bias_bh = jnp.broadcast_to(bias[:, None], (BATCH, HEADS, SEQ, SEQ)).reshape(bh, SEQ, SEQ)
    blk = jnp.arange(bh)[:, None] == jnp.arange(bh)[None, :]
    bias_bd = jnp.where(blk[:, None, :, None], bias_bh[:, :, None, :],
                        CROSS_NEG).reshape(BHS, BHS)

    w_packed, v_packed = _pack_params(params)
    x2d = emb.reshape(BS, HIDDEN)

    out = pl.pallas_call(
        encoder_kernel,
        out_shape=jax.ShapeDtypeStruct((BS, HIDDEN), emb.dtype),
        in_specs=[pl.BlockSpec(memory_space=pltpu.MemorySpace.VMEM)] * 4,
        out_specs=pl.BlockSpec(memory_space=pltpu.MemorySpace.VMEM),
        cost_estimate=_cost_estimate(),
    )(x2d, bias_bd, w_packed, v_packed)
    return out.reshape(BATCH, SEQ, HIDDEN)


# ---------------------------------------------------------------------------
# Deterministic parameter initialization (synthetic weights, stacked over layers)
# ---------------------------------------------------------------------------
def init_params(key):
    def nrm(k, shape, scale=0.02):
        return (scale * jax.random.normal(k, shape)).astype(jnp.float32)

    names = ["wqkv", "bqkv", "wo", "bo", "g1", "be1",
             "w1", "bf1", "w2", "bf2", "g2", "be2"]
    stacks = {n: [] for n in names}
    for _ in range(LAYERS):
        key, *ks = jax.random.split(key, 15)
        # linear weights stored as [in, out] (PyTorch W.T), biases as [1, out]
        stacks["wqkv"].append(jnp.concatenate(
            [nrm(ks[0], (HIDDEN, HIDDEN)), nrm(ks[1], (HIDDEN, HIDDEN)),
             nrm(ks[2], (HIDDEN, HIDDEN))], axis=1))
        stacks["bqkv"].append(nrm(ks[3], (1, 3 * HIDDEN)))
        stacks["wo"].append(nrm(ks[4], (HIDDEN, HIDDEN)))
        stacks["bo"].append(nrm(ks[5], (1, HIDDEN)))
        stacks["g1"].append(1.0 + nrm(ks[6], (1, HIDDEN)))
        stacks["be1"].append(nrm(ks[7], (1, HIDDEN)))
        stacks["w1"].append(nrm(ks[8], (HIDDEN, FFN)))
        stacks["bf1"].append(nrm(ks[9], (1, FFN)))
        stacks["w2"].append(nrm(ks[10], (FFN, HIDDEN)))
        stacks["bf2"].append(nrm(ks[11], (1, HIDDEN)))
        stacks["g2"].append(1.0 + nrm(ks[12], (1, HIDDEN)))
        stacks["be2"].append(nrm(ks[13], (1, HIDDEN)))
    return {n: jnp.stack(v) for n, v in stacks.items()}


# ---------------------------------------------------------------------------
# Pure-JAX reference (numerical sanity check, full f32)
# ---------------------------------------------------------------------------
def _ref_layer(x, bias, p, l):
    qkv = x @ p["wqkv"][l] + p["bqkv"][l]
    q = qkv[..., :HIDDEN]
    k = qkv[..., HIDDEN:2 * HIDDEN]
    v = qkv[..., 2 * HIDDEN:]
    B, S, H = x.shape

    def split(t):
        return t.reshape(B, S, HEADS, DH).transpose(0, 2, 1, 3)

    qh, kh, vh = split(q), split(k), split(v)
    scores = jnp.einsum("bhqd,bhkd->bhqk", qh, kh) / math.sqrt(DH)
    scores = scores + bias[:, None, :, :]
    probs = jax.nn.softmax(scores, axis=-1)
    ctx = jnp.einsum("bhqk,bhkd->bhqd", probs, vh)
    ctx = ctx.transpose(0, 2, 1, 3).reshape(B, S, H)
    attn = ctx @ p["wo"][l] + p["bo"][l]

    def ln(y, g, b):
        mean = y.mean(-1, keepdims=True)
        var = ((y - mean) ** 2).sum(-1, keepdims=True) / (y.shape[-1] - 1)
        return g * (y - mean) / (jnp.sqrt(var) + EPS) + b

    inter = ln(attn + x, p["g1"][l], p["be1"][l])
    ff = inter @ p["w1"][l] + p["bf1"][l]
    ff = ff * 0.5 * (1.0 + lax.erf(ff / math.sqrt(2.0)))
    ff = ff @ p["w2"][l] + p["bf2"][l]
    return ln(ff + inter, p["g2"][l], p["be2"][l])


def _ref_encoder(emb, seg, params):
    mask = generate_mask(seg)
    bias = (1.0 - (mask > 0).astype(jnp.float32)) * -10000.0
    h = emb
    for l in range(LAYERS):
        h = _ref_layer(h, bias, params, l)
    return h


# ---------------------------------------------------------------------------
if __name__ == "__main__":
    key = jax.random.PRNGKey(0)
    k_emb, k_par = jax.random.split(key)

    emb = jax.random.normal(k_emb, (BATCH, SEQ, HIDDEN), dtype=jnp.float32)
    # seg: table row/segment ids, 0 marks padding
    seg = jnp.array(
        [[1, 1, 1, 1, 2, 2, 2, 2, 3, 3, 3, 3, 0, 0, 0, 0],
         [1, 1, 2, 2, 3, 3, 4, 4, 5, 5, 5, 5, 5, 0, 0, 0]], dtype=jnp.int32)

    params = init_params(k_par)

    out = bert_tab_encoder(emb, seg, params, mask_mode="row-wise", additional_ban=0)
    out = jax.block_until_ready(out)

    ref = jax.block_until_ready(_ref_encoder(emb, seg, params))
    assert out.shape == (BATCH, SEQ, HIDDEN)
    err = float(jnp.max(jnp.abs(out - ref)))
    # tolerance loosened vs f32: attention matmul operands are bf16 (f32 accum)
    # and the softmax denominator uses the approximate EUP reciprocal.
    assert err < 5e-3, f"mismatch vs reference: max abs err {err}"

    print("KERNEL_OK")
</pallas_src>

<mosaic_0001>
module attributes {stable_mosaic.version = 11 : i64} {
  func.func @encoder_kernel(%arg0: memref<32x32xf32, #tpu.memory_space<vmem>>, %arg1: memref<128x128xf32, #tpu.memory_space<vmem>>, %arg2: memref<2x32x256xf32, #tpu.memory_space<vmem>>, %arg3: memref<2x8x128xf32, #tpu.memory_space<vmem>>, %arg4: memref<32x32xf32, #tpu.memory_space<vmem>>) attributes {dimension_semantics = [], scalar_prefetch = 0 : i64, scratch_operands = 0 : i64, tpu.core_type = #tpu.core_type<tc>} {
    %c0 = arith.constant 0 : index
    %c0_0 = arith.constant 0 : index
    %0 = vector.load %arg0[%c0, %c0_0] : memref<32x32xf32, #tpu.memory_space<vmem>>, vector<32x32xf32>
    %c0_1 = arith.constant 0 : index
    %c0_2 = arith.constant 0 : index
    %c0_3 = arith.constant 0 : index
    %1 = vector.load %arg2[%c0_1, %c0_2, %c0_3] : memref<2x32x256xf32, #tpu.memory_space<vmem>>, vector<1x32x256xf32>
    %2 = vector.shape_cast %1 : vector<1x32x256xf32> to vector<32x256xf32>
    %c0_4 = arith.constant 0 : index
    %c0_5 = arith.constant 0 : index
    %c0_6 = arith.constant 0 : index
    %3 = vector.load %arg3[%c0_4, %c0_5, %c0_6] : memref<2x8x128xf32, #tpu.memory_space<vmem>>, vector<1x8x128xf32>
    %4 = vector.shape_cast %3 : vector<1x8x128xf32> to vector<8x128xf32>
    %5 = vector.extract_strided_slice %2 {offsets = [0, 0], sizes = [32, 96], strides = [1, 1]} : vector<32x256xf32> to vector<32x96xf32>
    %cst = arith.constant dense<0.000000e+00> : vector<32x96xf32>
    %6 = tpu.matmul %0, %5, %cst {dimension_numbers = #tpu.dot_dimension_numbers<[1], [0], [0], [1], [0, 0, 1, 1], [], []>} : vector<32x32xf32>, vector<32x96xf32>, vector<32x96xf32> -> vector<32x96xf32>
    %7 = vector.extract_strided_slice %4 {offsets = [0, 0], sizes = [1, 96], strides = [1, 1]} : vector<8x128xf32> to vector<1x96xf32>
    %8 = vector.broadcast %7 : vector<1x96xf32> to vector<32x96xf32>
    %9 = arith.addf %6, %8 : vector<32x96xf32>
    %10 = vector.extract_strided_slice %9 {offsets = [0, 0], sizes = [16, 8], strides = [1, 1]} : vector<32x96xf32> to vector<16x8xf32>
    %11 = vector.extract_strided_slice %9 {offsets = [0, 8], sizes = [16, 8], strides = [1, 1]} : vector<32x96xf32> to vector<16x8xf32>
    %12 = vector.extract_strided_slice %9 {offsets = [0, 16], sizes = [16, 8], strides = [1, 1]} : vector<32x96xf32> to vector<16x8xf32>
    %13 = vector.extract_strided_slice %9 {offsets = [0, 24], sizes = [16, 8], strides = [1, 1]} : vector<32x96xf32> to vector<16x8xf32>
    %14 = vector.extract_strided_slice %9 {offsets = [16, 0], sizes = [16, 8], strides = [1, 1]} : vector<32x96xf32> to vector<16x8xf32>
    %15 = vector.extract_strided_slice %9 {offsets = [16, 8], sizes = [16, 8], strides = [1, 1]} : vector<32x96xf32> to vector<16x8xf32>
    %16 = vector.extract_strided_slice %9 {offsets = [16, 16], sizes = [16, 8], strides = [1, 1]} : vector<32x96xf32> to vector<16x8xf32>
    %17 = vector.extract_strided_slice %9 {offsets = [16, 24], sizes = [16, 8], strides = [1, 1]} : vector<32x96xf32> to vector<16x8xf32>
    %18 = tpu.concatenate %10, %11, %12, %13, %14, %15, %16, %17 in 0 : vector<16x8xf32>, vector<16x8xf32>, vector<16x8xf32>, vector<16x8xf32>, vector<16x8xf32>, vector<16x8xf32>, vector<16x8xf32>, vector<16x8xf32> -> vector<128x8xf32>
    %19 = arith.truncf %18 : vector<128x8xf32> to vector<128x8xbf16>
    %20 = vector.extract_strided_slice %9 {offsets = [0, 32], sizes = [16, 8], strides = [1, 1]} : vector<32x96xf32> to vector<16x8xf32>
    %21 = vector.extract_strided_slice %9 {offsets = [0, 40], sizes = [16, 8], strides = [1, 1]} : vector<32x96xf32> to vector<16x8xf32>
    %22 = vector.extract_strided_slice %9 {offsets = [0, 48], sizes = [16, 8], strides = [1, 1]} : vector<32x96xf32> to vector<16x8xf32>
    %23 = vector.extract_strided_slice %9 {offsets = [0, 56], sizes = [16, 8], strides = [1, 1]} : vector<32x96xf32> to vector<16x8xf32>
    %24 = vector.extract_strided_slice %9 {offsets = [16, 32], sizes = [16, 8], strides = [1, 1]} : vector<32x96xf32> to vector<16x8xf32>
    %25 = vector.extract_strided_slice %9 {offsets = [16, 40], sizes = [16, 8], strides = [1, 1]} : vector<32x96xf32> to vector<16x8xf32>
    %26 = vector.extract_strided_slice %9 {offsets = [16, 48], sizes = [16, 8], strides = [1, 1]} : vector<32x96xf32> to vector<16x8xf32>
    %27 = vector.extract_strided_slice %9 {offsets = [16, 56], sizes = [16, 8], strides = [1, 1]} : vector<32x96xf32> to vector<16x8xf32>
    %28 = tpu.concatenate %20, %21, %22, %23, %24, %25, %26, %27 in 0 : vector<16x8xf32>, vector<16x8xf32>, vector<16x8xf32>, vector<16x8xf32>, vector<16x8xf32>, vector<16x8xf32>, vector<16x8xf32>, vector<16x8xf32> -> vector<128x8xf32>
    %29 = tpu.transpose %28, [1, 0] : vector<128x8xf32> -> vector<8x128xf32>
    %30 = arith.truncf %29 : vector<8x128xf32> to vector<8x128xbf16>
    %cst_7 = arith.constant dense<0.000000e+00> : vector<128x128xf32>
    %31 = tpu.matmul %19, %30, %cst_7 {dimension_numbers = #tpu.dot_dimension_numbers<[1], [0], [0], [1], [0, 0, 1, 1], [], []>} : vector<128x8xbf16>, vector<8x128xbf16>, vector<128x128xf32> -> vector<128x128xf32>
    %c0_8 = arith.constant 0 : index
    %c0_9 = arith.constant 0 : index
    %32 = vector.load %arg1[%c0_8, %c0_9] : memref<128x128xf32, #tpu.memory_space<vmem>>, vector<128x128xf32>
    %33 = arith.addf %31, %32 : vector<128x128xf32>
    %cst_10 = arith.constant dense<0xFF800000> : vector<128xf32>
    %34 = vector.multi_reduction <maximumf>, %33, %cst_10 [1] : vector<128x128xf32> to vector<128xf32>
    %35 = vector.shape_cast %34 : vector<128xf32> to vector<128x1xf32>
    %36 = vector.broadcast %35 : vector<128x1xf32> to vector<128x128xf32>
    %37 = arith.subf %33, %36 : vector<128x128xf32>
    %38 = math.exp %37 : vector<128x128xf32>
    %cst_11 = arith.constant dense<0.000000e+00> : vector<128xf32>
    %39 = vector.multi_reduction <add>, %38, %cst_11 [1] : vector<128x128xf32> to vector<128xf32>
    %40 = vector.shape_cast %39 : vector<128xf32> to vector<128x1xf32>
    %41 = tpu.reciprocal %40 {approx = true} : vector<128x1xf32> -> vector<128x1xf32>
    %42 = vector.broadcast %41 : vector<128x1xf32> to vector<128x128xf32>
    %43 = arith.mulf %38, %42 : vector<128x128xf32>
    %44 = vector.extract_strided_slice %9 {offsets = [0, 64], sizes = [16, 8], strides = [1, 1]} : vector<32x96xf32> to vector<16x8xf32>
    %45 = vector.extract_strided_slice %9 {offsets = [0, 72], sizes = [16, 8], strides = [1, 1]} : vector<32x96xf32> to vector<16x8xf32>
    %46 = vector.extract_strided_slice %9 {offsets = [0, 80], sizes = [16, 8], strides = [1, 1]} : vector<32x96xf32> to vector<16x8xf32>
    %47 = vector.extract_strided_slice %9 {offsets = [0, 88], sizes = [16, 8], strides = [1, 1]} : vector<32x96xf32> to vector<16x8xf32>
    %48 = vector.extract_strided_slice %9 {offsets = [16, 64], sizes = [16, 8], strides = [1, 1]} : vector<32x96xf32> to vector<16x8xf32>
    %49 = vector.extract_strided_slice %9 {offsets = [16, 72], sizes = [16, 8], strides = [1, 1]} : vector<32x96xf32> to vector<16x8xf32>
    %50 = vector.extract_strided_slice %9 {offsets = [16, 80], sizes = [16, 8], strides = [1, 1]} : vector<32x96xf32> to vector<16x8xf32>
    %51 = vector.extract_strided_slice %9 {offsets = [16, 88], sizes = [16, 8], strides = [1, 1]} : vector<32x96xf32> to vector<16x8xf32>
    %52 = tpu.concatenate %44, %45, %46, %47, %48, %49, %50, %51 in 0 : vector<16x8xf32>, vector<16x8xf32>, vector<16x8xf32>, vector<16x8xf32>, vector<16x8xf32>, vector<16x8xf32>, vector<16x8xf32>, vector<16x8xf32> -> vector<128x8xf32>
    %53 = arith.truncf %52 : vector<128x8xf32> to vector<128x8xbf16>
    %54 = arith.truncf %43 : vector<128x128xf32> to vector<128x128xbf16>
    %cst_12 = arith.constant dense<0.000000e+00> : vector<128x8xf32>
    %55 = tpu.matmul %54, %53, %cst_12 {dimension_numbers = #tpu.dot_dimension_numbers<[1], [0], [0], [1], [0, 0, 1, 1], [], []>} : vector<128x128xbf16>, vector<128x8xbf16>, vector<128x8xf32> -> vector<128x8xf32>
    %56 = vector.extract_strided_slice %55 {offsets = [0, 0], sizes = [16, 8], strides = [1, 1]} : vector<128x8xf32> to vector<16x8xf32>
    %57 = vector.extract_strided_slice %55 {offsets = [16, 0], sizes = [16, 8], strides = [1, 1]} : vector<128x8xf32> to vector<16x8xf32>
    %58 = vector.extract_strided_slice %55 {offsets = [32, 0], sizes = [16, 8], strides = [1, 1]} : vector<128x8xf32> to vector<16x8xf32>
    %59 = vector.extract_strided_slice %55 {offsets = [48, 0], sizes = [16, 8], strides = [1, 1]} : vector<128x8xf32> to vector<16x8xf32>
    %60 = tpu.concatenate %56, %57, %58, %59 in 1 : vector<16x8xf32>, vector<16x8xf32>, vector<16x8xf32>, vector<16x8xf32> -> vector<16x32xf32>
    %61 = vector.extract_strided_slice %55 {offsets = [64, 0], sizes = [16, 8], strides = [1, 1]} : vector<128x8xf32> to vector<16x8xf32>
    %62 = vector.extract_strided_slice %55 {offsets = [80, 0], sizes = [16, 8], strides = [1, 1]} : vector<128x8xf32> to vector<16x8xf32>
    %63 = vector.extract_strided_slice %55 {offsets = [96, 0], sizes = [16, 8], strides = [1, 1]} : vector<128x8xf32> to vector<16x8xf32>
    %64 = vector.extract_strided_slice %55 {offsets = [112, 0], sizes = [16, 8], strides = [1, 1]} : vector<128x8xf32> to vector<16x8xf32>
    %65 = tpu.concatenate %61, %62, %63, %64 in 1 : vector<16x8xf32>, vector<16x8xf32>, vector<16x8xf32>, vector<16x8xf32> -> vector<16x32xf32>
    %66 = tpu.concatenate %60, %65 in 0 : vector<16x32xf32>, vector<16x32xf32> -> vector<32x32xf32>
    %67 = vector.extract_strided_slice %2 {offsets = [0, 96], sizes = [32, 32], strides = [1, 1]} : vector<32x256xf32> to vector<32x32xf32>
    %cst_13 = arith.constant dense<0.000000e+00> : vector<32x32xf32>
    %68 = tpu.matmul %66, %67, %cst_13 {dimension_numbers = #tpu.dot_dimension_numbers<[1], [0], [0], [1], [0, 0, 1, 1], [], []>} : vector<32x32xf32>, vector<32x32xf32>, vector<32x32xf32> -> vector<32x32xf32>
    %69 = vector.extract_strided_slice %4 {offsets = [1, 0], sizes = [1, 32], strides = [1, 1]} : vector<8x128xf32> to vector<1x32xf32>
    %70 = vector.broadcast %69 : vector<1x32xf32> to vector<32x32xf32>
    %71 = arith.addf %68, %70 : vector<32x32xf32>
    %72 = arith.addf %71, %0 : vector<32x32xf32>
    %73 = vector.extract_strided_slice %4 {offsets = [2, 0], sizes = [1, 32], strides = [1, 1]} : vector<8x128xf32> to vector<1x32xf32>
    %74 = vector.extract_strided_slice %4 {offsets = [3, 0], sizes = [1, 32], strides = [1, 1]} : vector<8x128xf32> to vector<1x32xf32>
    %cst_14 = arith.constant dense<0.000000e+00> : vector<32xf32>
    %75 = vector.multi_reduction <add>, %72, %cst_14 [1] : vector<32x32xf32> to vector<32xf32>
    %76 = vector.shape_cast %75 : vector<32xf32> to vector<32x1xf32>
    %cst_15 = arith.constant 3.200000e+01 : f32
    %77 = vector.broadcast %cst_15 : f32 to vector<32x1xf32>
    %78 = arith.divf %76, %77 : vector<32x1xf32>
    %79 = vector.broadcast %78 : vector<32x1xf32> to vector<32x32xf32>
    %80 = arith.subf %72, %79 : vector<32x32xf32>
    %81 = arith.mulf %80, %80 : vector<32x32xf32>
    %cst_16 = arith.constant dense<0.000000e+00> : vector<32xf32>
    %82 = vector.multi_reduction <add>, %81, %cst_16 [1] : vector<32x32xf32> to vector<32xf32>
    %83 = vector.shape_cast %82 : vector<32xf32> to vector<32x1xf32>
    %cst_17 = arith.constant 3.100000e+01 : f32
    %84 = vector.broadcast %cst_17 : f32 to vector<32x1xf32>
    %85 = arith.divf %83, %84 : vector<32x1xf32>
    %86 = math.sqrt %85 : vector<32x1xf32>
    %87 = vector.broadcast %73 : vector<1x32xf32> to vector<32x32xf32>
    %88 = arith.mulf %87, %80 : vector<32x32xf32>
    %cst_18 = arith.constant 9.99999997E-7 : f32
    %89 = vector.broadcast %cst_18 : f32 to vector<32x1xf32>
    %90 = arith.addf %86, %89 : vector<32x1xf32>
    %91 = vector.broadcast %90 : vector<32x1xf32> to vector<32x32xf32>
    %92 = arith.divf %88, %91 : vector<32x32xf32>
    %93 = vector.broadcast %74 : vector<1x32xf32> to vector<32x32xf32>
    %94 = arith.addf %92, %93 : vector<32x32xf32>
    %95 = vector.extract_strided_slice %2 {offsets = [0, 128], sizes = [32, 64], strides = [1, 1]} : vector<32x256xf32> to vector<32x64xf32>
    %cst_19 = arith.constant dense<0.000000e+00> : vector<32x64xf32>
    %96 = tpu.matmul %94, %95, %cst_19 {dimension_numbers = #tpu.dot_dimension_numbers<[1], [0], [0], [1], [0, 0, 1, 1], [], []>} : vector<32x32xf32>, vector<32x64xf32>, vector<32x64xf32> -> vector<32x64xf32>
    %97 = vector.extract_strided_slice %4 {offsets = [4, 0], sizes = [1, 64], strides = [1, 1]} : vector<8x128xf32> to vector<1x64xf32>
    %98 = vector.broadcast %97 : vector<1x64xf32> to vector<32x64xf32>
    %99 = arith.addf %96, %98 : vector<32x64xf32>
    %cst_20 = arith.constant 5.000000e-01 : f32
    %100 = vector.broadcast %cst_20 : f32 to vector<32x64xf32>
    %101 = arith.mulf %99, %100 : vector<32x64xf32>
    %cst_21 = arith.constant 0.707106769 : f32
    %102 = vector.broadcast %cst_21 : f32 to vector<32x64xf32>
    %103 = arith.mulf %99, %102 : vector<32x64xf32>
    %104 = math.erf %103 : vector<32x64xf32>
    %cst_22 = arith.constant 1.000000e+00 : f32
    %105 = vector.broadcast %cst_22 : f32 to vector<32x64xf32>
    %106 = arith.addf %105, %104 : vector<32x64xf32>
    %107 = arith.mulf %101, %106 : vector<32x64xf32>
    %108 = vector.extract_strided_slice %2 {offsets = [0, 192], sizes = [32, 32], strides = [1, 1]} : vector<32x256xf32> to vector<32x32xf32>
    %109 = vector.extract_strided_slice %2 {offsets = [0, 224], sizes = [32, 32], strides = [1, 1]} : vector<32x256xf32> to vector<32x32xf32>
    %110 = tpu.concatenate %108, %109 in 0 : vector<32x32xf32>, vector<32x32xf32> -> vector<64x32xf32>
    %cst_23 = arith.constant dense<0.000000e+00> : vector<32x32xf32>
    %111 = tpu.matmul %107, %110, %cst_23 {dimension_numbers = #tpu.dot_dimension_numbers<[1], [0], [0], [1], [0, 0, 1, 1], [], []>} : vector<32x64xf32>, vector<64x32xf32>, vector<32x32xf32> -> vector<32x32xf32>
    %112 = vector.extract_strided_slice %4 {offsets = [5, 0], sizes = [1, 32], strides = [1, 1]} : vector<8x128xf32> to vector<1x32xf32>
    %113 = vector.broadcast %112 : vector<1x32xf32> to vector<32x32xf32>
    %114 = arith.addf %111, %113 : vector<32x32xf32>
    %115 = arith.addf %114, %94 : vector<32x32xf32>
    %116 = vector.extract_strided_slice %4 {offsets = [6, 0], sizes = [1, 32], strides = [1, 1]} : vector<8x128xf32> to vector<1x32xf32>
    %117 = vector.extract_strided_slice %4 {offsets = [7, 0], sizes = [1, 32], strides = [1, 1]} : vector<8x128xf32> to vector<1x32xf32>
    %cst_24 = arith.constant dense<0.000000e+00> : vector<32xf32>
    %118 = vector.multi_reduction <add>, %115, %cst_24 [1] : vector<32x32xf32> to vector<32xf32>
    %119 = vector.shape_cast %118 : vector<32xf32> to vector<32x1xf32>
    %cst_25 = arith.constant 3.200000e+01 : f32
    %120 = vector.broadcast %cst_25 : f32 to vector<32x1xf32>
    %121 = arith.divf %119, %120 : vector<32x1xf32>
    %122 = vector.broadcast %121 : vector<32x1xf32> to vector<32x32xf32>
    %123 = arith.subf %115, %122 : vector<32x32xf32>
    %124 = arith.mulf %123, %123 : vector<32x32xf32>
    %cst_26 = arith.constant dense<0.000000e+00> : vector<32xf32>
    %125 = vector.multi_reduction <add>, %124, %cst_26 [1] : vector<32x32xf32> to vector<32xf32>
    %126 = vector.shape_cast %125 : vector<32xf32> to vector<32x1xf32>
    %cst_27 = arith.constant 3.100000e+01 : f32
    %127 = vector.broadcast %cst_27 : f32 to vector<32x1xf32>
    %128 = arith.divf %126, %127 : vector<32x1xf32>
    %129 = math.sqrt %128 : vector<32x1xf32>
    %130 = vector.broadcast %116 : vector<1x32xf32> to vector<32x32xf32>
    %131 = arith.mulf %130, %123 : vector<32x32xf32>
    %cst_28 = arith.constant 9.99999997E-7 : f32
    %132 = vector.broadcast %cst_28 : f32 to vector<32x1xf32>
    %133 = arith.addf %129, %132 : vector<32x1xf32>
    %134 = vector.broadcast %133 : vector<32x1xf32> to vector<32x32xf32>
    %135 = arith.divf %131, %134 : vector<32x32xf32>
    %136 = vector.broadcast %117 : vector<1x32xf32> to vector<32x32xf32>
    %137 = arith.addf %135, %136 : vector<32x32xf32>
    %c1 = arith.constant 1 : index
    %c0_29 = arith.constant 0 : index
    %c0_30 = arith.constant 0 : index
    %138 = vector.load %arg2[%c1, %c0_29, %c0_30] : memref<2x32x256xf32, #tpu.memory_space<vmem>>, vector<1x32x256xf32>
    %139 = vector.shape_cast %138 : vector<1x32x256xf32> to vector<32x256xf32>
    %c1_31 = arith.constant 1 : index
    %c0_32 = arith.constant 0 : index
    %c0_33 = arith.constant 0 : index
    %140 = vector.load %arg3[%c1_31, %c0_32, %c0_33] : memref<2x8x128xf32, #tpu.memory_space<vmem>>, vector<1x8x128xf32>
    %141 = vector.shape_cast %140 : vector<1x8x128xf32> to vector<8x128xf32>
    %142 = vector.extract_strided_slice %139 {offsets = [0, 0], sizes = [32, 96], strides = [1, 1]} : vector<32x256xf32> to vector<32x96xf32>
    %cst_34 = arith.constant dense<0.000000e+00> : vector<32x96xf32>
    %143 = tpu.matmul %137, %142, %cst_34 {dimension_numbers = #tpu.dot_dimension_numbers<[1], [0], [0], [1], [0, 0, 1, 1], [], []>} : vector<32x32xf32>, vector<32x96xf32>, vector<32x96xf32> -> vector<32x96xf32>
    %144 = vector.extract_strided_slice %141 {offsets = [0, 0], sizes = [1, 96], strides = [1, 1]} : vector<8x128xf32> to vector<1x96xf32>
    %145 = vector.broadcast %144 : vector<1x96xf32> to vector<32x96xf32>
    %146 = arith.addf %143, %145 : vector<32x96xf32>
    %147 = vector.extract_strided_slice %146 {offsets = [0, 0], sizes = [16, 8], strides = [1, 1]} : vector<32x96xf32> to vector<16x8xf32>
    %148 = vector.extract_strided_slice %146 {offsets = [0, 8], sizes = [16, 8], strides = [1, 1]} : vector<32x96xf32> to vector<16x8xf32>
    %149 = vector.extract_strided_slice %146 {offsets = [0, 16], sizes = [16, 8], strides = [1, 1]} : vector<32x96xf32> to vector<16x8xf32>
    %150 = vector.extract_strided_slice %146 {offsets = [0, 24], sizes = [16, 8], strides = [1, 1]} : vector<32x96xf32> to vector<16x8xf32>
    %151 = vector.extract_strided_slice %146 {offsets = [16, 0], sizes = [16, 8], strides = [1, 1]} : vector<32x96xf32> to vector<16x8xf32>
    %152 = vector.extract_strided_slice %146 {offsets = [16, 8], sizes = [16, 8], strides = [1, 1]} : vector<32x96xf32> to vector<16x8xf32>
    %153 = vector.extract_strided_slice %146 {offsets = [16, 16], sizes = [16, 8], strides = [1, 1]} : vector<32x96xf32> to vector<16x8xf32>
    %154 = vector.extract_strided_slice %146 {offsets = [16, 24], sizes = [16, 8], strides = [1, 1]} : vector<32x96xf32> to vector<16x8xf32>
    %155 = tpu.concatenate %147, %148, %149, %150, %151, %152, %153, %154 in 0 : vector<16x8xf32>, vector<16x8xf32>, vector<16x8xf32>, vector<16x8xf32>, vector<16x8xf32>, vector<16x8xf32>, vector<16x8xf32>, vector<16x8xf32> -> vector<128x8xf32>
    %156 = arith.truncf %155 : vector<128x8xf32> to vector<128x8xbf16>
    %157 = vector.extract_strided_slice %146 {offsets = [0, 32], sizes = [16, 8], strides = [1, 1]} : vector<32x96xf32> to vector<16x8xf32>
    %158 = vector.extract_strided_slice %146 {offsets = [0, 40], sizes = [16, 8], strides = [1, 1]} : vector<32x96xf32> to vector<16x8xf32>
    %159 = vector.extract_strided_slice %146 {offsets = [0, 48], sizes = [16, 8], strides = [1, 1]} : vector<32x96xf32> to vector<16x8xf32>
    %160 = vector.extract_strided_slice %146 {offsets = [0, 56], sizes = [16, 8], strides = [1, 1]} : vector<32x96xf32> to vector<16x8xf32>
    %161 = vector.extract_strided_slice %146 {offsets = [16, 32], sizes = [16, 8], strides = [1, 1]} : vector<32x96xf32> to vector<16x8xf32>
    %162 = vector.extract_strided_slice %146 {offsets = [16, 40], sizes = [16, 8], strides = [1, 1]} : vector<32x96xf32> to vector<16x8xf32>
    %163 = vector.extract_strided_slice %146 {offsets = [16, 48], sizes = [16, 8], strides = [1, 1]} : vector<32x96xf32> to vector<16x8xf32>
    %164 = vector.extract_strided_slice %146 {offsets = [16, 56], sizes = [16, 8], strides = [1, 1]} : vector<32x96xf32> to vector<16x8xf32>
    %165 = tpu.concatenate %157, %158, %159, %160, %161, %162, %163, %164 in 0 : vector<16x8xf32>, vector<16x8xf32>, vector<16x8xf32>, vector<16x8xf32>, vector<16x8xf32>, vector<16x8xf32>, vector<16x8xf32>, vector<16x8xf32> -> vector<128x8xf32>
    %166 = tpu.transpose %165, [1, 0] : vector<128x8xf32> -> vector<8x128xf32>
    %167 = arith.truncf %166 : vector<8x128xf32> to vector<8x128xbf16>
    %cst_35 = arith.constant dense<0.000000e+00> : vector<128x128xf32>
    %168 = tpu.matmul %156, %167, %cst_35 {dimension_numbers = #tpu.dot_dimension_numbers<[1], [0], [0], [1], [0, 0, 1, 1], [], []>} : vector<128x8xbf16>, vector<8x128xbf16>, vector<128x128xf32> -> vector<128x128xf32>
    %c0_36 = arith.constant 0 : index
    %c0_37 = arith.constant 0 : index
    %169 = vector.load %arg1[%c0_36, %c0_37] : memref<128x128xf32, #tpu.memory_space<vmem>>, vector<128x128xf32>
    %170 = arith.addf %168, %169 : vector<128x128xf32>
    %cst_38 = arith.constant dense<0xFF800000> : vector<128xf32>
    %171 = vector.multi_reduction <maximumf>, %170, %cst_38 [1] : vector<128x128xf32> to vector<128xf32>
    %172 = vector.shape_cast %171 : vector<128xf32> to vector<128x1xf32>
    %173 = vector.broadcast %172 : vector<128x1xf32> to vector<128x128xf32>
    %174 = arith.subf %170, %173 : vector<128x128xf32>
    %175 = math.exp %174 : vector<128x128xf32>
    %cst_39 = arith.constant dense<0.000000e+00> : vector<128xf32>
    %176 = vector.multi_reduction <add>, %175, %cst_39 [1] : vector<128x128xf32> to vector<128xf32>
    %177 = vector.shape_cast %176 : vector<128xf32> to vector<128x1xf32>
    %178 = tpu.reciprocal %177 {approx = true} : vector<128x1xf32> -> vector<128x1xf32>
    %179 = vector.broadcast %178 : vector<128x1xf32> to vector<128x128xf32>
    %180 = arith.mulf %175, %179 : vector<128x128xf32>
    %181 = vector.extract_strided_slice %146 {offsets = [0, 64], sizes = [16, 8], strides = [1, 1]} : vector<32x96xf32> to vector<16x8xf32>
    %182 = vector.extract_strided_slice %146 {offsets = [0, 72], sizes = [16, 8], strides = [1, 1]} : vector<32x96xf32> to vector<16x8xf32>
    %183 = vector.extract_strided_slice %146 {offsets = [0, 80], sizes = [16, 8], strides = [1, 1]} : vector<32x96xf32> to vector<16x8xf32>
    %184 = vector.extract_strided_slice %146 {offsets = [0, 88], sizes = [16, 8], strides = [1, 1]} : vector<32x96xf32> to vector<16x8xf32>
    %185 = vector.extract_strided_slice %146 {offsets = [16, 64], sizes = [16, 8], strides = [1, 1]} : vector<32x96xf32> to vector<16x8xf32>
    %186 = vector.extract_strided_slice %146 {offsets = [16, 72], sizes = [16, 8], strides = [1, 1]} : vector<32x96xf32> to vector<16x8xf32>
    %187 = vector.extract_strided_slice %146 {offsets = [16, 80], sizes = [16, 8], strides = [1, 1]} : vector<32x96xf32> to vector<16x8xf32>
    %188 = vector.extract_strided_slice %146 {offsets = [16, 88], sizes = [16, 8], strides = [1, 1]} : vector<32x96xf32> to vector<16x8xf32>
    %189 = tpu.concatenate %181, %182, %183, %184, %185, %186, %187, %188 in 0 : vector<16x8xf32>, vector<16x8xf32>, vector<16x8xf32>, vector<16x8xf32>, vector<16x8xf32>, vector<16x8xf32>, vector<16x8xf32>, vector<16x8xf32> -> vector<128x8xf32>
    %190 = arith.truncf %189 : vector<128x8xf32> to vector<128x8xbf16>
    %191 = arith.truncf %180 : vector<128x128xf32> to vector<128x128xbf16>
    %cst_40 = arith.constant dense<0.000000e+00> : vector<128x8xf32>
    %192 = tpu.matmul %191, %190, %cst_40 {dimension_numbers = #tpu.dot_dimension_numbers<[1], [0], [0], [1], [0, 0, 1, 1], [], []>} : vector<128x128xbf16>, vector<128x8xbf16>, vector<128x8xf32> -> vector<128x8xf32>
    %193 = vector.extract_strided_slice %192 {offsets = [0, 0], sizes = [16, 8], strides = [1, 1]} : vector<128x8xf32> to vector<16x8xf32>
    %194 = vector.extract_strided_slice %192 {offsets = [16, 0], sizes = [16, 8], strides = [1, 1]} : vector<128x8xf32> to vector<16x8xf32>
    %195 = vector.extract_strided_slice %192 {offsets = [32, 0], sizes = [16, 8], strides = [1, 1]} : vector<128x8xf32> to vector<16x8xf32>
    %196 = vector.extract_strided_slice %192 {offsets = [48, 0], sizes = [16, 8], strides = [1, 1]} : vector<128x8xf32> to vector<16x8xf32>
    %197 = tpu.concatenate %193, %194, %195, %196 in 1 : vector<16x8xf32>, vector<16x8xf32>, vector<16x8xf32>, vector<16x8xf32> -> vector<16x32xf32>
    %198 = vector.extract_strided_slice %192 {offsets = [64, 0], sizes = [16, 8], strides = [1, 1]} : vector<128x8xf32> to vector<16x8xf32>
    %199 = vector.extract_strided_slice %192 {offsets = [80, 0], sizes = [16, 8], strides = [1, 1]} : vector<128x8xf32> to vector<16x8xf32>
    %200 = vector.extract_strided_slice %192 {offsets = [96, 0], sizes = [16, 8], strides = [1, 1]} : vector<128x8xf32> to vector<16x8xf32>
    %201 = vector.extract_strided_slice %192 {offsets = [112, 0], sizes = [16, 8], strides = [1, 1]} : vector<128x8xf32> to vector<16x8xf32>
    %202 = tpu.concatenate %198, %199, %200, %201 in 1 : vector<16x8xf32>, vector<16x8xf32>, vector<16x8xf32>, vector<16x8xf32> -> vector<16x32xf32>
    %203 = tpu.concatenate %197, %202 in 0 : vector<16x32xf32>, vector<16x32xf32> -> vector<32x32xf32>
    %204 = vector.extract_strided_slice %139 {offsets = [0, 96], sizes = [32, 32], strides = [1, 1]} : vector<32x256xf32> to vector<32x32xf32>
    %cst_41 = arith.constant dense<0.000000e+00> : vector<32x32xf32>
    %205 = tpu.matmul %203, %204, %cst_41 {dimension_numbers = #tpu.dot_dimension_numbers<[1], [0], [0], [1], [0, 0, 1, 1], [], []>} : vector<32x32xf32>, vector<32x32xf32>, vector<32x32xf32> -> vector<32x32xf32>
    %206 = vector.extract_strided_slice %141 {offsets = [1, 0], sizes = [1, 32], strides = [1, 1]} : vector<8x128xf32> to vector<1x32xf32>
    %207 = vector.broadcast %206 : vector<1x32xf32> to vector<32x32xf32>
    %208 = arith.addf %205, %207 : vector<32x32xf32>
    %209 = arith.addf %208, %137 : vector<32x32xf32>
    %210 = vector.extract_strided_slice %141 {offsets = [2, 0], sizes = [1, 32], strides = [1, 1]} : vector<8x128xf32> to vector<1x32xf32>
    %211 = vector.extract_strided_slice %141 {offsets = [3, 0], sizes = [1, 32], strides = [1, 1]} : vector<8x128xf32> to vector<1x32xf32>
    %cst_42 = arith.constant dense<0.000000e+00> : vector<32xf32>
    %212 = vector.multi_reduction <add>, %209, %cst_42 [1] : vector<32x32xf32> to vector<32xf32>
    %213 = vector.shape_cast %212 : vector<32xf32> to vector<32x1xf32>
    %cst_43 = arith.constant 3.200000e+01 : f32
    %214 = vector.broadcast %cst_43 : f32 to vector<32x1xf32>
    %215 = arith.divf %213, %214 : vector<32x1xf32>
    %216 = vector.broadcast %215 : vector<32x1xf32> to vector<32x32xf32>
    %217 = arith.subf %209, %216 : vector<32x32xf32>
    %218 = arith.mulf %217, %217 : vector<32x32xf32>
    %cst_44 = arith.constant dense<0.000000e+00> : vector<32xf32>
    %219 = vector.multi_reduction <add>, %218, %cst_44 [1] : vector<32x32xf32> to vector<32xf32>
    %220 = vector.shape_cast %219 : vector<32xf32> to vector<32x1xf32>
    %cst_45 = arith.constant 3.100000e+01 : f32
    %221 = vector.broadcast %cst_45 : f32 to vector<32x1xf32>
    %222 = arith.divf %220, %221 : vector<32x1xf32>
    %223 = math.sqrt %222 : vector<32x1xf32>
    %224 = vector.broadcast %210 : vector<1x32xf32> to vector<32x32xf32>
    %225 = arith.mulf %224, %217 : vector<32x32xf32>
    %cst_46 = arith.constant 9.99999997E-7 : f32
    %226 = vector.broadcast %cst_46 : f32 to vector<32x1xf32>
    %227 = arith.addf %223, %226 : vector<32x1xf32>
    %228 = vector.broadcast %227 : vector<32x1xf32> to vector<32x32xf32>
    %229 = arith.divf %225, %228 : vector<32x32xf32>
    %230 = vector.broadcast %211 : vector<1x32xf32> to vector<32x32xf32>
    %231 = arith.addf %229, %230 : vector<32x32xf32>
    %232 = vector.extract_strided_slice %139 {offsets = [0, 128], sizes = [32, 64], strides = [1, 1]} : vector<32x256xf32> to vector<32x64xf32>
    %cst_47 = arith.constant dense<0.000000e+00> : vector<32x64xf32>
    %233 = tpu.matmul %231, %232, %cst_47 {dimension_numbers = #tpu.dot_dimension_numbers<[1], [0], [0], [1], [0, 0, 1, 1], [], []>} : vector<32x32xf32>, vector<32x64xf32>, vector<32x64xf32> -> vector<32x64xf32>
    %234 = vector.extract_strided_slice %141 {offsets = [4, 0], sizes = [1, 64], strides = [1, 1]} : vector<8x128xf32> to vector<1x64xf32>
    %235 = vector.broadcast %234 : vector<1x64xf32> to vector<32x64xf32>
    %236 = arith.addf %233, %235 : vector<32x64xf32>
    %cst_48 = arith.constant 5.000000e-01 : f32
    %237 = vector.broadcast %cst_48 : f32 to vector<32x64xf32>
    %238 = arith.mulf %236, %237 : vector<32x64xf32>
    %cst_49 = arith.constant 0.707106769 : f32
    %239 = vector.broadcast %cst_49 : f32 to vector<32x64xf32>
    %240 = arith.mulf %236, %239 : vector<32x64xf32>
    %241 = math.erf %240 : vector<32x64xf32>
    %cst_50 = arith.constant 1.000000e+00 : f32
    %242 = vector.broadcast %cst_50 : f32 to vector<32x64xf32>
    %243 = arith.addf %242, %241 : vector<32x64xf32>
    %244 = arith.mulf %238, %243 : vector<32x64xf32>
    %245 = vector.extract_strided_slice %139 {offsets = [0, 192], sizes = [32, 32], strides = [1, 1]} : vector<32x256xf32> to vector<32x32xf32>
    %246 = vector.extract_strided_slice %139 {offsets = [0, 224], sizes = [32, 32], strides = [1, 1]} : vector<32x256xf32> to vector<32x32xf32>
    %247 = tpu.concatenate %245, %246 in 0 : vector<32x32xf32>, vector<32x32xf32> -> vector<64x32xf32>
    %cst_51 = arith.constant dense<0.000000e+00> : vector<32x32xf32>
    %248 = tpu.matmul %244, %247, %cst_51 {dimension_numbers = #tpu.dot_dimension_numbers<[1], [0], [0], [1], [0, 0, 1, 1], [], []>} : vector<32x64xf32>, vector<64x32xf32>, vector<32x32xf32> -> vector<32x32xf32>
    %249 = vector.extract_strided_slice %141 {offsets = [5, 0], sizes = [1, 32], strides = [1, 1]} : vector<8x128xf32> to vector<1x32xf32>
    %250 = vector.broadcast %249 : vector<1x32xf32> to vector<32x32xf32>
    %251 = arith.addf %248, %250 : vector<32x32xf32>
    %252 = arith.addf %251, %231 : vector<32x32xf32>
    %253 = vector.extract_strided_slice %141 {offsets = [6, 0], sizes = [1, 32], strides = [1, 1]} : vector<8x128xf32> to vector<1x32xf32>
    %254 = vector.extract_strided_slice %141 {offsets = [7, 0], sizes = [1, 32], strides = [1, 1]} : vector<8x128xf32> to vector<1x32xf32>
    %cst_52 = arith.constant dense<0.000000e+00> : vector<32xf32>
    %255 = vector.multi_reduction <add>, %252, %cst_52 [1] : vector<32x32xf32> to vector<32xf32>
    %256 = vector.shape_cast %255 : vector<32xf32> to vector<32x1xf32>
    %cst_53 = arith.constant 3.200000e+01 : f32
    %257 = vector.broadcast %cst_53 : f32 to vector<32x1xf32>
    %258 = arith.divf %256, %257 : vector<32x1xf32>
    %259 = vector.broadcast %258 : vector<32x1xf32> to vector<32x32xf32>
    %260 = arith.subf %252, %259 : vector<32x32xf32>
    %261 = arith.mulf %260, %260 : vector<32x32xf32>
    %cst_54 = arith.constant dense<0.000000e+00> : vector<32xf32>
    %262 = vector.multi_reduction <add>, %261, %cst_54 [1] : vector<32x32xf32> to vector<32xf32>
    %263 = vector.shape_cast %262 : vector<32xf32> to vector<32x1xf32>
    %cst_55 = arith.constant 3.100000e+01 : f32
    %264 = vector.broadcast %cst_55 : f32 to vector<32x1xf32>
    %265 = arith.divf %263, %264 : vector<32x1xf32>
    %266 = math.sqrt %265 : vector<32x1xf32>
    %267 = vector.broadcast %253 : vector<1x32xf32> to vector<32x32xf32>
    %268 = arith.mulf %267, %260 : vector<32x32xf32>
    %cst_56 = arith.constant 9.99999997E-7 : f32
    %269 = vector.broadcast %cst_56 : f32 to vector<32x1xf32>
    %270 = arith.addf %266, %269 : vector<32x1xf32>
    %271 = vector.broadcast %270 : vector<32x1xf32> to vector<32x32xf32>
    %272 = arith.divf %268, %271 : vector<32x32xf32>
    %273 = vector.broadcast %254 : vector<1x32xf32> to vector<32x32xf32>
    %274 = arith.addf %272, %273 : vector<32x32xf32>
    %c0_57 = arith.constant 0 : index
    %c0_58 = arith.constant 0 : index
    %275 = vector.load %arg4[%c0_57, %c0_58] : memref<32x32xf32, #tpu.memory_space<vmem>>, vector<32x32xf32>
    tpu.vector_store %arg4[%c0_57, %c0_58], %274 {strides = array<i32>} : memref<32x32xf32, #tpu.memory_space<vmem>>, vector<32x32xf32>,
    return
  }
}

</mosaic_0001>

<bundles_post_ra>
// kernel: bert_tab_encoder.1
= control target key start
LH: loop header
LB: loop body
LE: loop exit
PB: predicated region body
PF: predicated region fallthrough
CT: control target
= control target key end

     0   :  { %vm36_vm0 = vcmask 261120   ;;  %s4330_s0 = inlined_call_operand.vmem [shape: f32[32,32], index: 0, kind: input, shape index: {}]   ;;  %s4331_s1 = inlined_call_operand.vmem [shape: f32[128,128], index: 1, kind: input, shape index: {}]   ;;  %s4332_s2 = inlined_call_operand.vmem [shape: f32[2,32,256], index: 2, kind: input, shape index: {}]   ;;  %s4333_s3 = inlined_call_operand.vmem [shape: f32[2,8,128], index: 3, kind: input, shape index: {}]   ;;  %s4334_s4 = inlined_call_operand.hbm [shape: f32[32,32], index: 4, kind: output, shape index: {}]  }
   0x1   :  { %v3334_v0 = vld [vmem:[%s4332_s2 + $0x30] sm:$0xff]  ;;  %v3339_v1 = vld [vmem:[%s4332_s2 + $0x20] sm:$0xff] }
   0x2   :  { %2806 = vmatprep.subr.mxu0 %v3334_v0  ;;  %v3345_v2 = vld [vmem:[%s4330_s0] sm:$0xff]  ;;  %v3351_v3 = vld [vmem:[%s4332_s2 + $0x10] sm:$0xff] }
   0x3   :  { %2807 = vmatpush3.msra.mxu0 %v3334_v0  ;;  %2814 = vmatprep.mubr.msk.f32.mxu0 %vm36_vm0, %v3345_v2 }
   0x4   :  { %2808 = vmatprep.subr.mxu0 %v3339_v1 }
   0x5   :  { %9 = vsyncpa [#allocation3], 0  ;;  %2809 = vmatpush3.msra.mxu0 %v3339_v1  ;;  %v3360_v4 = vld [vmem:[%s4332_s2] sm:$0xff]  ;;  %v3367_v5 = vld [vmem:[%s4330_s0 + $0x8] sm:$0xff]  ;;  %v32_v8 = vlaneseq  ;;  %vm279_vm1 = vcmask 64512   ;;  %s3296_s7 = smov 120  }
   0x6   :  { %2810 = vmatprep.subr.mxu0 %v3351_v3  ;;  %v3373_v6 = vld [vmem:[%s4330_s0 + $0x10] sm:$0xff]  ;;  %v3383_v7 = vld [vmem:[%s4330_s0 + $0x18] sm:$0xff]  ;;  %v3393_v11 = vld [vmem:[%s4333_s3] sm:$0xff]  ;;  %s3295_s0 = smov 112   ;;  %s3297_s8 = smov 104   ;;  %vm304_vm2 = vcmask 1043456  }
   0x7   :  { %2811 = vmatpush3.msra.mxu0 %v3351_v3  ;;  %v3387_v9 = vshrl.u32 %v32_v8, 7  ;;  %s3298_s9 = smov 96   ;;  %s3299_s10 = smov 64   ;;  %v265_v8 = vld [vmem:[%s4331_s1 + $0x10] sm:$0xff]  ;;  %vm712_vm3 = vcmask 130048   ;;  %vm715_vm4 = vcmask 195584  }
   0x8   :  { %2812 = vmatprep.subr.mxu0 %v3360_v4  ;;  %s3300_s21 = smov 32   ;;  %s3301_s22 = smov 8   ;;  %vm1128_vm13 = vcmask 523264  }
   0x9   :  { %2813 = vmatpush3.msra.mxu0 %v3360_v4  ;;  %v34_v10 = vsub.s32 0, %v3387_v9  ;;  %s3302_s23 = smov 24   ;;  %s3303_s24 = smov 16  }
   0xa   :  { %2815 = vmatmul.mubr.msk.f32.vlgmr.msra.gmra.mxu0 %vm36_vm0, %v3367_v5 }
   0xb   :  { %2817 = vmatprep.mubr.msk.f32.mxu0 %vm36_vm0, %v3373_v6  ;;  %v35_v12 = vrot.slane %v3393_v11, %v34_v10 }
   0xe   :  { %2818 = vmatmul.mubr.msk.f32.gmra.mxu0 %vm36_vm0, %v3383_v7 }
  0xca   :  { %v2816_v13 = vpop.f32.mrf.mxu0 }
  0xcb   :  { %v121_v15 = vadd.f32 %v2816_v13, %v35_v12 }
  0xcc   :  { %v115_v14 = vpop.f32.mrf.mxu0 }
  0xcd   :  { %v116_v16 = vadd.f32 %v115_v14, %v35_v12 }
  0xce   :  { %v2819_v18 = vpop.f32.mrf.mxu0 }
  0xcf   :  { %142 = vrot.lane.b32.xlu1 %v116_v16, %s3295_s0  ;;  %136 = vrot.lane.b32.xlu0 %v116_v16, %s3296_s7  ;;  %v3400_v17 = vpack.c.bf16 %v121_v15, %v116_v16  ;;  %v131_v19 = vadd.f32 %v2819_v18, %v35_v12 }
  0xd0   :  { %v125_v20 = vpop.f32.mrf.mxu0 }
  0xd1   :  { %2822 = vmatprep.mubr.msk.bf16.mxu1 %vm279_vm1, %v3400_v17  ;;  %v126_v21 = vadd.f32 %v125_v20, %v35_v12 }
  0xd3   :  { %144 = vrot.lane.b32.xlu1 %v121_v15, %s3295_s0  ;;  %138 = vrot.lane.b32.xlu0 %v121_v15, %s3296_s7  ;;  %v178_v37 = vpack.c.bf16 %v131_v19, %v126_v21 }
  0xd7   :  { %150 = vrot.lane.b32.xlu1 %v121_v15, %s3297_s8  ;;  %148 = vrot.lane.b32.xlu0 %v116_v16, %s3297_s8 }
  0xdb   :  { %158 = vrot.lane.b32.xlu1 %v131_v19, %s3296_s7  ;;  %182 = vrot.lane.b32.xlu0 %v116_v16, %s3298_s9 }
  0xdf   :  { %164 = vrot.lane.b32.xlu1 %v131_v19, %s3295_s0  ;;  %156 = vrot.lane.b32.xlu0 %v126_v21, %s3296_s7 }
  0xe3   :  { %170 = vrot.lane.b32.xlu1 %v131_v19, %s3297_s8  ;;  %162 = vrot.lane.b32.xlu0 %v126_v21, %s3295_s0 }
  0xe7   :  { %184 = vrot.lane.b32.xlu1 %v121_v15, %s3298_s9  ;;  %168 = vrot.lane.b32.xlu0 %v126_v21, %s3297_s8  ;;  %v263_v15 = vld [vmem:[%s4331_s1] sm:$0xff] }
  0xeb   :  { %198 = vrot.lane.b32.xlu0 %v126_v21, %s3298_s9 }
 0x141   :  { %v3417_v22 = vpop.permute.xlu1 %142  ;;  %v3419_v23 = vpop.permute.xlu0 %136 }
 0x142   :  { %186 = vrot.lane.b32.xlu0 %v3419_v23, %s3298_s9 }
 0x145   :  { %v3423_v24 = vpop.permute.xlu1 %144  ;;  %v3425_v25 = vpop.permute.xlu0 %138 }
 0x146   :  { %190 = vrot.lane.b32.xlu0 %v3417_v22, %s3298_s9  ;;  %188 = vrot.lane.b32.xlu1 %v3425_v25, %s3298_s9  ;;  %v3456_v58 = vpack.c.bf16 %v3425_v25, %v3419_v23  ;;  %v3460_v59 = vpack.c.bf16 %v3423_v24, %v3417_v22  ;;  %v264_v23 = vld [vmem:[%s4331_s1 + $0x8] sm:$0xff] }
 0x149   :  { %v3431_v26 = vpop.permute.xlu0 %148  ;;  %v3437_v27 = vpop.permute.xlu1 %150 }
 0x14a   :  { %192 = vrot.lane.b32.xlu1 %v3423_v24, %s3298_s9  ;;  %194 = vrot.lane.b32.xlu0 %v3431_v26, %s3298_s9  ;;  %v3468_v61 = vpack.c.bf16 %v3437_v27, %v3431_v26 }
 0x14d   :  { %v183_v28 = vpop.permute.xlu0 %182  ;;  %v159_v29 = vpop.permute.xlu1 %158 }
 0x14e   :  { %196 = vrot.lane.b32.xlu1 %v3437_v27, %s3298_s9  ;;  %v269_v27 = vld [vmem:[%s4331_s1 + $0x30] sm:$0xff] }
 0x151   :  { %v157_v30 = vpop.permute.xlu0 %156  ;;  %v165_v32 = vpop.permute.xlu1 %164 }
 0x152   :  { %200 = vrot.lane.b32.xlu1 %v131_v19, %s3298_s9  ;;  %202 = vrot.lane.b32.xlu0 %v157_v30, %s3298_s9  ;;  %v179_v53 = vpack.c.bf16 %v159_v29, %v157_v30  ;;  %v266_v19 = vld [vmem:[%s4331_s1 + $0x18] sm:$0xff] }
 0x155   :  { %v163_v31 = vpop.permute.xlu0 %162  ;;  %v171_v34 = vpop.permute.xlu1 %170 }
 0x156   :  { %204 = vrot.lane.b32.xlu1 %v159_v29, %s3298_s9  ;;  %206 = vrot.lane.b32.xlu0 %v163_v31, %s3298_s9  ;;  %v180_v36 = vpack.c.bf16 %v165_v32, %v163_v31  ;;  %v267_v31 = vld [vmem:[%s4331_s1 + $0x20] sm:$0xff] }
 0x159   :  { %v169_v33 = vpop.permute.xlu0 %168  ;;  %v185_v38 = vpop.permute.xlu1 %184 }
 0x15a   :  { %208 = vrot.lane.b32.xlu1 %v165_v32, %s3298_s9  ;;  %210 = vrot.lane.b32.xlu0 %v169_v33, %s3298_s9  ;;  %v181_v35 = vpack.c.bf16 %v171_v34, %v169_v33 }
 0x15d   :  { %v199_v39 = vpop.permute.xlu0 %198 }
 0x15e   :  { %212 = vrot.lane.b32.xlu1 %v171_v34, %s3298_s9 }
 0x162   :  { %579 = vrot.lane.b32.xlu1 %v181_v35, %s3299_s10 }
 0x166   :  { %577 = vrot.lane.b32.xlu1 %v180_v36, %s3299_s10 }
 0x16a   :  { %573 = vrot.lane.b32.xlu1 %v178_v37, %s3299_s10 }
 0x178   :  { %230 = vxpose.xlu0.b32.start [1/16] (narrow) %v183_v28, 8 }
 0x17c   :  { %231 = vxpose.xlu0.b32.cont [2/16] (narrow) %v185_v38, 8 }
 0x1b4   :  { %v187_v40 = vpop.permute.xlu0 %186 }
 0x1b5   :  { %232 = vxpose.xlu0.b32.cont [3/16] (narrow) %v187_v40, 8 }
 0x1b8   :  { %v189_v41 = vpop.permute.xlu1 %188  ;;  %v191_v42 = vpop.permute.xlu0 %190 }
 0x1b9   :  { %233 = vxpose.xlu0.b32.cont [4/16] (narrow) %v189_v41, 8  ;;  %v278_v41 = vld [vmem:[%s4331_s1 + $0x78] sm:$0xff] }
 0x1bc   :  { %v193_v43 = vpop.permute.xlu1 %192  ;;  %v195_v44 = vpop.permute.xlu0 %194 }
 0x1bd   :  { %234 = vxpose.xlu0.b32.cont [5/16] (narrow) %v191_v42, 8 }
 0x1c0   :  { %v197_v45 = vpop.permute.xlu1 %196 }
 0x1c1   :  { %235 = vxpose.xlu0.b32.cont [6/16] (narrow) %v193_v43, 8 }
 0x1c4   :  { %v201_v46 = vpop.permute.xlu1 %200  ;;  %v203_v47 = vpop.permute.xlu0 %202 }
 0x1c5   :  { %236 = vxpose.xlu0.b32.cont [7/16] (narrow) %v195_v44, 8 }
 0x1c8   :  { %v205_v48 = vpop.permute.xlu1 %204  ;;  %v207_v49 = vpop.permute.xlu0 %206 }
 0x1c9   :  { %237 = vxpose.xlu0.b32.cont [8/16] (narrow) %v197_v45, 8  ;;  %v273_v45 = vld [vmem:[%s4331_s1 + $0x50] sm:$0xff] }
 0x1cc   :  { %v209_v50 = vpop.permute.xlu1 %208  ;;  %v211_v51 = vpop.permute.xlu0 %210 }
 0x1cd   :  { %238 = vxpose.xlu0.b32.cont [9/16] (narrow) %v199_v39, 8  ;;  %v268_v39 = vld [vmem:[%s4331_s1 + $0x28] sm:$0xff] }
 0x1d0   :  { %v213_v52 = vpop.permute.xlu1 %212 }
 0x1d1   :  { %239 = vxpose.xlu0.b32.cont [10/16] (narrow) %v201_v46, 8 }
 0x1d4   :  { %v580_v56 = vpop.permute.xlu1 %579 }
 0x1d5   :  { %240 = vxpose.xlu0.b32.cont [11/16] (narrow) %v203_v47, 8  ;;  %v271_v47 = vld [vmem:[%s4331_s1 + $0x40] sm:$0xff] }
 0x1d8   :  { %v578_v60 = vpop.permute.xlu1 %577 }
 0x1d9   :  { %241 = vxpose.xlu0.b32.cont [12/16] (narrow) %v205_v48, 8 }
 0x1dc   :  { %v574_v63 = vpop.permute.xlu1 %573 }
 0x1dd   :  { %242 = vxpose.xlu0.b32.cont [13/16] (narrow) %v207_v49, 8  ;;  %v274_v49 = vld [vmem:[%s4331_s1 + $0x58] sm:$0xff] }
 0x1e1   :  { %243 = vxpose.xlu0.b32.cont [14/16] (narrow) %v209_v50, 8 }
 0x1e5   :  { %244 = vxpose.xlu0.b32.cont [15/16] (narrow) %v211_v51, 8  ;;  %v272_v51 = vld [vmem:[%s4331_s1 + $0x48] sm:$0xff] }
 0x1e9   :  { %245 = vxpose.xlu0.b32.end [16/16] (narrow) %v213_v52, 8 }
 0x212   :  { %575 = vrot.lane.b32.xlu0 %v179_v53, %s3299_s10 }
 0x229   :  { %v246_v54 = vpop.trf.xlu0 }
 0x22a   :  { %v262_v55 = vpack.c.bf16 %v246_v54, %v246_v54 }
 0x22c   :  { %3034 = vmatprep.subr.msk.bf16.mxu1 %vm304_vm2, %v262_v55  ;;  %v306_v57 = vsel %vm304_vm2, %v262_v55, 0  ;;  %v275_v55 = vld [vmem:[%s4331_s1 + $0x60] sm:$0xff] }
 0x22d   :  { %2821 = vmatpush3.bf16.msra.mxu1 %v306_v57 }
 0x22e   :  { %2838 = vmatprep.subr.bf16.mxu1 %v580_v56 }
 0x230   :  { %2823 = vmatmul.mubr.msk.bf16.vlgmr.msra.gmra.mxu1 %vm279_vm1, %v3456_v58 }
 0x231   :  { %2826 = vmatprep.mubr.msk.bf16.mxu1 %vm279_vm1, %v3460_v59  ;;  %2839 = vmatpush3.bf16.msra.mxu1 %v580_v56 }
 0x232   :  { %2840 = vmatprep.subr.bf16.mxu1 %v578_v60 }
 0x235   :  { %2841 = vmatpush3.bf16.msra.mxu1 %v578_v60  ;;  %v276_v60 = vld [vmem:[%s4331_s1 + $0x68] sm:$0xff] }
 0x238   :  { %2827 = vmatmul.mubr.msk.bf16.gmra.mxu1 %vm279_vm1, %v3468_v61 }
 0x239   :  { %2830 = vmatprep.mubr.msk.bf16.mxu1 %vm279_vm1, %v178_v37 }
 0x240   :  { %2831 = vmatmul.mubr.msk.bf16.gmra.mxu1 %vm279_vm1, %v179_v53  ;;  %v277_v53 = vld [vmem:[%s4331_s1 + $0x70] sm:$0xff] }
 0x241   :  { %2834 = vmatprep.mubr.msk.bf16.mxu1 %vm279_vm1, %v180_v36 }
 0x248   :  { %2835 = vmatmul.mubr.msk.bf16.gmra.mxu1 %vm279_vm1, %v181_v35  ;;  %v270_v35 = vld [vmem:[%s4331_s1 + $0x38] sm:$0xff] }
 0x284   :  { %v576_v62 = vpop.permute.xlu0 %575 }
 0x285   :  { %2842 = vmatprep.subr.bf16.mxu1 %v576_v62 }
 0x286   :  { %2843 = vmatpush3.bf16.msra.mxu1 %v576_v62 }
 0x287   :  { %2844 = vmatprep.subr.bf16.mxu1 %v574_v63 }
 0x28a   :  { %2845 = vmatpush3.bf16.msra.mxu1 %v574_v63 }
 0x2f0   :  { %v2824_v12 = vpop.f32.mrf.mxu1 }
 0x2f1   :  { %v3479_v13 = vadd.f32 %v2824_v12, %v265_v8 }
 0x2f2   :  { %v342_v14 = vpop.f32.mrf.mxu1 }
 0x2f3   :  { %409 = vmax.xlane.f32.xlu1 %v3479_v13  ;;  %v3485_v18 = vadd.f32 %v342_v14, %v263_v15 }
 0x2f4   :  { %v2825_v16 = vpop.f32.mrf.mxu1 }
 0x2f5   :  { %v3491_v22 = vadd.f32 %v2825_v16, %v266_v19 }
 0x2f6   :  { %v345_v20 = vpop.f32.mrf.mxu1 }
 0x2f7   :  { %405 = vmax.xlane.f32.xlu1 %v3485_v18  ;;  %v3497_v26 = vadd.f32 %v345_v20, %v264_v23 }
 0x2f8   :  { %v2828_v21 = vpop.f32.mrf.mxu1 }
 0x2f9   :  { %v3503_v30 = vadd.f32 %v2828_v21, %v269_v27 }
 0x2fa   :  { %v358_v24 = vpop.f32.mrf.mxu1 }
 0x2fb   :  { %411 = vmax.xlane.f32.xlu1 %v3491_v22  ;;  %v3509_v34 = vadd.f32 %v358_v24, %v267_v31 }
 0x2fc   :  { %v2829_v25 = vpop.f32.mrf.mxu1 }
 0x2fd   :  { %v3515_v38 = vadd.f32 %v2829_v25, %v270_v35 }
 0x2fe   :  { %v361_v28 = vpop.f32.mrf.mxu1 }
 0x2ff   :  { %407 = vmax.xlane.f32.xlu1 %v3497_v26  ;;  %v3524_v43 = vadd.f32 %v361_v28, %v268_v39 }
 0x300   :  { %v2832_v29 = vpop.f32.mrf.mxu1 }
 0x301   :  { %v3533_v46 = vadd.f32 %v2832_v29, %v273_v45 }
 0x302   :  { %v374_v32 = vpop.f32.mrf.mxu1 }
 0x303   :  { %417 = vmax.xlane.f32.xlu1 %v3503_v30  ;;  %v3539_v48 = vadd.f32 %v374_v32, %v271_v47 }
 0x304   :  { %v2833_v33 = vpop.f32.mrf.mxu1 }
 0x305   :  { %v3545_v50 = vadd.f32 %v2833_v33, %v274_v49 }
 0x306   :  { %v377_v36 = vpop.f32.mrf.mxu1 }
 0x307   :  { %413 = vmax.xlane.f32.xlu1 %v3509_v34  ;;  %v3551_v52 = vadd.f32 %v377_v36, %v272_v51 }
 0x308   :  { %v2836_v37 = vpop.f32.mrf.mxu1 }
 0x309   :  { %v3557_v54 = vadd.f32 %v2836_v37, %v277_v53 }
 0x30a   :  { %v390_v40 = vpop.f32.mrf.mxu1 }
 0x30b   :  { %419 = vmax.xlane.f32.xlu1 %v3515_v38  ;;  %v3563_v56 = vadd.f32 %v390_v40, %v275_v55 }
 0x30c   :  { %v2837_v42 = vpop.f32.mrf.mxu1 }
 0x30d   :  { %v3526_v44 = vadd.f32 %v2837_v42, %v278_v41 }
 0x30e   :  { %v393_v57 = vpop.f32.mrf.mxu1 }
 0x30f   :  { %435 = vmax.xlane.f32.xlu0 %v3526_v44  ;;  %415 = vmax.xlane.f32.xlu1 %v3524_v43  ;;  %v3571_v62 = vadd.f32 %v393_v57, %v276_v60 }
 0x313   :  { %425 = vmax.xlane.f32.xlu1 %v3533_v46 }
 0x317   :  { %421 = vmax.xlane.f32.xlu1 %v3539_v48 }
 0x31b   :  { %427 = vmax.xlane.f32.xlu1 %v3545_v50 }
 0x31f   :  { %423 = vmax.xlane.f32.xlu1 %v3551_v52 }
 0x323   :  { %433 = vmax.xlane.f32.xlu1 %v3557_v54 }
 0x325   :  { %571 = vrot.lane.b32.xlu0 %v3468_v61, %s3299_s10 }
 0x327   :  { %429 = vmax.xlane.f32.xlu1 %v3563_v56 }
 0x32b   :  { %431 = vmax.xlane.f32.xlu1 %v3571_v62 }
 0x33c   :  { %569 = vrot.lane.b32.xlu1 %v3460_v59, %s3299_s10 }
 0x37c   :  { %v410_v63 = vpop.xlane.xlu1 %409 }
 0x37d   :  { %v439_v8 = vsub.f32 %v3479_v13, %v410_v63 }
 0x37f   :  { %v457_v12 = vmul.f32 1.442695, %v439_v8 }
 0x380   :  { %v406_v14 = vpop.xlane.xlu1 %405 }
 0x381   :  { %3047 = vpow2.f32 %v457_v12  ;;  %v437_v61 = vsub.f32 %v3485_v18, %v406_v14 }
 0x383   :  { %v453_v15 = vmul.f32 1.442695, %v437_v61 }
 0x384   :  { %v412_v16 = vpop.xlane.xlu1 %411 }
 0x385   :  { %3049 = vpow2.f32 %v453_v15  ;;  %v440_v19 = vsub.f32 %v3491_v22, %v412_v16 }
 0x387   :  { %v459_v20 = vmul.f32 1.442695, %v440_v19 }
 0x388   :  { %v408_v21 = vpop.xlane.xlu1 %407 }
 0x389   :  { %3051 = vpow2.f32 %v459_v20  ;;  %v438_v23 = vsub.f32 %v3497_v26, %v408_v21 }
 0x38b   :  { %v455_v24 = vmul.f32 1.442695, %v438_v23 }
 0x38c   :  { %v418_v59 = vpop.xlane.xlu1 %417 }
 0x38d   :  { %3053 = vpow2.f32 %v455_v24  ;;  %v443_v13 = vsub.f32 %v3503_v30, %v418_v59 }
 0x38e   :  { %v3581_v25 = vpop.eup %3047 }
 0x38f   :  { %v465_v27 = vmul.f32 1.442695, %v443_v13  ;;  %489 = vadd.xlane.f32.xlu0 %v3581_v25 }
 0x390   :  { %v414_v18 = vpop.xlane.xlu1 %413 }
 0x391   :  { %3055 = vpow2.f32 %v465_v27  ;;  %v441_v28 = vsub.f32 %v3509_v34, %v414_v18 }
 0x392   :  { %v3585_v22 = vpop.eup %3049 }
 0x393   :  { %v461_v29 = vmul.f32 1.442695, %v441_v28  ;;  %485 = vadd.xlane.f32.xlu1 %v3585_v22 }
 0x394   :  { %v420_v26 = vpop.xlane.xlu1 %419 }
 0x395   :  { %3057 = vpow2.f32 %v461_v29  ;;  %v444_v31 = vsub.f32 %v3515_v38, %v420_v26 }
 0x396   :  { %v3589_v32 = vpop.eup %3051 }
 0x397   :  { %v467_v30 = vmul.f32 1.442695, %v444_v31  ;;  %491 = vadd.xlane.f32.xlu0 %v3589_v32 }
 0x398   :  { %v3592_v33 = vpop.xlane.xlu0 %435  ;;  %v416_v35 = vpop.xlane.xlu1 %415 }
 0x399   :  { %3059 = vpow2.f32 %v467_v30  ;;  %v442_v34 = vsub.f32 %v3524_v43, %v416_v35  ;;  %v452_v59 = vsub.f32 %v3526_v44, %v3592_v33 }
 0x39a   :  { %v3595_v36 = vpop.eup %3053 }
 0x39b   :  { %v463_v37 = vmul.f32 1.442695, %v442_v34  ;;  %487 = vadd.xlane.f32.xlu0 %v3595_v36  ;;  %v483_v27 = vmul.f32 1.442695, %v452_v59 }
 0x39c   :  { %v572_v39 = vpop.permute.xlu0 %571  ;;  %v426_v40 = vpop.xlane.xlu1 %425 }
 0x39d   :  { %v447_v38 = vsub.f32 %v3533_v46, %v426_v40  ;;  %2846 = vmatprep.subr.bf16.mxu1 %v572_v39  ;;  %3061 = vpow2.f32 %v463_v37 }
 0x39e   :  { %v3599_v41 = vpop.eup %3055  ;;  %2847 = vmatpush3.bf16.msra.mxu1 %v572_v39 }
 0x39f   :  { %v473_v42 = vmul.f32 1.442695, %v447_v38  ;;  %497 = vadd.xlane.f32.xlu1 %v3599_v41 }
 0x3a0   :  { %v422_v45 = vpop.xlane.xlu1 %421 }
 0x3a1   :  { %3063 = vpow2.f32 %v473_v42  ;;  %v445_v43 = vsub.f32 %v3539_v48, %v422_v45 }
 0x3a2   :  { %v3603_v47 = vpop.eup %3057 }
 0x3a3   :  { %v469_v49 = vmul.f32 1.442695, %v445_v43  ;;  %493 = vadd.xlane.f32.xlu1 %v3603_v47 }
 0x3a4   :  { %v428_v51 = vpop.xlane.xlu1 %427 }
 0x3a5   :  { %3065 = vpow2.f32 %v469_v49  ;;  %v448_v46 = vsub.f32 %v3545_v50, %v428_v51 }
 0x3a6   :  { %v3607_v53 = vpop.eup %3059 }
 0x3a7   :  { %v475_v55 = vmul.f32 1.442695, %v448_v46  ;;  %499 = vadd.xlane.f32.xlu0 %v3607_v53 }
 0x3a8   :  { %v424_v57 = vpop.xlane.xlu1 %423 }
 0x3a9   :  { %3067 = vpow2.f32 %v475_v55  ;;  %v446_v60 = vsub.f32 %v3551_v52, %v424_v57 }
 0x3aa   :  { %v3611_v63 = vpop.eup %3061 }
 0x3ab   :  { %v471_v48 = vmul.f32 1.442695, %v446_v60  ;;  %495 = vadd.xlane.f32.xlu0 %v3611_v63 }
 0x3ac   :  { %v434_v8 = vpop.xlane.xlu1 %433 }
 0x3ad   :  { %3069 = vpow2.f32 %v471_v48  ;;  %v451_v12 = vsub.f32 %v3557_v54, %v434_v8 }
 0x3ae   :  { %v3615_v14 = vpop.eup %3063 }
 0x3af   :  { %v481_v50 = vmul.f32 1.442695, %v451_v12  ;;  %505 = vadd.xlane.f32.xlu1 %v3615_v14 }
 0x3b0   :  { %v430_v61 = vpop.xlane.xlu1 %429 }
 0x3b1   :  { %3071 = vpow2.f32 %v481_v50  ;;  %v449_v15 = vsub.f32 %v3563_v56, %v430_v61 }
 0x3b2   :  { %v3619_v16 = vpop.eup %3065 }
 0x3b3   :  { %v477_v52 = vmul.f32 1.442695, %v449_v15  ;;  %501 = vadd.xlane.f32.xlu1 %v3619_v16 }
 0x3b4   :  { %v432_v19 = vpop.xlane.xlu1 %431 }
 0x3b5   :  { %3073 = vpow2.f32 %v477_v52  ;;  %v450_v24 = vsub.f32 %v3571_v62, %v432_v19 }
 0x3b6   :  { %v3622_v20 = vpop.eup %3067 }
 0x3b7   :  { %507 = vadd.xlane.f32.xlu0 %v3622_v20  ;;  %v479_v13 = vmul.f32 1.442695, %v450_v24 }
 0x3b8   :  { %v570_v54 = vpop.permute.xlu1 %569 }
 0x3b9   :  { %2848 = vmatprep.subr.bf16.mxu1 %v570_v54  ;;  %3075 = vpow2.f32 %v479_v13 }
 0x3ba   :  { %v3625_v21 = vpop.eup %3069  ;;  %2849 = vmatpush3.bf16.msra.mxu1 %v570_v54  ;;  %3077 = vpow2.f32 %v483_v27 }
 0x3bb   :  { %503 = vadd.xlane.f32.xlu0 %v3625_v21 }
 0x3be   :  { %v3628_v23 = vpop.eup %3071 }
 0x3bf   :  { %513 = vadd.xlane.f32.xlu1 %v3628_v23 }
 0x3c2   :  { %v3631_v56 = vpop.eup %3073 }
 0x3c3   :  { %509 = vadd.xlane.f32.xlu1 %v3631_v56 }
 0x3c6   :  { %v3641_v18 = vpop.eup %3075 }
 0x3c7   :  { %v3644_v28 = vpop.eup %3077 }
 0x3d1   :  { %567 = vrot.lane.b32.xlu0 %v3456_v58, %s3299_s10 }
 0x3d4   :  { %565 = vrot.lane.b32.xlu1 %v3400_v17, %s3299_s10 }
 0x3d8   :  { %760 = vrot.lane.b32.xlu1 %v3339_v1, %s3300_s21 }
 0x3f0   :  { %511 = vadd.xlane.f32.xlu0 %v3641_v18 }
 0x3f4   :  { %515 = vadd.xlane.f32.xlu0 %v3644_v28 }
 0x40a   :  { %762 = vrot.lane.b32.xlu0 %v3334_v0, %s3300_s21 }
 0x40e   :  { %758 = vrot.lane.b32.xlu0 %v3351_v3, %s3300_s21 }
 0x418   :  { %v490_v17 = vpop.xlane.xlu0 %489 }
 0x41c   :  { %v486_v58 = vpop.xlane.xlu1 %485 }
 0x41d   :  { %3079 = vrcp.f32 %v486_v58 }
 0x420   :  { %v492_v44 = vpop.xlane.xlu0 %491 }
 0x424   :  { %v488_v62 = vpop.xlane.xlu0 %487 }
 0x425   :  { %3081 = vrcp.f32 %v488_v62 }
 0x426   :  { %3083 = vrcp.f32 %v492_v44 }
 0x428   :  { %v498_v33 = vpop.xlane.xlu1 %497 }
 0x42a   :  { %v3080_v29 = vpop.eup %3079 }
 0x42b   :  { %v533_v31 = vmul.f32 %v3080_v29, %v3585_v22 }
 0x42c   :  { %v494_v0 = vpop.xlane.xlu1 %493 }
 0x430   :  { %v500_v35 = vpop.xlane.xlu0 %499 }
 0x432   :  { %v3082_v26 = vpop.eup %3081 }
 0x433   :  { %v534_v30 = vmul.f32 %v3082_v26, %v3595_v36  ;;  %v3084_v36 = vpop.eup %3083 }
 0x434   :  { %v496_v34 = vpop.xlane.xlu0 %495  ;;  %v536_v51 = vmul.f32 %v3084_v36, %v3589_v32 }
 0x435   :  { %v549_v1 = vpack.c.bf16 %v534_v30, %v533_v31  ;;  %3085 = vrcp.f32 %v496_v34 }
 0x436   :  { %3087 = vrcp.f32 %v490_v17 }
 0x437   :  { %2854 = vmatprep.mubr.bf16.mxu1 %v549_v1  ;;  %3089 = vrcp.f32 %v494_v0 }
 0x438   :  { %v506_v37 = vpop.xlane.xlu1 %505  ;;  %3091 = vrcp.f32 %v500_v35 }
 0x43c   :  { %v502_v39 = vpop.xlane.xlu1 %501 }
 0x440   :  { %v508_v3 = vpop.xlane.xlu0 %507 }
 0x442   :  { %v3086_v45 = vpop.eup %3085 }
 0x443   :  { %v3088_v43 = vpop.eup %3087  ;;  %v538_v55 = vmul.f32 %v3086_v45, %v3611_v63 }
 0x444   :  { %v504_v40 = vpop.xlane.xlu0 %503  ;;  %v3090_v49 = vpop.eup %3089  ;;  %v535_v57 = vmul.f32 %v3088_v43, %v3581_v25 }
 0x445   :  { %3093 = vrcp.f32 %v504_v40  ;;  %v537_v60 = vmul.f32 %v3090_v49, %v3603_v47  ;;  %v3092_v8 = vpop.eup %3091 }
 0x446   :  { %3095 = vrcp.f32 %v498_v33  ;;  %v550_v48 = vpack.c.bf16 %v536_v51, %v535_v57  ;;  %v540_v32 = vmul.f32 %v3092_v8, %v3607_v53 }
 0x447   :  { %3097 = vrcp.f32 %v502_v39  ;;  %v551_v12 = vpack.c.bf16 %v538_v55, %v537_v60 }
 0x448   :  { %v568_v38 = vpop.permute.xlu0 %567  ;;  %v514_v22 = vpop.xlane.xlu1 %513  ;;  %3099 = vrcp.f32 %v508_v3 }
 0x449   :  { %2850 = vmatprep.subr.bf16.mxu1 %v568_v38  ;;  %3101 = vrcp.f32 %v506_v37 }
 0x44a   :  { %2851 = vmatpush3.bf16.msra.mxu1 %v568_v38 }
 0x44c   :  { %v510_v42 = vpop.xlane.xlu1 %509 }
 0x44d   :  { %3103 = vrcp.f32 %v510_v42 }
 0x450   :  { %v566_v46 = vpop.permute.xlu1 %565 }
 0x451   :  { %2852 = vmatprep.subr.bf16.mxu1 %v566_v46 }
 0x452   :  { %2853 = vmatpush3.bf16.msra.mxu1 %v566_v46  ;;  %v3094_v50 = vpop.eup %3093 }
 0x453   :  { %v3096_v61 = vpop.eup %3095  ;;  %v542_v52 = vmul.f32 %v3094_v50, %v3625_v21 }
 0x454   :  { %v3098_v15 = vpop.eup %3097  ;;  %v539_v63 = vmul.f32 %v3096_v61, %v3599_v41  ;;  %v761_v30 = vpop.permute.xlu1 %760 }
 0x455   :  { %2855 = vmatmul.mubr.bf16.vlgmr.msra.gmra.mxu1 %v550_v48  ;;  %v541_v19 = vmul.f32 %v3098_v15, %v3619_v16  ;;  %v3100_v54 = vpop.eup %3099 }
 0x456   :  { %2858 = vmatprep.mubr.bf16.mxu1 %v551_v12  ;;  %v552_v25 = vpack.c.bf16 %v540_v32, %v539_v63  ;;  %v3102_v47 = vpop.eup %3101  ;;  %v544_v59 = vmul.f32 %v3100_v54, %v3622_v20 }
 0x457   :  { %v553_v24 = vpack.c.bf16 %v542_v52, %v541_v19  ;;  %v543_v13 = vmul.f32 %v3102_v47, %v3615_v14 }
 0x459   :  { %v554_v27 = vpack.c.bf16 %v544_v59, %v543_v13 }
 0x45a   :  { %v3104_v41 = vpop.eup %3103 }
 0x45b   :  { %v545_v17 = vmul.f32 %v3104_v41, %v3631_v56 }
 0x45d   :  { %2859 = vmatmul.mubr.bf16.gmra.mxu1 %v552_v25 }
 0x45e   :  { %2862 = vmatprep.mubr.bf16.mxu1 %v553_v24 }
 0x465   :  { %2863 = vmatmul.mubr.bf16.gmra.mxu1 %v554_v27  ;;  %v750_v27 = vsub.s32 1, %v3387_v9 }
 0x479   :  { %v512_v53 = vpop.xlane.xlu0 %511 }
 0x47a   :  { %3105 = vrcp.f32 %v512_v53  ;;  %v751_v53 = vrot.slane %v3393_v11, %v750_v27 }
 0x47b   :  { %3107 = vrcp.f32 %v514_v22 }
 0x47d   :  { %v516_v21 = vpop.xlane.xlu0 %515 }
 0x47e   :  { %3109 = vrcp.f32 %v516_v21 }
 0x481   :  { %v763_v31 = vpop.permute.xlu0 %762 }
 0x482   :  { %2870 = vmatprep.subr.mxu0 %v763_v31 }
 0x483   :  { %2871 = vmatpush3.msra.mxu0 %v763_v31 }
 0x484   :  { %2872 = vmatprep.subr.mxu0 %v761_v30 }
 0x485   :  { %2873 = vmatpush3.msra.mxu0 %v761_v30  ;;  %v759_v33 = vpop.permute.xlu0 %758 }
 0x486   :  { %2874 = vmatprep.subr.mxu0 %v759_v33 }
 0x487   :  { %v3106_v16 = vpop.eup %3105  ;;  %2875 = vmatpush3.msra.mxu0 %v759_v33 }
 0x488   :  { %v546_v58 = vmul.f32 %v3106_v16, %v3641_v18  ;;  %v3108_v44 = vpop.eup %3107 }
 0x489   :  { %v547_v14 = vmul.f32 %v3108_v44, %v3628_v23 }
 0x48a   :  { %v555_v62 = vpack.c.bf16 %v546_v58, %v545_v17 }
 0x48b   :  { %v3110_v29 = vpop.eup %3109 }
 0x48c   :  { %2866 = vmatprep.mubr.bf16.mxu1 %v555_v62  ;;  %v548_v20 = vmul.f32 %v3110_v29, %v3644_v28 }
 0x48e   :  { %v556_v26 = vpack.c.bf16 %v548_v20, %v547_v14 }
 0x490   :  { %2867 = vmatmul.mubr.bf16.gmra.mxu1 %v556_v26 }
 0x515   :  { %v2856_v56 = vpop.f32.mrf.mxu1 }
 0x516   :  { %688 = vrot.lane.b32.xlu1 %v2856_v56, %s3301_s22 }
 0x517   :  { %v623_v18 = vpop.f32.mrf.mxu1 }
 0x519   :  { %v2857_v1 = vpop.f32.mrf.mxu1 }
 0x51a   :  { %690 = vrot.lane.b32.xlu1 %v2857_v1, %s3301_s22 }
 0x51b   :  { %v626_v23 = vpop.f32.mrf.mxu1 }
 0x51d   :  { %v2860_v28 = vpop.f32.mrf.mxu1 }
 0x51e   :  { %704 = vrot.lane.b32.xlu0 %v2860_v28, %s3302_s23 }
 0x51f   :  { %v639_v35 = vpop.f32.mrf.mxu1 }
 0x521   :  { %v2861_v0 = vpop.f32.mrf.mxu1 }
 0x522   :  { %696 = vrot.lane.b32.xlu0 %v639_v35, %s3303_s24 }
 0x523   :  { %v642_v34 = vpop.f32.mrf.mxu1 }
 0x524   :  { %698 = vrot.lane.b32.xlu1 %v642_v34, %s3303_s24  ;;  %v3724_v34 = vld [vmem:[%s4332_s2 + $0x38] sm:$0xff] }
 0x525   :  { %v2864_v37 = vpop.f32.mrf.mxu1 }
 0x526   :  { %706 = vrot.lane.b32.xlu0 %v2861_v0, %s3302_s23 }
 0x527   :  { %v655_v3 = vpop.f32.mrf.mxu1 }
 0x528   :  { %756 = vrot.lane.b32.xlu1 %v3360_v4, %s3300_s21 }
 0x529   :  { %v2865_v39 = vpop.f32.mrf.mxu1 }
 0x52a   :  { %722 = vrot.lane.b32.xlu0 %v2865_v39, %s3301_s22  ;;  %v3744_v39 = vld [vmem:[%s4332_s2 + $0x8] sm:$0xff] }
 0x52b   :  { %v658_v40 = vpop.f32.mrf.mxu1 }
 0x52c   :  { %720 = vrot.lane.b32.xlu1 %v2864_v37, %s3301_s22  ;;  %v3730_v37 = vld [vmem:[%s4332_s2 + $0x28] sm:$0xff] }
 0x550   :  { %v2868_v38 = vpop.f32.mrf.mxu1 }
 0x552   :  { %v671_v22 = vpop.f32.mrf.mxu1 }
 0x553   :  { %728 = vrot.lane.b32.xlu1 %v671_v22, %s3303_s24 }
 0x554   :  { %v2869_v36 = vpop.f32.mrf.mxu1 }
 0x556   :  { %v674_v42 = vpop.f32.mrf.mxu1 }
 0x557   :  { %736 = vrot.lane.b32.xlu1 %v2868_v38, %s3302_s23  ;;  %730 = vrot.lane.b32.xlu0 %v674_v42, %s3303_s24 }
 0x55b   :  { %738 = vrot.lane.b32.xlu0 %v2869_v36, %s3302_s23 }
 0x588   :  { %v689_v45 = vpop.permute.xlu1 %688 }
 0x589   :  { %v710_v49 = vsel %vm279_vm1, %v623_v18, %v689_v45 }
 0x58c   :  { %v691_v43 = vpop.permute.xlu1 %690 }
 0x58d   :  { %v711_v60 = vsel %vm279_vm1, %v626_v23, %v691_v43 }
 0x590   :  { %v705_v4 = vpop.permute.xlu0 %704 }
 0x594   :  { %v697_v51 = vpop.permute.xlu0 %696 }
 0x595   :  { %v713_v46 = vsel %vm712_vm3, %v710_v49, %v697_v51 }
 0x596   :  { %v699_v55 = vpop.permute.xlu1 %698  ;;  %v716_v57 = vsel %vm715_vm4, %v713_v46, %v705_v4 }
 0x597   :  { %2878 = vmatprep.mubr.msk.f32.mxu0 %vm36_vm0, %v716_v57  ;;  %v714_v48 = vsel %vm712_vm3, %v711_v60, %v699_v55 }
 0x598   :  { %v707_v8 = vpop.permute.xlu0 %706 }
 0x599   :  { %v717_v50 = vsel %vm715_vm4, %v714_v48, %v707_v8 }
 0x59a   :  { %v757_v12 = vpop.permute.xlu1 %756 }
 0x59b   :  { %2876 = vmatprep.subr.mxu0 %v757_v12 }
 0x59c   :  { %2877 = vmatpush3.msra.mxu0 %v757_v12  ;;  %v723_v15 = vpop.permute.xlu0 %722 }
 0x59d   :  { %2879 = vmatmul.mubr.msk.f32.vlgmr.msra.gmra.mxu0 %vm36_vm0, %v717_v50  ;;  %v743_v24 = vsel %vm279_vm1, %v658_v40, %v723_v15  ;;  %2884 = vmatprep.subr.mxu0 %v3724_v34 }
 0x59e   :  { %v721_v61 = vpop.permute.xlu1 %720  ;;  %2885 = vmatpush3.msra.mxu0 %v3724_v34 }
 0x59f   :  { %v742_v52 = vsel %vm279_vm1, %v655_v3, %v721_v61  ;;  %2886 = vmatprep.subr.mxu0 %v3730_v37  ;;  %v3737_v3 = vld [vmem:[%s4332_s2 + $0x18] sm:$0xff] }
 0x5a0   :  { %2887 = vmatpush3.msra.mxu0 %v3730_v37 }
 0x5a1   :  { %2888 = vmatprep.subr.mxu0 %v3737_v3 }
 0x5a2   :  { %2889 = vmatpush3.msra.mxu0 %v3737_v3 }
 0x5a3   :  { %2890 = vmatprep.subr.mxu0 %v3744_v39 }
 0x5a4   :  { %2891 = vmatpush3.msra.mxu0 %v3744_v39 }
 0x5c5   :  { %v729_v32 = vpop.permute.xlu1 %728 }
 0x5c6   :  { %v744_v63 = vsel %vm712_vm3, %v742_v52, %v729_v32 }
 0x5c9   :  { %v731_v19 = vpop.permute.xlu0 %730  ;;  %v737_v25 = vpop.permute.xlu1 %736 }
 0x5ca   :  { %v746_v54 = vsel %vm715_vm4, %v744_v63, %v737_v25  ;;  %v745_v47 = vsel %vm712_vm3, %v743_v24, %v731_v19  ;;  %v941_v24 = vsub.s32 2, %v3387_v9 }
 0x5cb   :  { %2881 = vmatprep.mubr.msk.f32.mxu0 %vm36_vm0, %v746_v54 }
 0x5cd   :  { %v739_v59 = vpop.permute.xlu0 %738 }
 0x5ce   :  { %v747_v13 = vsel %vm715_vm4, %v745_v47, %v739_v59  ;;  %v3771_v47 = vld [vmem:[%s4333_s3] sm:$0xff] }
 0x5cf   :  { %2882 = vmatmul.mubr.msk.f32.gmra.mxu0 %vm36_vm0, %v747_v13  ;;  %v942_v59 = vrot.slane %v3771_v47, %v941_v24  ;;  %v961_v13 = vsub.s32 3, %v3387_v9 }
 0x65d   :  { %v2880_v21 = vpop.f32.mrf.mxu0 }
 0x65e   :  { %v852_v41 = vadd.f32 %v2880_v21, %v751_v53 }
 0x65f   :  { %v846_v16 = vpop.f32.mrf.mxu0 }
 0x660   :  { %v847_v17 = vadd.f32 %v846_v16, %v751_v53  ;;  %v866_v58 = vadd.f32 %v852_v41, %v3367_v5 }
 0x662   :  { %v865_v44 = vadd.f32 %v847_v17, %v3345_v2  ;;  %v872_v62 = vsel %vm36_vm0, %v866_v58, 0.0  ;;  %v962_v17 = vrot.slane %v3771_v47, %v961_v13 }
 0x663   :  { %873 = vadd.xlane.f32.xlu0 %v872_v62 }
 0x664   :  { %v869_v29 = vsel %vm36_vm0, %v865_v44, 0.0 }
 0x665   :  { %870 = vadd.xlane.f32.xlu1 %v869_v29 }
 0x68f   :  { %v2883_v14 = vpop.f32.mrf.mxu0 }
 0x690   :  { %v862_v20 = vadd.f32 %v2883_v14, %v751_v53 }
 0x691   :  { %v856_v26 = vpop.f32.mrf.mxu0 }
 0x692   :  { %v868_v31 = vadd.f32 %v862_v20, %v3383_v7  ;;  %v857_v11 = vadd.f32 %v856_v26, %v751_v53 }
 0x694   :  { %v878_v30 = vsel %vm36_vm0, %v868_v31, 0.0  ;;  %v867_v33 = vadd.f32 %v857_v11, %v3373_v6 }
 0x695   :  { %879 = vadd.xlane.f32.xlu1 %v878_v30 }
 0x696   :  { %v875_v5 = vsel %vm36_vm0, %v867_v33, 0.0 }
 0x697   :  { %876 = vadd.xlane.f32.xlu0 %v875_v5 }
 0x6ec   :  { %v874_v2 = vpop.xlane.xlu0 %873 }
 0x6ed   :  { %v883_v56 = vmul.f32 0.03125, %v874_v2 }
 0x6ee   :  { %v871_v18 = vpop.xlane.xlu1 %870 }
 0x6ef   :  { %v3711_v1 = vsub.f32 %v866_v58, %v883_v56  ;;  %v882_v23 = vmul.f32 0.03125, %v871_v18 }
 0x6f1   :  { %v3713_v28 = vsub.f32 %v865_v44, %v882_v23  ;;  %v891_v7 = vmul.f32 %v3711_v1, %v3711_v1  ;;  %v944_v21 = vmul.f32 %v942_v59, %v3711_v1 }
 0x6f3   :  { %v897_v35 = vsel %vm36_vm0, %v891_v7, 0.0  ;;  %v890_v6 = vmul.f32 %v3713_v28, %v3713_v28  ;;  %v943_v41 = vmul.f32 %v942_v59, %v3713_v28 }
 0x6f4   :  { %898 = vadd.xlane.f32.xlu1 %v897_v35 }
 0x6f5   :  { %v894_v0 = vsel %vm36_vm0, %v890_v6, 0.0 }
 0x6f6   :  { %895 = vadd.xlane.f32.xlu0 %v894_v0 }
 0x71e   :  { %v880_v40 = vpop.xlane.xlu1 %879 }
 0x71f   :  { %v885_v38 = vmul.f32 0.03125, %v880_v40 }
 0x720   :  { %v877_v22 = vpop.xlane.xlu0 %876 }
 0x721   :  { %v3749_v36 = vsub.f32 %v868_v31, %v885_v38  ;;  %v884_v42 = vmul.f32 0.03125, %v877_v22 }
 0x723   :  { %v3751_v45 = vsub.f32 %v867_v33, %v884_v42  ;;  %v893_v4 = vmul.f32 %v3749_v36, %v3749_v36  ;;  %v946_v38 = vmul.f32 %v942_v59, %v3749_v36 }
 0x725   :  { %v903_v43 = vsel %vm36_vm0, %v893_v4, 0.0  ;;  %v892_v49 = vmul.f32 %v3751_v45, %v3751_v45  ;;  %v945_v22 = vmul.f32 %v942_v59, %v3751_v45 }
 0x726   :  { %904 = vadd.xlane.f32.xlu1 %v903_v43 }
 0x727   :  { %v900_v51 = vsel %vm36_vm0, %v892_v49, 0.0 }
 0x728   :  { %901 = vadd.xlane.f32.xlu0 %v900_v51 }
 0x737   :  { %1096 = vrot.lane.b32.xlu1 %v3730_v37, %s3298_s9 }
 0x73b   :  { %1094 = vrot.lane.b32.xlu1 %v3737_v3, %s3298_s9 }
 0x73e   :  { %1098 = vrot.lane.b32.xlu0 %v3724_v34, %s3298_s9 }
 0x742   :  { %1092 = vrot.lane.b32.xlu0 %v3744_v39, %s3298_s9 }
 0x77d   :  { %v899_v46 = vpop.xlane.xlu1 %898 }
 0x77e   :  { %v908_v55 = vmul.f32 0.032258064, %v899_v46 }
 0x77f   :  { %v896_v57 = vpop.xlane.xlu0 %895 }
 0x780   :  { %3111 = vrsqrt.f32 %v908_v55  ;;  %v907_v60 = vmul.f32 0.032258064, %v896_v57  ;;  %vm920_vm5 = vcmp.eq.f32.partialorder %v908_v55, inf  ;;  %v923_v12 = vand.u32 2147483648, %v908_v55 }
 0x781   :  { %vm922_vm6 = vcmp.eq.f32.partialorder %v908_v55, 0.0 }
 0x782   :  { %3113 = vrsqrt.f32 %v907_v60  ;;  %vm913_vm7 = vcmp.eq.f32.partialorder %v907_v60, inf  ;;  %v916_v63 = vand.u32 2147483648, %v907_v60  ;;  %vm915_vm8 = vcmp.eq.f32.partialorder %v907_v60, 0.0 }
 0x78d   :  { %v3112_v48 = vpop.eup %3111 }
 0x78e   :  { %v919_v8 = vmul.f32 %v3112_v48, %v908_v55  ;;  %v969_v48 = vsub.s32 4, %v3387_v9 }
 0x78f   :  { %v3114_v50 = vpop.eup %3113 }
 0x790   :  { %v921_v61 = vsel %vm920_vm5, %v908_v55, %v919_v8  ;;  %v912_v32 = vmul.f32 %v3114_v50, %v907_v60  ;;  %v970_v8 = vrot.slane %v3771_v47, %v969_v48 }
 0x791   :  { %v924_v15 = vsel %vm922_vm6, %v923_v12, %v921_v61 }
 0x792   :  { %v948_v52 = vadd.f32 1e-06, %v924_v15  ;;  %v914_v19 = vsel %vm913_vm7, %v907_v60, %v912_v32 }
 0x793   :  { %v917_v25 = vsel %vm915_vm8, %v916_v63, %v914_v19 }
 0x794   :  { %3115 = vrcp.f32 %v948_v52  ;;  %v947_v54 = vadd.f32 1e-06, %v917_v25 }
 0x796   :  { %3117 = vrcp.f32 %v947_v54 }
 0x7a1   :  { %v3116_v53 = vpop.eup %3115 }
 0x7a2   :  { %v954_v58 = vmul.f32 %v3116_v53, %v944_v21 }
 0x7a3   :  { %v3118_v16 = vpop.eup %3117 }
 0x7a4   :  { %v952_v44 = vmul.f32 %v3118_v16, %v943_v41  ;;  %v3784_v29 = vadd.f32 %v962_v17, %v954_v58 }
 0x7a6   :  { %v3782_v62 = vadd.f32 %v962_v17, %v952_v44 }
 0x7a8   :  { %2892 = vmatprep.mubr.msk.f32.mxu0 %vm36_vm0, %v3782_v62 }
 0x7a9   :  { %2893 = vmatmul.mubr.msk.f32.vlgmr.msra.gmra.mxu0 %vm36_vm0, %v3784_v29 }
 0x7af   :  { %v905_v14 = vpop.xlane.xlu1 %904 }
 0x7b0   :  { %v910_v20 = vmul.f32 0.032258064, %v905_v14 }
 0x7b1   :  { %v902_v26 = vpop.xlane.xlu0 %901 }
 0x7b2   :  { %3119 = vrsqrt.f32 %v910_v20  ;;  %v909_v31 = vmul.f32 0.032258064, %v902_v26  ;;  %vm934_vm9 = vcmp.eq.f32.partialorder %v910_v20, inf  ;;  %v937_v18 = vand.u32 2147483648, %v910_v20 }
 0x7b3   :  { %v1097_v11 = vpop.permute.xlu1 %1096  ;;  %vm936_vm10 = vcmp.eq.f32.partialorder %v910_v20, 0.0 }
 0x7b4   :  { %1116 = vrot.lane.b32.xlu0 %v1097_v11, %s3299_s10  ;;  %3121 = vrsqrt.f32 %v909_v31  ;;  %vm927_vm11 = vcmp.eq.f32.partialorder %v909_v31, inf  ;;  %v930_v6 = vand.u32 2147483648, %v909_v31  ;;  %vm929_vm12 = vcmp.eq.f32.partialorder %v909_v31, 0.0 }
 0x7b5   :  { %v1099_v30 = vpop.permute.xlu0 %1098 }
 0x7b6   :  { %1118 = vrot.lane.b32.xlu1 %v1099_v30, %s3299_s10 }
 0x7b7   :  { %v1095_v33 = vpop.permute.xlu1 %1094 }
 0x7b9   :  { %v1093_v5 = vpop.permute.xlu0 %1092 }
 0x7ba   :  { %1114 = vrot.lane.b32.xlu1 %v1095_v33, %s3299_s10  ;;  %1112 = vrot.lane.b32.xlu0 %v1093_v5, %s3299_s10 }
 0x7be   :  { %1110 = vrot.lane.b32.xlu1 %v3724_v34, %s3299_s10  ;;  %1108 = vrot.lane.b32.xlu0 %v3730_v37, %s3299_s10 }
 0x7bf   :  { %v3120_v2 = vpop.eup %3119 }
 0x7c0   :  { %v933_v56 = vmul.f32 %v3120_v2, %v910_v20 }
 0x7c1   :  { %v3122_v1 = vpop.eup %3121 }
 0x7c2   :  { %v935_v23 = vsel %vm934_vm9, %v910_v20, %v933_v56  ;;  %1106 = vrot.lane.b32.xlu1 %v3737_v3, %s3299_s10  ;;  %1104 = vrot.lane.b32.xlu0 %v3744_v39, %s3299_s10  ;;  %v926_v7 = vmul.f32 %v3122_v1, %v909_v31 }
 0x7c3   :  { %v938_v28 = vsel %vm936_vm10, %v937_v18, %v935_v23  ;;  %v1102_v18 = vsub.s32 5, %v3387_v9 }
 0x7c4   :  { %v950_v35 = vadd.f32 1e-06, %v938_v28  ;;  %v928_v0 = vsel %vm927_vm11, %v909_v31, %v926_v7 }
 0x7c5   :  { %v931_v34 = vsel %vm929_vm12, %v930_v6, %v928_v0  ;;  %v1103_v1 = vrot.slane %v3771_v47, %v1102_v18 }
 0x7c6   :  { %3123 = vrcp.f32 %v950_v35  ;;  %v949_v37 = vadd.f32 1e-06, %v931_v34 }
 0x7c8   :  { %3125 = vrcp.f32 %v949_v37 }
 0x7d3   :  { %v3124_v40 = vpop.eup %3123 }
 0x7d4   :  { %v958_v42 = vmul.f32 %v3124_v40, %v946_v38 }
 0x7d5   :  { %v3126_v3 = vpop.eup %3125 }
 0x7d6   :  { %v956_v4 = vmul.f32 %v3126_v3, %v945_v22  ;;  %v3806_v43 = vadd.f32 %v962_v17, %v958_v42 }
 0x7d8   :  { %v3804_v39 = vadd.f32 %v962_v17, %v956_v4 }
 0x7da   :  { %2895 = vmatprep.mubr.msk.f32.mxu0 %vm36_vm0, %v3804_v39 }
 0x7db   :  { %2896 = vmatmul.mubr.msk.f32.gmra.mxu0 %vm36_vm0, %v3806_v43 }
 0x826   :  { %v1117_v49 = vpop.permute.xlu0 %1116 }
 0x828   :  { %v1119_v51 = vpop.permute.xlu1 %1118 }
 0x829   :  { %2898 = vmatprep.subr.mxu0 %v1119_v51 }
 0x82a   :  { %2899 = vmatpush3.msra.mxu0 %v1119_v51 }
 0x82b   :  { %2900 = vmatprep.subr.mxu0 %v1117_v49 }
 0x82c   :  { %2901 = vmatpush3.msra.mxu0 %v1117_v49  ;;  %v1115_v36 = vpop.permute.xlu1 %1114  ;;  %v1113_v45 = vpop.permute.xlu0 %1112 }
 0x82d   :  { %2902 = vmatprep.subr.mxu0 %v1115_v36 }
 0x82e   :  { %2903 = vmatpush3.msra.mxu0 %v1115_v36 }
 0x82f   :  { %2904 = vmatprep.subr.mxu0 %v1113_v45 }
 0x830   :  { %2905 = vmatpush3.msra.mxu0 %v1113_v45  ;;  %v1111_v46 = vpop.permute.xlu1 %1110  ;;  %v1109_v55 = vpop.permute.xlu0 %1108 }
 0x831   :  { %2906 = vmatprep.subr.mxu0 %v1111_v46 }
 0x832   :  { %2907 = vmatpush3.msra.mxu0 %v1111_v46 }
 0x833   :  { %2908 = vmatprep.subr.mxu0 %v1109_v55 }
 0x834   :  { %2909 = vmatpush3.msra.mxu0 %v1109_v55  ;;  %v1107_v57 = vpop.permute.xlu1 %1106  ;;  %v1105_v60 = vpop.permute.xlu0 %1104 }
 0x835   :  { %2910 = vmatprep.subr.mxu0 %v1107_v57 }
 0x836   :  { %2911 = vmatpush3.msra.mxu0 %v1107_v57 }
 0x837   :  { %2912 = vmatprep.subr.mxu0 %v1105_v60 }
 0x838   :  { %2913 = vmatpush3.msra.mxu0 %v1105_v60 }
 0x869   :  { %v2894_v12 = vpop.f32.mrf.mxu0 }
 0x86a   :  { %v1055_v50 = vadd.f32 %v2894_v12, %v970_v8  ;;  %v3842_v12 = vld [vmem:[%s4332_s2 + $0x60] sm:$0xff] }
 0x86b   :  { %v1049_v61 = vpop.f32.mrf.mxu0 }
 0x86c   :  { %v1073_v15 = vmul.f32 0.70710677, %v1055_v50  ;;  %v1050_v32 = vadd.f32 %v1049_v61, %v970_v8  ;;  %v1069_v53 = vmul.f32 0.5, %v1055_v50  ;;  %v3849_v50 = vld [vmem:[%s4332_s2 + $0x50] sm:$0xff]  ;;  %v3856_v61 = vld [vmem:[%s4332_s2 + $0x40] sm:$0xff] }
 0x86e   :  { %3127 = verf.f32 %v1073_v15  ;;  %v1072_v52 = vmul.f32 0.70710677, %v1050_v32  ;;  %v1068_v54 = vmul.f32 0.5, %v1050_v32 }
 0x870   :  { %3129 = verf.f32 %v1072_v52 }
 0x87b   :  { %v3128_v63 = vpop.eup %3127 }
 0x87c   :  { %v1081_v25 = vadd.f32 1.0, %v3128_v63 }
 0x87d   :  { %v3130_v19 = vpop.eup %3129 }
 0x87e   :  { %v1080_v59 = vadd.f32 1.0, %v3130_v19  ;;  %v1085_v41 = vmul.f32 %v1081_v25, %v1069_v53 }
 0x880   :  { %v1084_v21 = vmul.f32 %v1080_v59, %v1068_v54 }
 0x882   :  { %2914 = vmatprep.mubr.msk.f32.mxu0 %vm1128_vm13, %v1084_v21 }
 0x883   :  { %2915 = vmatmul.mubr.msk.f32.vlgmr.msra.gmra.mxu0 %vm1128_vm13, %v1085_v41 }
 0x89b   :  { %v2897_v16 = vpop.f32.mrf.mxu0 }
 0x89c   :  { %v1065_v17 = vadd.f32 %v2897_v16, %v970_v8 }
 0x89d   :  { %v1059_v58 = vpop.f32.mrf.mxu0 }
 0x89e   :  { %v1075_v44 = vmul.f32 0.70710677, %v1065_v17  ;;  %v1060_v14 = vadd.f32 %v1059_v58, %v970_v8  ;;  %v1071_v5 = vmul.f32 0.5, %v1065_v17 }
 0x8a0   :  { %3131 = verf.f32 %v1075_v44  ;;  %v1074_v20 = vmul.f32 0.70710677, %v1060_v14  ;;  %v1070_v30 = vmul.f32 0.5, %v1060_v14 }
 0x8a2   :  { %3133 = verf.f32 %v1074_v20 }
 0x8ad   :  { %v3132_v26 = vpop.eup %3131 }
 0x8ae   :  { %v1083_v11 = vadd.f32 1.0, %v3132_v26 }
 0x8af   :  { %v3134_v31 = vpop.eup %3133 }
 0x8b0   :  { %v1082_v33 = vadd.f32 1.0, %v3134_v31  ;;  %v1087_v56 = vmul.f32 %v1083_v11, %v1071_v5 }
 0x8b2   :  { %v1086_v2 = vmul.f32 %v1082_v33, %v1070_v30 }
 0x8b4   :  { %2917 = vmatprep.mubr.msk.f32.mxu0 %vm1128_vm13, %v1086_v2 }
 0x8b5   :  { %2918 = vmatmul.mubr.msk.f32.gmra.mxu0 %vm1128_vm13, %v1087_v56 }
 0x943   :  { %v2916_v23 = vpop.f32.mrf.mxu0 }
 0x944   :  { %v1213_v28 = vadd.f32 %v2916_v23, %v1103_v1  ;;  %v1300_v23 = vsub.s32 6, %v3387_v9 }
 0x945   :  { %v1207_v7 = vpop.f32.mrf.mxu0 }
 0x946   :  { %v1208_v35 = vadd.f32 %v1207_v7, %v1103_v1  ;;  %v1227_v6 = vadd.f32 %v1213_v28, %v3784_v29  ;;  %v1301_v28 = vrot.slane %v3771_v47, %v1300_v23  ;;  %v1320_v7 = vsub.s32 7, %v3387_v9 }
 0x948   :  { %v1226_v0 = vadd.f32 %v1208_v35, %v3782_v62  ;;  %v1233_v34 = vsel %vm36_vm0, %v1227_v6, 0.0 }
 0x949   :  { %1234 = vadd.xlane.f32.xlu0 %v1233_v34 }
 0x94a   :  { %v1230_v37 = vsel %vm36_vm0, %v1226_v0, 0.0 }
 0x94b   :  { %1231 = vadd.xlane.f32.xlu1 %v1230_v37  ;;  %v1321_v37 = vrot.slane %v3771_v47, %v1320_v7 }
 0x975   :  { %v2919_v40 = vpop.f32.mrf.mxu0 }
 0x976   :  { %v1223_v38 = vadd.f32 %v2919_v40, %v1103_v1 }
 0x977   :  { %v1217_v22 = vpop.f32.mrf.mxu0 }
 0x978   :  { %v1229_v3 = vadd.f32 %v1223_v38, %v3806_v43  ;;  %v1218_v42 = vadd.f32 %v1217_v22, %v1103_v1 }
 0x97a   :  { %v1239_v4 = vsel %vm36_vm0, %v1229_v3, 0.0  ;;  %v1228_v49 = vadd.f32 %v1218_v42, %v3804_v39  ;;  %v3837_v39 = vld [vmem:[%s4332_s2 + $0x70] sm:$0xff] }
 0x97b   :  { %1240 = vadd.xlane.f32.xlu1 %v1239_v4  ;;  %2920 = vmatprep.subr.mxu0 %v3837_v39 }
 0x97c   :  { %v1236_v29 = vsel %vm36_vm0, %v1228_v49, 0.0  ;;  %2921 = vmatpush3.msra.mxu0 %v3837_v39 }
 0x97d   :  { %1237 = vadd.xlane.f32.xlu0 %v1236_v29  ;;  %2922 = vmatprep.subr.mxu0 %v3842_v12 }
 0x97e   :  { %2923 = vmatpush3.msra.mxu0 %v3842_v12 }
 0x97f   :  { %2924 = vmatprep.subr.mxu0 %v3849_v50 }
 0x980   :  { %2925 = vmatpush3.msra.mxu0 %v3849_v50 }
 0x981   :  { %2926 = vmatprep.subr.mxu0 %v3856_v61 }
 0x982   :  { %2927 = vmatpush3.msra.mxu0 %v3856_v61 }
 0x9d2   :  { %v1235_v62 = vpop.xlane.xlu0 %1234 }
 0x9d3   :  { %v1243_v51 = vmul.f32 0.03125, %v1235_v62 }
 0x9d4   :  { %v1232_v36 = vpop.xlane.xlu1 %1231 }
 0x9d5   :  { %v1247_v45 = vsub.f32 %v1227_v6, %v1243_v51  ;;  %v1242_v46 = vmul.f32 0.03125, %v1232_v36 }
 0x9d7   :  { %v1246_v55 = vsub.f32 %v1226_v0, %v1242_v46  ;;  %v1251_v57 = vmul.f32 %v1247_v45, %v1247_v45  ;;  %v1303_v6 = vmul.f32 %v1301_v28, %v1247_v45 }
 0x9d9   :  { %v1257_v60 = vsel %vm36_vm0, %v1251_v57, 0.0  ;;  %v1250_v8 = vmul.f32 %v1246_v55, %v1246_v55  ;;  %v1302_v0 = vmul.f32 %v1301_v28, %v1246_v55 }
 0x9da   :  { %1258 = vadd.xlane.f32.xlu1 %v1257_v60 }
 0x9db   :  { %v1254_v43 = vsel %vm36_vm0, %v1250_v8, 0.0 }
 0x9dc   :  { %1255 = vadd.xlane.f32.xlu0 %v1254_v43 }
 0xa04   :  { %v1241_v15 = vpop.xlane.xlu1 %1240 }
 0xa05   :  { %v1245_v32 = vmul.f32 0.03125, %v1241_v15 }
 0xa06   :  { %v1238_v52 = vpop.xlane.xlu0 %1237 }
 0xa07   :  { %v3862_v63 = vsub.f32 %v1229_v3, %v1245_v32  ;;  %v1244_v19 = vmul.f32 0.03125, %v1238_v52 }
 0xa09   :  { %v3864_v25 = vsub.f32 %v1228_v49, %v1244_v19  ;;  %v1253_v54 = vmul.f32 %v3862_v63, %v3862_v63  ;;  %v1305_v52 = vmul.f32 %v1301_v28, %v3862_v63 }
 0xa0b   :  { %v1263_v59 = vsel %vm36_vm0, %v1253_v54, 0.0  ;;  %v1252_v53 = vmul.f32 %v3864_v25, %v3864_v25  ;;  %v1304_v19 = vmul.f32 %v1301_v28, %v3864_v25 }
 0xa0c   :  { %1264 = vadd.xlane.f32.xlu1 %v1263_v59 }
 0xa0d   :  { %v1260_v21 = vsel %vm36_vm0, %v1252_v53, 0.0 }
 0xa0e   :  { %1261 = vadd.xlane.f32.xlu0 %v1260_v21 }
 0xa63   :  { %v1259_v41 = vpop.xlane.xlu1 %1258 }
 0xa64   :  { %v1267_v16 = vmul.f32 0.032258064, %v1259_v41 }
 0xa65   :  { %v1256_v17 = vpop.xlane.xlu0 %1255 }
 0xa66   :  { %3135 = vrsqrt.f32 %v1267_v16  ;;  %v1266_v58 = vmul.f32 0.032258064, %v1256_v17  ;;  %vm1279_vm14 = vcmp.eq.f32.partialorder %v1267_v16, inf  ;;  %v1282_v20 = vand.u32 2147483648, %v1267_v16 }
 0xa67   :  { %vm1281_vm15 = vcmp.eq.f32.partialorder %v1267_v16, 0.0 }
 0xa68   :  { %3137 = vrsqrt.f32 %v1266_v58  ;;  %vm1272_vm5 = vcmp.eq.f32.partialorder %v1266_v58, inf  ;;  %v1275_v5 = vand.u32 2147483648, %v1266_v58  ;;  %vm1274_vm6 = vcmp.eq.f32.partialorder %v1266_v58, 0.0 }
 0xa73   :  { %v3136_v44 = vpop.eup %3135 }
 0xa74   :  { %v1278_v14 = vmul.f32 %v3136_v44, %v1267_v16 }
 0xa75   :  { %v3138_v26 = vpop.eup %3137 }
 0xa76   :  { %v1280_v31 = vsel %vm1279_vm14, %v1267_v16, %v1278_v14  ;;  %v1271_v30 = vmul.f32 %v3138_v26, %v1266_v58  ;;  %v3901_v16 = vld [vmem:[%s4333_s3 + $0x8] sm:$0xff] }
 0xa77   :  { %v1283_v11 = vsel %vm1281_vm15, %v1282_v20, %v1280_v31  ;;  %v1340_v63 = vrot.slane %v3901_v16, %v34_v10 }
 0xa78   :  { %v1307_v33 = vadd.f32 1e-06, %v1283_v11  ;;  %v1273_v2 = vsel %vm1272_vm5, %v1266_v58, %v1271_v30 }
 0xa79   :  { %v1276_v56 = vsel %vm1274_vm6, %v1275_v5, %v1273_v2 }
 0xa7a   :  { %3139 = vrcp.f32 %v1307_v33  ;;  %v1306_v1 = vadd.f32 1e-06, %v1276_v56 }
 0xa7c   :  { %3141 = vrcp.f32 %v1306_v1 }
 0xa87   :  { %v3140_v35 = vpop.eup %3139 }
 0xa88   :  { %v1313_v40 = vmul.f32 %v3140_v35, %v1303_v6 }
 0xa89   :  { %v3142_v34 = vpop.eup %3141 }
 0xa8a   :  { %v1311_v38 = vmul.f32 %v3142_v34, %v1302_v0  ;;  %v3882_v3 = vadd.f32 %v1321_v37, %v1313_v40 }
 0xa8c   :  { %v3880_v22 = vadd.f32 %v1321_v37, %v1311_v38 }
 0xa8e   :  { %2928 = vmatprep.mubr.msk.f32.mxu0 %vm36_vm0, %v3880_v22 }
 0xa8f   :  { %2929 = vmatmul.mubr.msk.f32.vlgmr.msra.gmra.mxu0 %vm36_vm0, %v3882_v3 }
 0xa95   :  { %v1265_v42 = vpop.xlane.xlu1 %1264 }
 0xa96   :  { %v1269_v4 = vmul.f32 0.032258064, %v1265_v42 }
 0xa97   :  { %v1262_v49 = vpop.xlane.xlu0 %1261 }
 0xa98   :  { %3143 = vrsqrt.f32 %v1269_v4  ;;  %v1268_v29 = vmul.f32 0.032258064, %v1262_v49  ;;  %vm1293_vm7 = vcmp.eq.f32.partialorder %v1269_v4, inf  ;;  %v1296_v51 = vand.u32 2147483648, %v1269_v4 }
 0xa99   :  { %vm1295_vm8 = vcmp.eq.f32.partialorder %v1269_v4, 0.0 }
 0xa9a   :  { %3145 = vrsqrt.f32 %v1268_v29  ;;  %vm1286_vm9 = vcmp.eq.f32.partialorder %v1268_v29, inf  ;;  %v1289_v60 = vand.u32 2147483648, %v1268_v29  ;;  %vm1288_vm10 = vcmp.eq.f32.partialorder %v1268_v29, 0.0 }
 0xaa5   :  { %v3144_v62 = vpop.eup %3143 }
 0xaa6   :  { %v1292_v47 = vmul.f32 %v3144_v62, %v1269_v4 }
 0xaa7   :  { %v3146_v36 = vpop.eup %3145 }
 0xaa8   :  { %v1294_v45 = vsel %vm1293_vm7, %v1269_v4, %v1292_v47  ;;  %v1285_v55 = vmul.f32 %v3146_v36, %v1268_v29 }
 0xaa9   :  { %v1297_v46 = vsel %vm1295_vm8, %v1296_v51, %v1294_v45 }
 0xaaa   :  { %v1309_v57 = vadd.f32 1e-06, %v1297_v46  ;;  %v1287_v8 = vsel %vm1286_vm9, %v1268_v29, %v1285_v55 }
 0xaab   :  { %v1290_v43 = vsel %vm1288_vm10, %v1289_v60, %v1287_v8 }
 0xaac   :  { %3147 = vrcp.f32 %v1309_v57  ;;  %v1308_v15 = vadd.f32 1e-06, %v1290_v43 }
 0xaae   :  { %3149 = vrcp.f32 %v1308_v15 }
 0xab9   :  { %v3148_v32 = vpop.eup %3147 }
 0xaba   :  { %v1317_v59 = vmul.f32 %v3148_v32, %v1305_v52 }
 0xabb   :  { %v3150_v54 = vpop.eup %3149 }
 0xabc   :  { %v1315_v53 = vmul.f32 %v3150_v54, %v1304_v19  ;;  %v3892_v41 = vadd.f32 %v1321_v37, %v1317_v59 }
 0xabe   :  { %v3890_v21 = vadd.f32 %v1321_v37, %v1315_v53 }
 0xac0   :  { %2931 = vmatprep.mubr.msk.f32.mxu0 %vm36_vm0, %v3890_v21 }
 0xac1   :  { %2932 = vmatmul.mubr.msk.f32.gmra.mxu0 %vm36_vm0, %v3892_v41 }
 0xb4f   :  { %v2930_v25 = vpop.f32.mrf.mxu0 }
 0xb50   :  { %v1425_v17 = vadd.f32 %v2930_v25, %v1340_v63 }
 0xb51   :  { %v1419_v58 = vpop.f32.mrf.mxu0 }
 0xb52   :  { %v1420_v44 = vadd.f32 %v1419_v58, %v1340_v63  ;;  %1442 = vrot.lane.b32.xlu1 %v1425_v17, %s3296_s7 }
 0xb54   :  { %1440 = vrot.lane.b32.xlu0 %v1420_v44, %s3296_s7  ;;  %v3908_v14 = vpack.c.bf16 %v1425_v17, %v1420_v44 }
 0xb56   :  { %1446 = vrot.lane.b32.xlu1 %v1420_v44, %s3295_s0  ;;  %2936 = vmatprep.mubr.msk.bf16.mxu0 %vm279_vm1, %v3908_v14 }
 0xb58   :  { %1448 = vrot.lane.b32.xlu0 %v1425_v17, %s3295_s0 }
 0xb5a   :  { %1452 = vrot.lane.b32.xlu1 %v1420_v44, %s3297_s8 }
 0xb5c   :  { %1454 = vrot.lane.b32.xlu0 %v1425_v17, %s3297_s8 }
 0xb5e   :  { %1486 = vrot.lane.b32.xlu1 %v1420_v44, %s3298_s9 }
 0xb81   :  { %v2933_v10 = vpop.f32.mrf.mxu0 }
 0xb82   :  { %v1435_v20 = vadd.f32 %v2933_v10, %v1340_v63 }
 0xb83   :  { %v1429_v26 = vpop.f32.mrf.mxu0 }
 0xb84   :  { %v1430_v31 = vadd.f32 %v1429_v26, %v1340_v63  ;;  %1462 = vrot.lane.b32.xlu0 %v1435_v20, %s3296_s7  ;;  %v3256_v26 = vld [vmem:[%s4331_s1 + $0x10] sm:$0xff] }
 0xb86   :  { %1460 = vrot.lane.b32.xlu1 %v1430_v31, %s3296_s7  ;;  %v1482_v42 = vpack.c.bf16 %v1435_v20, %v1430_v31 }
 0xb88   :  { %1468 = vrot.lane.b32.xlu0 %v1435_v20, %s3295_s0 }
 0xb8a   :  { %1466 = vrot.lane.b32.xlu1 %v1430_v31, %s3295_s0 }
 0xb8c   :  { %1474 = vrot.lane.b32.xlu0 %v1435_v20, %s3297_s8 }
 0xb8e   :  { %1472 = vrot.lane.b32.xlu1 %v1430_v31, %s3297_s8 }
 0xb90   :  { %1488 = vrot.lane.b32.xlu0 %v1425_v17, %s3298_s9 }
 0xb92   :  { %1502 = vrot.lane.b32.xlu1 %v1430_v31, %s3298_s9 }
 0xbc4   :  { %v3925_v11 = vpop.permute.xlu1 %1442 }
 0xbc5   :  { %1492 = vrot.lane.b32.xlu0 %v3925_v11, %s3298_s9 }
 0xbc6   :  { %v3929_v30 = vpop.permute.xlu0 %1440 }
 0xbc7   :  { %1490 = vrot.lane.b32.xlu1 %v3929_v30, %s3298_s9  ;;  %v1479_v59 = vpack.c.bf16 %v3925_v11, %v3929_v30  ;;  %v3257_v30 = vld [vmem:[%s4331_s1] sm:$0xff] }
 0xbc8   :  { %v3933_v33 = vpop.permute.xlu1 %1446 }
 0xbca   :  { %v3935_v5 = vpop.permute.xlu0 %1448 }
 0xbcb   :  { %1496 = vrot.lane.b32.xlu0 %v3935_v5, %s3298_s9  ;;  %1494 = vrot.lane.b32.xlu1 %v3933_v33, %s3298_s9  ;;  %v3966_v17 = vpack.c.bf16 %v3935_v5, %v3933_v33 }
 0xbcc   :  { %v3941_v2 = vpop.permute.xlu1 %1452 }
 0xbce   :  { %v1455_v56 = vpop.permute.xlu0 %1454 }
 0xbcf   :  { %1500 = vrot.lane.b32.xlu0 %v1455_v56, %s3298_s9  ;;  %1498 = vrot.lane.b32.xlu1 %v3941_v2, %s3298_s9  ;;  %v1481_v54 = vpack.c.bf16 %v1455_v56, %v3941_v2  ;;  %v3258_v2 = vld [vmem:[%s4331_s1 + $0x18] sm:$0xff] }
 0xbd0   :  { %v1487_v1 = vpop.permute.xlu1 %1486 }
 0xbd3   :  { %1504 = vrot.lane.b32.xlu0 %v1435_v20, %s3298_s9 }
 0xbf6   :  { %v1463_v28 = vpop.permute.xlu0 %1462 }
 0xbf7   :  { %1508 = vrot.lane.b32.xlu0 %v1463_v28, %s3298_s9 }
 0xbf8   :  { %v1461_v35 = vpop.permute.xlu1 %1460 }
 0xbf9   :  { %1506 = vrot.lane.b32.xlu1 %v1461_v35, %s3298_s9  ;;  %v1483_v19 = vpack.c.bf16 %v1463_v28, %v1461_v35  ;;  %v3259_v28 = vld [vmem:[%s4331_s1 + $0x8] sm:$0xff] }
 0xbfa   :  { %v1469_v6 = vpop.permute.xlu0 %1468 }
 0xbfb   :  { %1512 = vrot.lane.b32.xlu0 %v1469_v6, %s3298_s9 }
 0xbfc   :  { %v1467_v0 = vpop.permute.xlu1 %1466 }
 0xbfd   :  { %1510 = vrot.lane.b32.xlu1 %v1467_v0, %s3298_s9  ;;  %v1484_v38 = vpack.c.bf16 %v1469_v6, %v1467_v0  ;;  %v3260_v0 = vld [vmem:[%s4331_s1 + $0x30] sm:$0xff] }
 0xbfe   :  { %v1475_v34 = vpop.permute.xlu0 %1474 }
 0xbff   :  { %1516 = vrot.lane.b32.xlu0 %v1475_v34, %s3298_s9 }
 0xc00   :  { %v1473_v37 = vpop.permute.xlu1 %1472 }
 0xc01   :  { %v1485_v40 = vpack.c.bf16 %v1475_v34, %v1473_v37  ;;  %1514 = vrot.lane.b32.xlu1 %v1473_v37, %s3298_s9 }
 0xc02   :  { %v1489_v4 = vpop.permute.xlu0 %1488 }
 0xc03   :  { %1865 = vrot.lane.b32.xlu0 %v1485_v40, %s3299_s10 }
 0xc04   :  { %v1503_v49 = vpop.permute.xlu1 %1502 }
 0xc07   :  { %1863 = vrot.lane.b32.xlu0 %v1484_v38, %s3299_s10 }
 0xc0b   :  { %1859 = vrot.lane.b32.xlu0 %v1482_v42, %s3299_s10 }
 0xc2a   :  { %1534 = vxpose.xlu1.b32.start [1/16] (narrow) %v1487_v1, 8 }
 0xc2e   :  { %1535 = vxpose.xlu1.b32.cont [2/16] (narrow) %v1489_v4, 8  ;;  %v3262_v4 = vld [vmem:[%s4331_s1 + $0x38] sm:$0xff] }
 0xc37   :  { %v1493_v62 = vpop.permute.xlu0 %1492 }
 0xc39   :  { %v1491_v29 = vpop.permute.xlu1 %1490 }
 0xc3a   :  { %1536 = vxpose.xlu1.b32.cont [3/16] (narrow) %v1491_v29, 8 }
 0xc3d   :  { %v1495_v47 = vpop.permute.xlu1 %1494  ;;  %v1497_v51 = vpop.permute.xlu0 %1496 }
 0xc3e   :  { %1537 = vxpose.xlu1.b32.cont [4/16] (narrow) %v1493_v62, 8  ;;  %v3263_v62 = vld [vmem:[%s4331_s1 + $0x28] sm:$0xff] }
 0xc41   :  { %v1499_v36 = vpop.permute.xlu1 %1498  ;;  %v1501_v45 = vpop.permute.xlu0 %1500 }
 0xc42   :  { %1538 = vxpose.xlu1.b32.cont [5/16] (narrow) %v1495_v47, 8 }
 0xc45   :  { %v1505_v46 = vpop.permute.xlu0 %1504 }
 0xc46   :  { %1539 = vxpose.xlu1.b32.cont [6/16] (narrow) %v1497_v51, 8 }
 0xc4a   :  { %1540 = vxpose.xlu1.b32.cont [7/16] (narrow) %v1499_v36, 8  ;;  %v3264_v36 = vld [vmem:[%s4331_s1 + $0x50] sm:$0xff] }
 0xc4e   :  { %1541 = vxpose.xlu1.b32.cont [8/16] (narrow) %v1501_v45, 8 }
 0xc52   :  { %1542 = vxpose.xlu1.b32.cont [9/16] (narrow) %v1503_v49, 8 }
 0xc56   :  { %1543 = vxpose.xlu1.b32.cont [10/16] (narrow) %v1505_v46, 8 }
 0xc69   :  { %v1509_v55 = vpop.permute.xlu0 %1508 }
 0xc6b   :  { %v1507_v57 = vpop.permute.xlu1 %1506 }
 0xc6c   :  { %1544 = vxpose.xlu1.b32.cont [11/16] (narrow) %v1507_v57, 8 }
 0xc6d   :  { %v1513_v60 = vpop.permute.xlu0 %1512 }
 0xc6f   :  { %v1511_v43 = vpop.permute.xlu1 %1510 }
 0xc70   :  { %1545 = vxpose.xlu1.b32.cont [12/16] (narrow) %v1509_v55, 8  ;;  %v3265_v55 = vld [vmem:[%s4331_s1 + $0x40] sm:$0xff] }
 0xc71   :  { %v1517_v8 = vpop.permute.xlu0 %1516 }
 0xc73   :  { %v1515_v52 = vpop.permute.xlu1 %1514 }
 0xc74   :  { %1546 = vxpose.xlu1.b32.cont [13/16] (narrow) %v1511_v43, 8 }
 0xc75   :  { %v1866_v15 = vpop.permute.xlu0 %1865 }
 0xc76   :  { %2952 = vmatprep.subr.bf16.mxu1 %v1866_v15 }
 0xc77   :  { %2953 = vmatpush3.bf16.msra.mxu1 %v1866_v15 }
 0xc78   :  { %1547 = vxpose.xlu1.b32.cont [14/16] (narrow) %v1513_v60, 8 }
 0xc79   :  { %v1864_v32 = vpop.permute.xlu0 %1863 }
 0xc7a   :  { %2954 = vmatprep.subr.bf16.mxu1 %v1864_v32 }
 0xc7b   :  { %2955 = vmatpush3.bf16.msra.mxu1 %v1864_v32  ;;  %v3267_v32 = vld [vmem:[%s4331_s1 + $0x48] sm:$0xff] }
 0xc7c   :  { %1548 = vxpose.xlu1.b32.cont [15/16] (narrow) %v1515_v52, 8 }
 0xc7d   :  { %v1860_v44 = vpop.permute.xlu0 %1859 }
 0xc80   :  { %1549 = vxpose.xlu1.b32.end [16/16] (narrow) %v1517_v8, 8  ;;  %v3266_v8 = vld [vmem:[%s4331_s1 + $0x58] sm:$0xff] }
 0xc9e   :  { %1861 = vrot.lane.b32.xlu1 %v1483_v19, %s3299_s10 }
 0xca2   :  { %1857 = vrot.lane.b32.xlu1 %v1481_v54, %s3299_s10 }
 0xca6   :  { %1853 = vrot.lane.b32.xlu1 %v1479_v59, %s3299_s10 }
 0xcc0   :  { %v1550_v53 = vpop.trf.xlu1 }
 0xcc1   :  { %v1566_v63 = vpack.c.bf16 %v1550_v53, %v1550_v53 }
 0xcc3   :  { %v1592_v25 = vsel %vm304_vm2, %v1566_v63, 0  ;;  %3035 = vmatprep.subr.msk.bf16.mxu0 %vm304_vm2, %v1566_v63  ;;  %v3269_v63 = vld [vmem:[%s4331_s1 + $0x60] sm:$0xff] }
 0xcc4   :  { %2935 = vmatpush3.bf16.msra.mxu0 %v1592_v25 }
 0xcc7   :  { %2937 = vmatmul.mubr.msk.bf16.vlgmr.msra.gmra.mxu0 %vm279_vm1, %v1479_v59 }
 0xcc8   :  { %2940 = vmatprep.mubr.msk.bf16.mxu0 %vm279_vm1, %v3966_v17 }
 0xccf   :  { %2941 = vmatmul.mubr.msk.bf16.gmra.mxu0 %vm279_vm1, %v1481_v54  ;;  %v3268_v54 = vld [vmem:[%s4331_s1 + $0x70] sm:$0xff] }
 0xcd0   :  { %2944 = vmatprep.mubr.msk.bf16.mxu0 %vm279_vm1, %v1482_v42 }
 0xcd7   :  { %2945 = vmatmul.mubr.msk.bf16.gmra.mxu0 %vm279_vm1, %v1483_v19 }
 0xcd8   :  { %2948 = vmatprep.mubr.msk.bf16.mxu0 %vm279_vm1, %v1484_v38 }
 0xcdf   :  { %2949 = vmatmul.mubr.msk.bf16.gmra.mxu0 %vm279_vm1, %v1485_v40  ;;  %v3261_v40 = vld [vmem:[%s4331_s1 + $0x20] sm:$0xff] }
 0xd10   :  { %v1862_v58 = vpop.permute.xlu1 %1861 }
 0xd11   :  { %2956 = vmatprep.subr.bf16.mxu1 %v1862_v58 }
 0xd12   :  { %2957 = vmatpush3.bf16.msra.mxu1 %v1862_v58 }
 0xd13   :  { %2958 = vmatprep.subr.bf16.mxu1 %v1860_v44 }
 0xd14   :  { %v1858_v10 = vpop.permute.xlu1 %1857 }
 0xd16   :  { %2959 = vmatpush3.bf16.msra.mxu1 %v1860_v44  ;;  %v3270_v44 = vld [vmem:[%s4331_s1 + $0x78] sm:$0xff] }
 0xd17   :  { %2960 = vmatprep.subr.bf16.mxu1 %v1858_v10 }
 0xd1a   :  { %2961 = vmatpush3.bf16.msra.mxu1 %v1858_v10 }
 0xd87   :  { %v2938_v20 = vpop.f32.mrf.mxu0 }
 0xd88   :  { %v3979_v31 = vadd.f32 %v3256_v26, %v2938_v20  ;;  %v3271_v26 = vld [vmem:[%s4331_s1 + $0x68] sm:$0xff] }
 0xd89   :  { %v1628_v11 = vpop.f32.mrf.mxu0 }
 0xd8a   :  { %1695 = vmax.xlane.f32.xlu0 %v3979_v31  ;;  %v3985_v33 = vadd.f32 %v3257_v30, %v1628_v11 }
 0xd8b   :  { %v2939_v5 = vpop.f32.mrf.mxu0 }
 0xd8c   :  { %v3991_v56 = vadd.f32 %v3258_v2, %v2939_v5 }
 0xd8d   :  { %v1631_v1 = vpop.f32.mrf.mxu0 }
 0xd8e   :  { %1691 = vmax.xlane.f32.xlu0 %v3985_v33  ;;  %v3997_v35 = vadd.f32 %v3259_v28, %v1631_v1 }
 0xd8f   :  { %v2942_v6 = vpop.f32.mrf.mxu0 }
 0xd90   :  { %v4003_v34 = vadd.f32 %v3260_v0, %v2942_v6 }
 0xd91   :  { %v1644_v37 = vpop.f32.mrf.mxu0 }
 0xd92   :  { %1697 = vmax.xlane.f32.xlu0 %v3991_v56  ;;  %v4009_v38 = vadd.f32 %v3261_v40, %v1644_v37 }
 0xd93   :  { %v2943_v42 = vpop.f32.mrf.mxu0 }
 0xd94   :  { %v4015_v49 = vadd.f32 %v3262_v4, %v2943_v42 }
 0xd95   :  { %v1647_v29 = vpop.f32.mrf.mxu0 }
 0xd96   :  { %1693 = vmax.xlane.f32.xlu0 %v3997_v35  ;;  %v4021_v47 = vadd.f32 %v3263_v62, %v1647_v29 }
 0xd97   :  { %v2946_v51 = vpop.f32.mrf.mxu0 }
 0xd98   :  { %v4027_v45 = vadd.f32 %v3264_v36, %v2946_v51 }
 0xd99   :  { %v1660_v46 = vpop.f32.mrf.mxu0 }
 0xd9a   :  { %1703 = vmax.xlane.f32.xlu0 %v4003_v34  ;;  %v4033_v57 = vadd.f32 %v3265_v55, %v1660_v46 }
 0xd9b   :  { %v2947_v60 = vpop.f32.mrf.mxu0 }
 0xd9c   :  { %v4039_v43 = vadd.f32 %v3266_v8, %v2947_v60 }
 0xd9d   :  { %v1663_v15 = vpop.f32.mrf.mxu0 }
 0xd9e   :  { %1699 = vmax.xlane.f32.xlu0 %v4009_v38  ;;  %v4045_v52 = vadd.f32 %v3267_v32, %v1663_v15 }
 0xd9f   :  { %v2950_v19 = vpop.f32.mrf.mxu0 }
 0xda0   :  { %v4051_v59 = vadd.f32 %v3268_v54, %v2950_v19 }
 0xda1   :  { %v1676_v53 = vpop.f32.mrf.mxu0 }
 0xda2   :  { %1705 = vmax.xlane.f32.xlu0 %v4015_v49  ;;  %v4057_v25 = vadd.f32 %v3269_v63, %v1676_v53 }
 0xda3   :  { %v2951_v58 = vpop.f32.mrf.mxu0 }
 0xda4   :  { %v4063_v10 = vadd.f32 %v3270_v44, %v2951_v58 }
 0xda5   :  { %v1679_v20 = vpop.f32.mrf.mxu0 }
 0xda6   :  { %1701 = vmax.xlane.f32.xlu0 %v4021_v47  ;;  %v4069_v11 = vadd.f32 %v3271_v26, %v1679_v20 }
 0xdaa   :  { %1711 = vmax.xlane.f32.xlu0 %v4027_v45 }
 0xdae   :  { %1707 = vmax.xlane.f32.xlu0 %v4033_v57 }
 0xdb2   :  { %1713 = vmax.xlane.f32.xlu0 %v4039_v43 }
 0xdb6   :  { %1709 = vmax.xlane.f32.xlu0 %v4045_v52 }
 0xdba   :  { %1719 = vmax.xlane.f32.xlu0 %v4051_v59 }
 0xdbe   :  { %1715 = vmax.xlane.f32.xlu0 %v4057_v25 }
 0xdc2   :  { %1721 = vmax.xlane.f32.xlu0 %v4063_v10 }
 0xdc6   :  { %1717 = vmax.xlane.f32.xlu0 %v4069_v11 }
 0xddc   :  { %1855 = vrot.lane.b32.xlu0 %v3966_v17, %s3299_s10 }
 0xe13   :  { %v1696_v30 = vpop.xlane.xlu0 %1695 }
 0xe14   :  { %v1725_v5 = vsub.f32 %v3979_v31, %v1696_v30 }
 0xe16   :  { %v1743_v2 = vmul.f32 1.442695, %v1725_v5 }
 0xe17   :  { %v1692_v1 = vpop.xlane.xlu0 %1691 }
 0xe18   :  { %3151 = vpow2.f32 %v1743_v2  ;;  %v1723_v28 = vsub.f32 %v3985_v33, %v1692_v1 }
 0xe1a   :  { %v1739_v6 = vmul.f32 1.442695, %v1723_v28 }
 0xe1b   :  { %v1698_v0 = vpop.xlane.xlu0 %1697 }
 0xe1c   :  { %3153 = vpow2.f32 %v1739_v6  ;;  %v1726_v37 = vsub.f32 %v3991_v56, %v1698_v0 }
 0xe1e   :  { %v1745_v40 = vmul.f32 1.442695, %v1726_v37 }
 0xe1f   :  { %v1694_v42 = vpop.xlane.xlu0 %1693 }
 0xe20   :  { %3155 = vpow2.f32 %v1745_v40  ;;  %v1724_v4 = vsub.f32 %v3997_v35, %v1694_v42 }
 0xe22   :  { %v1741_v29 = vmul.f32 1.442695, %v1724_v4 }
 0xe23   :  { %v1704_v17 = vpop.xlane.xlu0 %1703 }
 0xe24   :  { %3157 = vpow2.f32 %v1741_v29  ;;  %v1729_v31 = vsub.f32 %v4003_v34, %v1704_v17 }
 0xe25   :  { %v4079_v62 = vpop.eup %3151 }
 0xe26   :  { %v1751_v51 = vmul.f32 1.442695, %v1729_v31  ;;  %1775 = vadd.xlane.f32.xlu1 %v4079_v62 }
 0xe27   :  { %v1700_v33 = vpop.xlane.xlu0 %1699 }
 0xe28   :  { %3159 = vpow2.f32 %v1751_v51  ;;  %v1727_v36 = vsub.f32 %v4009_v38, %v1700_v33 }
 0xe29   :  { %v4083_v56 = vpop.eup %3153 }
 0xe2a   :  { %v1747_v46 = vmul.f32 1.442695, %v1727_v36  ;;  %1771 = vadd.xlane.f32.xlu1 %v4083_v56 }
 0xe2b   :  { %v1706_v35 = vpop.xlane.xlu0 %1705 }
 0xe2c   :  { %3161 = vpow2.f32 %v1747_v46  ;;  %v1730_v55 = vsub.f32 %v4015_v49, %v1706_v35 }
 0xe2d   :  { %v4087_v60 = vpop.eup %3155 }
 0xe2e   :  { %v1753_v34 = vmul.f32 1.442695, %v1730_v55  ;;  %1777 = vadd.xlane.f32.xlu1 %v4087_v60 }
 0xe2f   :  { %v1702_v8 = vpop.xlane.xlu0 %1701 }
 0xe30   :  { %3163 = vpow2.f32 %v1753_v34  ;;  %v1728_v15 = vsub.f32 %v4021_v47, %v1702_v8 }
 0xe31   :  { %v4091_v32 = vpop.eup %3157 }
 0xe32   :  { %v1749_v38 = vmul.f32 1.442695, %v1728_v15  ;;  %1773 = vadd.xlane.f32.xlu0 %v4091_v32 }
 0xe33   :  { %v1712_v19 = vpop.xlane.xlu0 %1711 }
 0xe34   :  { %3165 = vpow2.f32 %v1749_v38  ;;  %v1733_v54 = vsub.f32 %v4027_v45, %v1712_v19 }
 0xe35   :  { %v4095_v53 = vpop.eup %3159 }
 0xe36   :  { %v1759_v49 = vmul.f32 1.442695, %v1733_v54  ;;  %1783 = vadd.xlane.f32.xlu0 %v4095_v53 }
 0xe37   :  { %v1708_v63 = vpop.xlane.xlu0 %1707 }
 0xe38   :  { %3167 = vpow2.f32 %v1759_v49  ;;  %v1731_v58 = vsub.f32 %v4033_v57, %v1708_v63 }
 0xe39   :  { %v4099_v44 = vpop.eup %3161 }
 0xe3a   :  { %v1755_v47 = vmul.f32 1.442695, %v1731_v58  ;;  %1779 = vadd.xlane.f32.xlu1 %v4099_v44 }
 0xe3b   :  { %v1714_v20 = vpop.xlane.xlu0 %1713 }
 0xe3c   :  { %3169 = vpow2.f32 %v1755_v47  ;;  %v1734_v26 = vsub.f32 %v4039_v43, %v1714_v20 }
 0xe3d   :  { %v4103_v30 = vpop.eup %3163 }
 0xe3e   :  { %v1761_v45 = vmul.f32 1.442695, %v1734_v26  ;;  %1785 = vadd.xlane.f32.xlu1 %v4103_v30 }
 0xe3f   :  { %v1710_v5 = vpop.xlane.xlu0 %1709 }
 0xe40   :  { %3171 = vpow2.f32 %v1761_v45  ;;  %v1732_v2 = vsub.f32 %v4045_v52, %v1710_v5 }
 0xe41   :  { %v4107_v1 = vpop.eup %3165 }
 0xe42   :  { %v1757_v57 = vmul.f32 1.442695, %v1732_v2  ;;  %1781 = vadd.xlane.f32.xlu0 %v4107_v1 }
 0xe43   :  { %v1720_v28 = vpop.xlane.xlu0 %1719 }
 0xe44   :  { %3173 = vpow2.f32 %v1757_v57  ;;  %v1737_v6 = vsub.f32 %v4051_v59, %v1720_v28 }
 0xe45   :  { %v4111_v0 = vpop.eup %3167 }
 0xe46   :  { %v1767_v43 = vmul.f32 1.442695, %v1737_v6  ;;  %1791 = vadd.xlane.f32.xlu0 %v4111_v0 }
 0xe47   :  { %v1716_v37 = vpop.xlane.xlu0 %1715 }
 0xe48   :  { %3175 = vpow2.f32 %v1767_v43  ;;  %v1735_v40 = vsub.f32 %v4057_v25, %v1716_v37 }
 0xe49   :  { %v4115_v42 = vpop.eup %3169 }
 0xe4a   :  { %v1763_v52 = vmul.f32 1.442695, %v1735_v40  ;;  %1787 = vadd.xlane.f32.xlu1 %v4115_v42 }
 0xe4b   :  { %v1722_v4 = vpop.xlane.xlu0 %1721 }
 0xe4c   :  { %3177 = vpow2.f32 %v1763_v52  ;;  %v1738_v29 = vsub.f32 %v4063_v10, %v1722_v4  ;;  %v1854_v10 = vpop.permute.xlu1 %1853 }
 0xe4d   :  { %v4119_v17 = vpop.eup %3171 }
 0xe4e   :  { %v1769_v59 = vmul.f32 1.442695, %v1738_v29  ;;  %1793 = vadd.xlane.f32.xlu1 %v4119_v17 }
 0xe4f   :  { %v1718_v31 = vpop.xlane.xlu0 %1717 }
 0xe50   :  { %3179 = vpow2.f32 %v1769_v59  ;;  %v1736_v51 = vsub.f32 %v4069_v11, %v1718_v31 }
 0xe51   :  { %v4123_v33 = vpop.eup %3173 }
 0xe52   :  { %v1765_v25 = vmul.f32 1.442695, %v1736_v51  ;;  %1789 = vadd.xlane.f32.xlu0 %v4123_v33 }
 0xe53   :  { %v1856_v36 = vpop.permute.xlu0 %1855 }
 0xe54   :  { %3181 = vpow2.f32 %v1765_v25  ;;  %2962 = vmatprep.subr.bf16.mxu1 %v1856_v36 }
 0xe55   :  { %v4126_v46 = vpop.eup %3175  ;;  %2963 = vmatpush3.bf16.msra.mxu1 %v1856_v36 }
 0xe56   :  { %1799 = vadd.xlane.f32.xlu0 %v4126_v46  ;;  %2964 = vmatprep.subr.bf16.mxu1 %v1854_v10 }
 0xe59   :  { %v4129_v35 = vpop.eup %3177  ;;  %2965 = vmatpush3.bf16.msra.mxu1 %v1854_v10 }
 0xe5a   :  { %1795 = vadd.xlane.f32.xlu1 %v4129_v35 }
 0xe5d   :  { %v4132_v11 = vpop.eup %3179 }
 0xe5e   :  { %1801 = vadd.xlane.f32.xlu1 %v4132_v11 }
 0xe61   :  { %v4135_v55 = vpop.eup %3181 }
 0xe62   :  { %1797 = vadd.xlane.f32.xlu0 %v4135_v55 }
 0xe6f   :  { %2046 = vrot.lane.b32.xlu1 %v3837_v39, %s3300_s21 }
 0xe73   :  { %2044 = vrot.lane.b32.xlu1 %v3842_v12, %s3300_s21 }
 0xe77   :  { %2042 = vrot.lane.b32.xlu1 %v3849_v50, %s3300_s21 }
 0xe78   :  { %1851 = vrot.lane.b32.xlu0 %v3908_v14, %s3299_s10 }
 0xe7c   :  { %2040 = vrot.lane.b32.xlu0 %v3856_v61, %s3300_s21 }
 0xeaf   :  { %v1776_v34 = vpop.xlane.xlu1 %1775 }
 0xeb3   :  { %v1772_v8 = vpop.xlane.xlu1 %1771 }
 0xeb4   :  { %3183 = vrcp.f32 %v1772_v8 }
 0xeb7   :  { %v1778_v49 = vpop.xlane.xlu1 %1777 }
 0xebb   :  { %v1774_v15 = vpop.xlane.xlu0 %1773 }
 0xebc   :  { %3185 = vrcp.f32 %v1774_v15 }
 0xebd   :  { %3187 = vrcp.f32 %v1778_v49 }
 0xebf   :  { %v1784_v50 = vpop.xlane.xlu0 %1783 }
 0xec1   :  { %v3184_v38 = vpop.eup %3183 }
 0xec2   :  { %v1819_v39 = vmul.f32 %v3184_v38, %v4083_v56 }
 0xec3   :  { %v1780_v14 = vpop.xlane.xlu1 %1779 }
 0xec7   :  { %v1786_v61 = vpop.xlane.xlu1 %1785 }
 0xec9   :  { %v3186_v19 = vpop.eup %3185 }
 0xeca   :  { %v1820_v12 = vmul.f32 %v3186_v19, %v4091_v32  ;;  %v3188_v32 = vpop.eup %3187 }
 0xecb   :  { %v1782_v63 = vpop.xlane.xlu0 %1781  ;;  %v1822_v6 = vmul.f32 %v3188_v32, %v4087_v60 }
 0xecc   :  { %v1835_v54 = vpack.c.bf16 %v1820_v12, %v1819_v39  ;;  %3189 = vrcp.f32 %v1782_v63 }
 0xecd   :  { %3191 = vrcp.f32 %v1776_v34 }
 0xece   :  { %2968 = vmatprep.mubr.bf16.mxu1 %v1835_v54  ;;  %3193 = vrcp.f32 %v1780_v14 }
 0xecf   :  { %v1792_v58 = vpop.xlane.xlu0 %1791  ;;  %3195 = vrcp.f32 %v1786_v61 }
 0xed3   :  { %v1788_v20 = vpop.xlane.xlu1 %1787 }
 0xed7   :  { %v1794_v56 = vpop.xlane.xlu1 %1793 }
 0xed9   :  { %v3190_v5 = vpop.eup %3189 }
 0xeda   :  { %v3192_v2 = vpop.eup %3191  ;;  %v1824_v37 = vmul.f32 %v3190_v5, %v4107_v1 }
 0xedb   :  { %v1790_v47 = vpop.xlane.xlu0 %1789  ;;  %v3194_v28 = vpop.eup %3193  ;;  %v1821_v40 = vmul.f32 %v3192_v2, %v4079_v62 }
 0xedc   :  { %3197 = vrcp.f32 %v1790_v47  ;;  %v1823_v52 = vmul.f32 %v3194_v28, %v4099_v44  ;;  %v3196_v29 = vpop.eup %3195 }
 0xedd   :  { %3199 = vrcp.f32 %v1784_v50  ;;  %v1836_v4 = vpack.c.bf16 %v1822_v6, %v1821_v40  ;;  %v1826_v1 = vmul.f32 %v3196_v29, %v4103_v30 }
 0xede   :  { %3201 = vrcp.f32 %v1788_v20  ;;  %v1837_v31 = vpack.c.bf16 %v1824_v37, %v1823_v52 }
 0xedf   :  { %v1800_v26 = vpop.xlane.xlu0 %1799  ;;  %3203 = vrcp.f32 %v1794_v56 }
 0xee3   :  { %v1796_v57 = vpop.xlane.xlu1 %1795 }
 0xee7   :  { %v1802_v59 = vpop.xlane.xlu1 %1801 }
 0xee9   :  { %v3198_v51 = vpop.eup %3197 }
 0xeea   :  { %v3200_v25 = vpop.eup %3199  ;;  %v1828_v36 = vmul.f32 %v3198_v51, %v4123_v33 }
 0xeeb   :  { %v1798_v45 = vpop.xlane.xlu0 %1797  ;;  %v3202_v60 = vpop.eup %3201  ;;  %v1825_v62 = vmul.f32 %v3200_v25, %v4095_v53 }
 0xeec   :  { %3205 = vrcp.f32 %v1798_v45  ;;  %v1827_v10 = vmul.f32 %v3202_v60, %v4115_v42  ;;  %v3204_v34 = vpop.eup %3203 }
 0xeed   :  { %3207 = vrcp.f32 %v1792_v58  ;;  %v1838_v44 = vpack.c.bf16 %v1826_v1, %v1825_v62  ;;  %v1830_v39 = vmul.f32 %v3204_v34, %v4119_v17  ;;  %v2047_v58 = vpop.permute.xlu1 %2046 }
 0xeee   :  { %3209 = vrcp.f32 %v1796_v57  ;;  %v1839_v8 = vpack.c.bf16 %v1828_v36, %v1827_v10  ;;  %2984 = vmatprep.subr.mxu0 %v2047_v58 }
 0xeef   :  { %v1852_v43 = vpop.permute.xlu0 %1851  ;;  %3211 = vrcp.f32 %v1802_v59  ;;  %2985 = vmatpush3.msra.mxu0 %v2047_v58 }
 0xef0   :  { %2966 = vmatprep.subr.bf16.mxu1 %v1852_v43  ;;  %3213 = vrcp.f32 %v1800_v26 }
 0xef1   :  { %2967 = vmatpush3.bf16.msra.mxu1 %v1852_v43  ;;  %v2045_v17 = vpop.permute.xlu1 %2044 }
 0xef2   :  { %2986 = vmatprep.subr.mxu0 %v2045_v17 }
 0xef3   :  { %2987 = vmatpush3.msra.mxu0 %v2045_v17 }
 0xef4   :  { %2969 = vmatmul.mubr.bf16.vlgmr.msra.gmra.mxu1 %v1836_v4 }
 0xef5   :  { %2972 = vmatprep.mubr.bf16.mxu1 %v1837_v31 }
 0xef9   :  { %v3206_v15 = vpop.eup %3205 }
 0xefa   :  { %v3208_v38 = vpop.eup %3207  ;;  %v1832_v12 = vmul.f32 %v3206_v15, %v4135_v55 }
 0xefb   :  { %v3210_v19 = vpop.eup %3209  ;;  %v1829_v30 = vmul.f32 %v3208_v38, %v4111_v0  ;;  %v2043_v0 = vpop.permute.xlu1 %2042 }
 0xefc   :  { %2973 = vmatmul.mubr.bf16.gmra.mxu1 %v1838_v44  ;;  %v1831_v33 = vmul.f32 %v3210_v19, %v4129_v35  ;;  %v3212_v53 = vpop.eup %3211  ;;  %2988 = vmatprep.subr.mxu0 %v2043_v0  ;;  %v2041_v35 = vpop.permute.xlu0 %2040 }
 0xefd   :  { %2976 = vmatprep.mubr.bf16.mxu1 %v1839_v8  ;;  %v1840_v54 = vpack.c.bf16 %v1830_v39, %v1829_v30  ;;  %v3214_v42 = vpop.eup %3213  ;;  %v1834_v49 = vmul.f32 %v3212_v53, %v4132_v11  ;;  %2989 = vmatpush3.msra.mxu0 %v2043_v0 }
 0xefe   :  { %v1841_v50 = vpack.c.bf16 %v1832_v12, %v1831_v33  ;;  %v1833_v63 = vmul.f32 %v3214_v42, %v4126_v46  ;;  %2990 = vmatprep.subr.mxu0 %v2041_v35 }
 0xeff   :  { %2991 = vmatpush3.msra.mxu0 %v2041_v35 }
 0xf00   :  { %v1842_v14 = vpack.c.bf16 %v1834_v49, %v1833_v63 }
 0xf04   :  { %2977 = vmatmul.mubr.bf16.gmra.mxu1 %v1840_v54  ;;  %v2035_v54 = vrot.slane %v3901_v16, %v750_v27 }
 0xf05   :  { %2980 = vmatprep.mubr.bf16.mxu1 %v1841_v50 }
 0xf0c   :  { %2981 = vmatmul.mubr.bf16.gmra.mxu1 %v1842_v14 }
 0xfb4   :  { %v2970_v55 = vpop.f32.mrf.mxu1 }
 0xfb5   :  { %1974 = vrot.lane.b32.xlu0 %v2970_v55, %s3301_s22 }
 0xfb6   :  { %v1909_v11 = vpop.f32.mrf.mxu1 }
 0xfb8   :  { %v2971_v61 = vpop.f32.mrf.mxu1 }
 0xfb9   :  { %1976 = vrot.lane.b32.xlu0 %v2971_v61, %s3301_s22 }
 0xfba   :  { %v1912_v46 = vpop.f32.mrf.mxu1 }
 0xfbc   :  { %v2974_v47 = vpop.f32.mrf.mxu1 }
 0xfbd   :  { %1990 = vrot.lane.b32.xlu1 %v2974_v47, %s3302_s23 }
 0xfbe   :  { %v1925_v20 = vpop.f32.mrf.mxu1 }
 0xfc0   :  { %v2975_v26 = vpop.f32.mrf.mxu1 }
 0xfc1   :  { %1982 = vrot.lane.b32.xlu1 %v1925_v20, %s3303_s24 }
 0xfc2   :  { %v1928_v56 = vpop.f32.mrf.mxu1 }
 0xfc3   :  { %1984 = vrot.lane.b32.xlu0 %v1928_v56, %s3303_s24 }
 0xfc4   :  { %v2978_v32 = vpop.f32.mrf.mxu1 }
 0xfc5   :  { %1992 = vrot.lane.b32.xlu1 %v2975_v26, %s3302_s23 }
 0xfc6   :  { %v1941_v45 = vpop.f32.mrf.mxu1 }
 0xfc7   :  { %2004 = vrot.lane.b32.xlu0 %v2978_v32, %s3301_s22 }
 0xfc8   :  { %v2979_v5 = vpop.f32.mrf.mxu1 }
 0xfc9   :  { %2006 = vrot.lane.b32.xlu1 %v2979_v5, %s3301_s22 }
 0xfca   :  { %v1944_v2 = vpop.f32.mrf.mxu1 }
 0xfcc   :  { %v2982_v57 = vpop.f32.mrf.mxu1 }
 0xfce   :  { %v1957_v28 = vpop.f32.mrf.mxu1 }
 0xfcf   :  { %2012 = vrot.lane.b32.xlu0 %v1957_v28, %s3303_s24 }
 0xfd0   :  { %v2983_v6 = vpop.f32.mrf.mxu1 }
 0xfd2   :  { %v1960_v43 = vpop.f32.mrf.mxu1 }
 0xfd3   :  { %2020 = vrot.lane.b32.xlu0 %v2982_v57, %s3302_s23  ;;  %2014 = vrot.lane.b32.xlu1 %v1960_v43, %s3303_s24 }
 0xfd7   :  { %2022 = vrot.lane.b32.xlu1 %v2983_v6, %s3302_s23 }
0x1027   :  { %v1975_v37 = vpop.permute.xlu0 %1974 }
0x1028   :  { %v1996_v4 = vsel %vm279_vm1, %v1909_v11, %v1975_v37 }
0x102b   :  { %v1977_v52 = vpop.permute.xlu0 %1976 }
0x102c   :  { %v1997_v31 = vsel %vm279_vm1, %v1912_v46, %v1977_v52 }
0x102f   :  { %v1991_v40 = vpop.permute.xlu1 %1990 }
0x1033   :  { %v1983_v29 = vpop.permute.xlu1 %1982 }
0x1034   :  { %v1998_v59 = vsel %vm712_vm3, %v1996_v4, %v1983_v29  ;;  %v2658_v29 = vld [vmem:[%s4332_s2 + $0x78] sm:$0xff] }
0x1035   :  { %v1985_v51 = vpop.permute.xlu0 %1984  ;;  %v2000_v25 = vsel %vm715_vm4, %v1998_v59, %v1991_v40  ;;  %2998 = vmatprep.subr.mxu0 %v2658_v29  ;;  %v2656_v59 = vld [vmem:[%s4332_s2 + $0x68] sm:$0xff] }
0x1036   :  { %v1999_v60 = vsel %vm712_vm3, %v1997_v31, %v1985_v51  ;;  %2992 = vmatprep.mubr.msk.f32.mxu0 %vm36_vm0, %v2000_v25  ;;  %v2654_v31 = vld [vmem:[%s4332_s2 + $0x58] sm:$0xff]  ;;  %v4235_v51 = vld [vmem:[%s4332_s2 + $0x48] sm:$0xff] }
0x1037   :  { %v1993_v1 = vpop.permute.xlu1 %1992 }
0x1038   :  { %v2001_v36 = vsel %vm715_vm4, %v1999_v60, %v1993_v1 }
0x1039   :  { %2993 = vmatmul.mubr.msk.f32.vlgmr.msra.gmra.mxu0 %vm36_vm0, %v2001_v36  ;;  %v2005_v62 = vpop.permute.xlu0 %2004 }
0x103a   :  { %v2026_v34 = vsel %vm279_vm1, %v1941_v45, %v2005_v62  ;;  %2999 = vmatpush3.msra.mxu0 %v2658_v29 }
0x103b   :  { %v2007_v10 = vpop.permute.xlu1 %2006  ;;  %3000 = vmatprep.subr.mxu0 %v2656_v59 }
0x103c   :  { %v2027_v39 = vsel %vm279_vm1, %v1944_v2, %v2007_v10  ;;  %3001 = vmatpush3.msra.mxu0 %v2656_v59 }
0x103d   :  { %3002 = vmatprep.subr.mxu0 %v2654_v31 }
0x103e   :  { %3003 = vmatpush3.msra.mxu0 %v2654_v31 }
0x103f   :  { %3004 = vmatprep.subr.mxu0 %v4235_v51 }
0x1040   :  { %3005 = vmatpush3.msra.mxu0 %v4235_v51 }
0x1041   :  { %v2013_v44 = vpop.permute.xlu0 %2012 }
0x1042   :  { %v2028_v8 = vsel %vm712_vm3, %v2026_v34, %v2013_v44 }
0x1045   :  { %v2021_v15 = vpop.permute.xlu0 %2020  ;;  %v2015_v38 = vpop.permute.xlu1 %2014 }
0x1046   :  { %v2030_v19 = vsel %vm715_vm4, %v2028_v8, %v2021_v15  ;;  %v2029_v12 = vsel %vm712_vm3, %v2027_v39, %v2015_v38 }
0x1047   :  { %2995 = vmatprep.mubr.msk.f32.mxu0 %vm36_vm0, %v2030_v19 }
0x1049   :  { %v2023_v30 = vpop.permute.xlu1 %2022 }
0x104a   :  { %v2031_v33 = vsel %vm715_vm4, %v2029_v12, %v2023_v30 }
0x104b   :  { %2996 = vmatmul.mubr.msk.f32.gmra.mxu0 %vm36_vm0, %v2031_v33 }
0x10f9   :  { %v2994_v53 = vpop.f32.mrf.mxu0 }
0x10fa   :  { %v2136_v50 = vadd.f32 %v2994_v53, %v2035_v54 }
0x10fb   :  { %v2130_v42 = vpop.f32.mrf.mxu0 }
0x10fc   :  { %v2150_v49 = vadd.f32 %v2136_v50, %v3882_v3  ;;  %v2131_v63 = vadd.f32 %v2130_v42, %v2035_v54 }
0x10fe   :  { %v2149_v14 = vadd.f32 %v2131_v63, %v3880_v22  ;;  %v2156_v58 = vsel %vm36_vm0, %v2150_v49, 0.0 }
0x10ff   :  { %2157 = vadd.xlane.f32.xlu1 %v2156_v58 }
0x1100   :  { %v2153_v17 = vsel %vm36_vm0, %v2149_v14, 0.0 }
0x1101   :  { %2154 = vadd.xlane.f32.xlu0 %v2153_v17  ;;  %v4250_v17 = vld [vmem:[%s4333_s3 + $0x8] sm:$0xff]  ;;  %s3304_s3 = smov [#allocation2]  }
0x110b   :  { %v2997_v0 = vpop.f32.mrf.mxu0 }
0x110c   :  { %v2146_v55 = vadd.f32 %v2997_v0, %v2035_v54  ;;  %v2224_v0 = vrot.slane %v4250_v17, %v941_v24  ;;  %v2244_v24 = vrot.slane %v4250_v17, %v961_v13 }
0x110d   :  { %v2140_v35 = vpop.f32.mrf.mxu0 }
0x110e   :  { %v2141_v11 = vadd.f32 %v2140_v35, %v2035_v54  ;;  %v2152_v16 = vadd.f32 %v2146_v55, %v3892_v41 }
0x1110   :  { %v2151_v27 = vadd.f32 %v2141_v11, %v3890_v21  ;;  %v2162_v3 = vsel %vm36_vm0, %v2152_v16, 0.0 }
0x1112   :  { %v2159_v61 = vsel %vm36_vm0, %v2151_v27, 0.0 }
0x1113   :  { %2160 = vadd.xlane.f32.xlu0 %v2159_v61 }
0x1117   :  { %2163 = vadd.xlane.f32.xlu0 %v2162_v3 }
0x1188   :  { %v2158_v22 = vpop.xlane.xlu1 %2157 }
0x1189   :  { %v2166_v46 = vmul.f32 0.03125, %v2158_v22 }
0x118a   :  { %v2155_v47 = vpop.xlane.xlu0 %2154 }
0x118b   :  { %v4203_v20 = vsub.f32 %v2150_v49, %v2166_v46  ;;  %v2165_v26 = vmul.f32 0.03125, %v2155_v47 }
0x118d   :  { %v4205_v56 = vsub.f32 %v2149_v14, %v2165_v26  ;;  %v2174_v32 = vmul.f32 %v4203_v20, %v4203_v20  ;;  %v2226_v11 = vmul.f32 %v2224_v0, %v4203_v20 }
0x118f   :  { %v2180_v21 = vsel %vm36_vm0, %v2174_v32, 0.0  ;;  %v2173_v41 = vmul.f32 %v4205_v56, %v4205_v56 }
0x1190   :  { %2181 = vadd.xlane.f32.xlu0 %v2180_v21 }
0x1191   :  { %v2177_v45 = vsel %vm36_vm0, %v2173_v41, 0.0 }
0x1192   :  { %2178 = vadd.xlane.f32.xlu1 %v2177_v45 }
0x119c   :  { %v2161_v5 = vpop.xlane.xlu0 %2160 }
0x119d   :  { %v2167_v2 = vmul.f32 0.03125, %v2161_v5 }
0x119f   :  { %v4213_v57 = vsub.f32 %v2151_v27, %v2167_v2  ;;  %v2225_v27 = vmul.f32 %v2224_v0, %v4205_v56 }
0x11a0   :  { %v2164_v28 = vpop.xlane.xlu0 %2163 }
0x11a1   :  { %v2168_v6 = vmul.f32 0.03125, %v2164_v28  ;;  %v2175_v43 = vmul.f32 %v4213_v57, %v4213_v57  ;;  %v2227_v28 = vmul.f32 %v2224_v0, %v4213_v57 }
0x11a3   :  { %v4217_v37 = vsub.f32 %v2152_v16, %v2168_v6  ;;  %v2183_v40 = vsel %vm36_vm0, %v2175_v43, 0.0 }
0x11a4   :  { %2184 = vadd.xlane.f32.xlu1 %v2183_v40 }
0x11a5   :  { %v2176_v52 = vmul.f32 %v4217_v37, %v4217_v37  ;;  %v2228_v40 = vmul.f32 %v2224_v0, %v4217_v37 }
0x11a7   :  { %v2186_v4 = vsel %vm36_vm0, %v2176_v52, 0.0 }
0x11a8   :  { %2187 = vadd.xlane.f32.xlu0 %v2186_v4 }
0x11b5   :  { %2380 = vrot.lane.b32.xlu1 %v2658_v29, %s3298_s9 }
0x11b9   :  { %2376 = vrot.lane.b32.xlu1 %v2654_v31, %s3298_s9 }
0x11bd   :  { %2374 = vrot.lane.b32.xlu1 %v4235_v51, %s3298_s9 }
0x11be   :  { %2378 = vrot.lane.b32.xlu0 %v2656_v59, %s3298_s9 }
0x1219   :  { %v2182_v25 = vpop.xlane.xlu0 %2181 }
0x121a   :  { %v2190_v60 = vmul.f32 0.032258064, %v2182_v25 }
0x121b   :  { %v2179_v1 = vpop.xlane.xlu1 %2178 }
0x121c   :  { %3215 = vrsqrt.f32 %v2190_v60  ;;  %v2189_v36 = vmul.f32 0.032258064, %v2179_v1  ;;  %vm2202_vm1 = vcmp.eq.f32.partialorder %v2190_v60, inf  ;;  %v2205_v44 = vand.u32 2147483648, %v2190_v60 }
0x121d   :  { %vm2204_vm2 = vcmp.eq.f32.partialorder %v2190_v60, 0.0 }
0x121e   :  { %3217 = vrsqrt.f32 %v2189_v36  ;;  %vm2195_vm3 = vcmp.eq.f32.partialorder %v2189_v36, inf  ;;  %v2198_v12 = vand.u32 2147483648, %v2189_v36  ;;  %vm2197_vm4 = vcmp.eq.f32.partialorder %v2189_v36, 0.0 }
0x1229   :  { %v3216_v62 = vpop.eup %3215 }
0x122a   :  { %v2201_v10 = vmul.f32 %v3216_v62, %v2190_v60  ;;  %v2252_v62 = vrot.slane %v4250_v17, %v969_v48 }
0x122b   :  { %v3218_v34 = vpop.eup %3217 }
0x122c   :  { %v2203_v8 = vsel %vm2202_vm1, %v2190_v60, %v2201_v10  ;;  %v2194_v38 = vmul.f32 %v3218_v34, %v2189_v36 }
0x122d   :  { %v2206_v15 = vsel %vm2204_vm2, %v2205_v44, %v2203_v8  ;;  %v2185_v19 = vpop.xlane.xlu1 %2184 }
0x122e   :  { %v2230_v39 = vadd.f32 1e-06, %v2206_v15  ;;  %v2191_v30 = vmul.f32 0.032258064, %v2185_v19  ;;  %v2196_v33 = vsel %vm2195_vm3, %v2189_v36, %v2194_v38 }
0x122f   :  { %v2199_v54 = vsel %vm2197_vm4, %v2198_v12, %v2196_v33 }
0x1230   :  { %3219 = vrcp.f32 %v2230_v39  ;;  %v2229_v53 = vadd.f32 1e-06, %v2199_v54  ;;  %vm2209_vm11 = vcmp.eq.f32.partialorder %v2191_v30, inf  ;;  %v2212_v3 = vand.u32 2147483648, %v2191_v30 }
0x1231   :  { %3221 = vrsqrt.f32 %v2191_v30  ;;  %v2188_v50 = vpop.xlane.xlu0 %2187  ;;  %v2381_v42 = vpop.permute.xlu1 %2380  ;;  %vm2211_vm12 = vcmp.eq.f32.partialorder %v2191_v30, 0.0 }
0x1232   :  { %v2192_v49 = vmul.f32 0.032258064, %v2188_v50  ;;  %2400 = vrot.lane.b32.xlu0 %v2381_v42, %s3299_s10  ;;  %3223 = vrcp.f32 %v2229_v53 }
0x1234   :  { %3225 = vrsqrt.f32 %v2192_v49  ;;  %vm2216_vm14 = vcmp.eq.f32.partialorder %v2192_v49, inf  ;;  %v2219_v56 = vand.u32 2147483648, %v2192_v49  ;;  %vm2218_vm15 = vcmp.eq.f32.partialorder %v2192_v49, 0.0 }
0x1235   :  { %v2379_v63 = vpop.permute.xlu0 %2378  ;;  %v2377_v14 = vpop.permute.xlu1 %2376 }
0x1236   :  { %2398 = vrot.lane.b32.xlu1 %v2379_v63, %s3299_s10  ;;  %2396 = vrot.lane.b32.xlu0 %v2377_v14, %s3299_s10 }
0x1239   :  { %v2375_v58 = vpop.permute.xlu1 %2374 }
0x123a   :  { %2394 = vrot.lane.b32.xlu1 %v2375_v58, %s3299_s10  ;;  %2392 = vrot.lane.b32.xlu0 %v2658_v29, %s3299_s10 }
0x123d   :  { %v3220_v35 = vpop.eup %3219 }
0x123e   :  { %v3222_v55 = vpop.eup %3221  ;;  %2390 = vrot.lane.b32.xlu1 %v2656_v59, %s3299_s10  ;;  %2388 = vrot.lane.b32.xlu0 %v2654_v31, %s3299_s10  ;;  %v2236_v22 = vmul.f32 %v3220_v35, %v2226_v11 }
0x123f   :  { %v2208_v16 = vmul.f32 %v3222_v55, %v2191_v30  ;;  %v3224_v61 = vpop.eup %3223 }
0x1240   :  { %v2234_v26 = vmul.f32 %v3224_v61, %v2225_v27  ;;  %v4268_v5 = vadd.f32 %v2244_v24, %v2236_v22 }
0x1241   :  { %v3226_v46 = vpop.eup %3225  ;;  %v2210_v47 = vsel %vm2209_vm11, %v2191_v30, %v2208_v16 }
0x1242   :  { %v2213_v20 = vsel %vm2211_vm12, %v2212_v3, %v2210_v47  ;;  %v2215_v32 = vmul.f32 %v3226_v46, %v2192_v49  ;;  %2386 = vrot.lane.b32.xlu1 %v4235_v51, %s3299_s10  ;;  %v4266_v41 = vadd.f32 %v2244_v24, %v2234_v26  ;;  %s2616_s10 = sshll.u32 %s3304_s3, 4  ;;  %s2617_s10 = int_to_ptr.vmem [resolvable:$true] %s2616_s10 }
0x1243   :  { %v2231_v21 = vadd.f32 1e-06, %v2213_v20  ;;  %s3273_s17 = scalar_lea.vmem %s2617_s10, 512  ;;  %p3278_p1 = scmp.lt.s32.totalorder %s2617_s10, %s2617_s10 }
0x1244   :  { %v2217_v45 = vsel %vm2216_vm14, %v2192_v49, %v2215_v32  ;;  %3006 = vmatprep.mubr.msk.f32.mxu0 %vm36_vm0, %v4266_v41  ;;  %p3274_p0 = scmp.ne.s32.totalorder %s2617_s10, %s3273_s17  ;;  %p3279_p2 = scmp.lt.s32.totalorder %s3273_s17, %s3273_s17 }
0x1245   :  { %3227 = vrcp.f32 %v2231_v21  ;;  %v2220_v13 = vsel %vm2218_vm15, %v2219_v56, %v2217_v45  ;;  %3007 = vmatmul.mubr.msk.f32.vlgmr.msra.gmra.mxu0 %vm36_vm0, %v4268_v5 }
0x1246   :  { %v2232_v2 = vadd.f32 1e-06, %v2220_v13  ;;  %p3280_p3 = por %p3279_p2, %p3278_p1 }
0x1248   :  { %3229 = vrcp.f32 %v2232_v2  ;;  %p3281_p4 = pnand %p3280_p3, %p3274_p0 }
0x1252   :  { %v3228_v6 = vpop.eup %3227 }
0x1253   :  { %v2238_v43 = vmul.f32 %v3228_v6, %v2227_v28 }
0x1255   :  { %v3230_v52 = vpop.eup %3229  ;;  %v4276_v4 = vadd.f32 %v2244_v24, %v2238_v43 }
0x1256   :  { %v2240_v29 = vmul.f32 %v3230_v52, %v2228_v40 }
0x1257   :  { %3009 = vmatprep.mubr.msk.f32.mxu0 %vm36_vm0, %v4276_v4 }
0x1258   :  { %v4280_v59 = vadd.f32 %v2244_v24, %v2240_v29  ;;  %v2385_v24 = vrot.slane %v4250_v17, %v1102_v18 }
0x125a   :  { %3010 = vmatmul.mubr.msk.f32.gmra.mxu0 %vm36_vm0, %v4280_v59 }
0x12a4   :  { %v2401_v31 = vpop.permute.xlu0 %2400 }
0x12a5   :  { %3012 = vmatprep.subr.mxu1 %v2401_v31 }
0x12a6   :  { %3013 = vmatpush3.msra.mxu1 %v2401_v31 }
0x12a8   :  { %v2399_v57 = vpop.permute.xlu1 %2398  ;;  %v2397_v51 = vpop.permute.xlu0 %2396 }
0x12a9   :  { %3014 = vmatprep.subr.mxu1 %v2399_v57 }
0x12aa   :  { %3015 = vmatpush3.msra.mxu1 %v2399_v57 }
0x12ab   :  { %3016 = vmatprep.subr.mxu1 %v2397_v51 }
0x12ac   :  { %3017 = vmatpush3.msra.mxu1 %v2397_v51  ;;  %v2395_v37 = vpop.permute.xlu1 %2394  ;;  %v2393_v25 = vpop.permute.xlu0 %2392 }
0x12ad   :  { %3018 = vmatprep.subr.mxu1 %v2395_v37 }
0x12ae   :  { %3019 = vmatpush3.msra.mxu1 %v2395_v37 }
0x12af   :  { %3020 = vmatprep.subr.mxu1 %v2393_v25 }
0x12b0   :  { %3021 = vmatpush3.msra.mxu1 %v2393_v25  ;;  %v2391_v60 = vpop.permute.xlu1 %2390  ;;  %v2389_v1 = vpop.permute.xlu0 %2388 }
0x12b1   :  { %3022 = vmatprep.subr.mxu1 %v2391_v60 }
0x12b2   :  { %3023 = vmatpush3.msra.mxu1 %v2391_v60 }
0x12b3   :  { %3024 = vmatprep.subr.mxu1 %v2389_v1 }
0x12b4   :  { %3025 = vmatpush3.msra.mxu1 %v2389_v1  ;;  %v2387_v36 = vpop.permute.xlu1 %2386 }
0x12b5   :  { %3026 = vmatprep.subr.mxu1 %v2387_v36 }
0x12b6   :  { %3027 = vmatpush3.msra.mxu1 %v2387_v36 }
0x1305   :  { %v3008_v10 = vpop.f32.mrf.mxu0 }
0x1306   :  { %v2337_v44 = vadd.f32 %v3008_v10, %v2252_v62 }
0x1307   :  { %v2331_v34 = vpop.f32.mrf.mxu0 }
0x1308   :  { %v2355_v8 = vmul.f32 0.70710677, %v2337_v44  ;;  %v2332_v15 = vadd.f32 %v2331_v34, %v2252_v62  ;;  %v2351_v50 = vmul.f32 0.5, %v2337_v44 }
0x130a   :  { %3231 = verf.f32 %v2355_v8  ;;  %v2354_v38 = vmul.f32 0.70710677, %v2332_v15  ;;  %v2350_v33 = vmul.f32 0.5, %v2332_v15 }
0x130c   :  { %3233 = verf.f32 %v2354_v38 }
0x1317   :  { %v3232_v19 = vpop.eup %3231 }
0x1318   :  { %v2363_v12 = vadd.f32 1.0, %v3232_v19 }
0x1319   :  { %v3234_v39 = vpop.eup %3233 }
0x131a   :  { %v3011_v30 = vpop.f32.mrf.mxu0  ;;  %v2362_v54 = vadd.f32 1.0, %v3234_v39  ;;  %v2367_v14 = vmul.f32 %v2363_v12, %v2351_v50 }
0x131b   :  { %v2347_v53 = vadd.f32 %v3011_v30, %v2252_v62 }
0x131c   :  { %v2341_v42 = vpop.f32.mrf.mxu0  ;;  %v2366_v49 = vmul.f32 %v2362_v54, %v2350_v33 }
0x131d   :  { %v2357_v63 = vmul.f32 0.70710677, %v2347_v53  ;;  %v2342_v48 = vadd.f32 %v2341_v42, %v2252_v62  ;;  %v2353_v16 = vmul.f32 0.5, %v2347_v53 }
0x131e   :  { %3028 = vmatprep.mubr.msk.f32.mxu1 %vm1128_vm13, %v2366_v49 }
0x131f   :  { %3235 = verf.f32 %v2357_v63  ;;  %v2356_v58 = vmul.f32 0.70710677, %v2342_v48  ;;  %3029 = vmatmul.mubr.msk.f32.vlgmr.msra.gmra.mxu1 %vm1128_vm13, %v2367_v14  ;;  %v2352_v11 = vmul.f32 0.5, %v2342_v48 }
0x1321   :  { %3237 = verf.f32 %v2356_v58 }
0x132c   :  { %v3236_v0 = vpop.eup %3235 }
0x132d   :  { %v2365_v55 = vadd.f32 1.0, %v3236_v0 }
0x132e   :  { %v3238_v35 = vpop.eup %3237 }
0x132f   :  { %v2364_v27 = vadd.f32 1.0, %v3238_v35  ;;  %v2369_v3 = vmul.f32 %v2365_v55, %v2353_v16  ;;  %v2582_v16 = vrot.slane %v4250_v17, %v1300_v23 }
0x1331   :  { %v2368_v61 = vmul.f32 %v2364_v27, %v2352_v11 }
0x1333   :  { %3031 = vmatprep.mubr.msk.f32.mxu1 %vm1128_vm13, %v2368_v61  ;;  %v2602_v61 = vrot.slane %v4250_v17, %v1320_v7 }
0x1334   :  { %3032 = vmatmul.mubr.msk.f32.gmra.mxu1 %vm1128_vm13, %v2369_v3 }
0x13df   :  { %v3030_v22 = vpop.f32.mrf.mxu1 }
0x13e0   :  { %v2494_v46 = vadd.f32 %v3030_v22, %v2385_v24 }
0x13e1   :  { %v2488_v47 = vpop.f32.mrf.mxu1 }
0x13e2   :  { %v2508_v26 = vadd.f32 %v2494_v46, %v4268_v5  ;;  %v2489_v20 = vadd.f32 %v2488_v47, %v2385_v24 }
0x13e4   :  { %v2507_v32 = vadd.f32 %v2489_v20, %v4266_v41  ;;  %v2514_v21 = vsel %vm36_vm0, %v2508_v26, 0.0 }
0x13e5   :  { %2515 = vadd.xlane.f32.xlu1 %v2514_v21 }
0x13e6   :  { %v2511_v56 = vsel %vm36_vm0, %v2507_v32, 0.0 }
0x13e7   :  { %2512 = vadd.xlane.f32.xlu0 %v2511_v56 }
0x13f4   :  { %v3033_v45 = vpop.f32.mrf.mxu1 }
0x13f5   :  { %v2504_v2 = vadd.f32 %v3033_v45, %v2385_v24 }
0x13f6   :  { %v2498_v13 = vpop.f32.mrf.mxu1 }
0x13f7   :  { %v2499_v28 = vadd.f32 %v2498_v13, %v2385_v24  ;;  %v2510_v6 = vadd.f32 %v2504_v2, %v4280_v59 }
0x13f9   :  { %v2509_v18 = vadd.f32 %v2499_v28, %v4276_v4  ;;  %v2520_v5 = vsel %vm36_vm0, %v2510_v6, 0.0 }
0x13fb   :  { %v2517_v43 = vsel %vm36_vm0, %v2509_v18, 0.0 }
0x13fc   :  { %2518 = vadd.xlane.f32.xlu0 %v2517_v43 }
0x1400   :  { %2521 = vadd.xlane.f32.xlu0 %v2520_v5 }
0x146e   :  { %v2516_v41 = vpop.xlane.xlu1 %2515 }
0x146f   :  { %v2524_v40 = vmul.f32 0.03125, %v2516_v41 }
0x1470   :  { %v2513_v52 = vpop.xlane.xlu0 %2512 }
0x1471   :  { %v2528_v29 = vsub.f32 %v2508_v26, %v2524_v40  ;;  %v2523_v31 = vmul.f32 0.03125, %v2513_v52 }
0x1473   :  { %v2527_v57 = vsub.f32 %v2507_v32, %v2523_v31  ;;  %v2532_v51 = vmul.f32 %v2528_v29, %v2528_v29  ;;  %v2584_v3 = vmul.f32 %v2582_v16, %v2528_v29 }
0x1475   :  { %v2538_v37 = vsel %vm36_vm0, %v2532_v51, 0.0  ;;  %v2531_v25 = vmul.f32 %v2527_v57, %v2527_v57  ;;  %v2583_v47 = vmul.f32 %v2582_v16, %v2527_v57 }
0x1476   :  { %2539 = vadd.xlane.f32.xlu0 %v2538_v37 }
0x1477   :  { %v2535_v4 = vsel %vm36_vm0, %v2531_v25, 0.0 }
0x1478   :  { %2536 = vadd.xlane.f32.xlu1 %v2535_v4 }
0x1485   :  { %v2519_v59 = vpop.xlane.xlu0 %2518 }
0x1486   :  { %v2525_v60 = vmul.f32 0.03125, %v2519_v59 }
0x1488   :  { %v4304_v1 = vsub.f32 %v2509_v18, %v2525_v60 }
0x1489   :  { %v2522_v36 = vpop.xlane.xlu0 %2521 }
0x148a   :  { %v2526_v62 = vmul.f32 0.03125, %v2522_v36  ;;  %v2533_v10 = vmul.f32 %v4304_v1, %v4304_v1  ;;  %v2585_v43 = vmul.f32 %v2582_v16, %v4304_v1 }
0x148c   :  { %v4308_v44 = vsub.f32 %v2510_v6, %v2526_v62  ;;  %v2541_v34 = vsel %vm36_vm0, %v2533_v10, 0.0 }
0x148d   :  { %2542 = vadd.xlane.f32.xlu1 %v2541_v34 }
0x148e   :  { %v2534_v8 = vmul.f32 %v4308_v44, %v4308_v44  ;;  %v2586_v40 = vmul.f32 %v2582_v16, %v4308_v44 }
0x1490   :  { %v2544_v15 = vsel %vm36_vm0, %v2534_v8, 0.0 }
0x1491   :  { %2545 = vadd.xlane.f32.xlu0 %v2544_v15 }
0x14ff   :  { %v2540_v38 = vpop.xlane.xlu0 %2539 }
0x1500   :  { %v2548_v19 = vmul.f32 0.032258064, %v2540_v38 }
0x1501   :  { %v2537_v39 = vpop.xlane.xlu1 %2536 }
0x1502   :  { %3239 = vrsqrt.f32 %v2548_v19  ;;  %v2547_v12 = vmul.f32 0.032258064, %v2537_v39  ;;  %vm2560_vm13 = vcmp.eq.f32.partialorder %v2548_v19, inf  ;;  %v2563_v54 = vand.u32 2147483648, %v2548_v19 }
0x1503   :  { %vm2562_vm5 = vcmp.eq.f32.partialorder %v2548_v19, 0.0 }
0x1504   :  { %3241 = vrsqrt.f32 %v2547_v12  ;;  %vm2553_vm6 = vcmp.eq.f32.partialorder %v2547_v12, inf  ;;  %v2556_v48 = vand.u32 2147483648, %v2547_v12  ;;  %vm2555_vm7 = vcmp.eq.f32.partialorder %v2547_v12, 0.0 }
0x150f   :  { %v3240_v30 = vpop.eup %3239 }
0x1510   :  { %v2559_v33 = vmul.f32 %v3240_v30, %v2548_v19 }
0x1511   :  { %v3242_v53 = vpop.eup %3241 }
0x1512   :  { %v2561_v50 = vsel %vm2560_vm13, %v2548_v19, %v2559_v33  ;;  %v2552_v49 = vmul.f32 %v3242_v53, %v2547_v12 }
0x1513   :  { %v2564_v42 = vsel %vm2562_vm5, %v2563_v54, %v2561_v50 }
0x1514   :  { %v2588_v63 = vadd.f32 1e-06, %v2564_v42  ;;  %v2554_v14 = vsel %vm2553_vm6, %v2547_v12, %v2552_v49 }
0x1515   :  { %v2557_v0 = vsel %vm2555_vm7, %v2556_v48, %v2554_v14 }
0x1516   :  { %v2543_v58 = vpop.xlane.xlu1 %2542  ;;  %3243 = vrcp.f32 %v2588_v63  ;;  %v2587_v55 = vadd.f32 1e-06, %v2557_v0 }
0x1517   :  { %v2549_v35 = vmul.f32 0.032258064, %v2543_v58 }
0x1519   :  { %3245 = vrsqrt.f32 %v2549_v35  ;;  %vm2567_vm8 = vcmp.eq.f32.partialorder %v2549_v35, inf  ;;  %v2570_v21 = vand.u32 2147483648, %v2549_v35  ;;  %vm2569_vm9 = vcmp.eq.f32.partialorder %v2549_v35, 0.0 }
0x151a   :  { %3247 = vrcp.f32 %v2587_v55  ;;  %v2546_v11 = vpop.xlane.xlu0 %2545 }
0x151b   :  { %v2550_v27 = vmul.f32 0.032258064, %v2546_v11 }
0x151d   :  { %3249 = vrsqrt.f32 %v2550_v27  ;;  %vm2574_vm10 = vcmp.eq.f32.partialorder %v2550_v27, inf  ;;  %v2577_v17 = vand.u32 2147483648, %v2550_v27  ;;  %vm2576_vm1 = vcmp.eq.f32.partialorder %v2550_v27, 0.0 }
0x1523   :  { %v3244_v24 = vpop.eup %3243 }
0x1524   :  { %v2594_v22 = vmul.f32 %v3244_v24, %v2584_v3 }
0x1526   :  { %v3246_v46 = vpop.eup %3245  ;;  %v2604_v32 = vadd.f32 %v2602_v61, %v2594_v22 }
0x1527   :  { %v3248_v26 = vpop.eup %3247  ;;  %v2566_v20 = vmul.f32 %v3246_v46, %v2549_v35 }
0x1528   :  { %v2592_v56 = vmul.f32 %v3248_v26, %v2583_v47  ;;  %2608 = vst.msk [vmem:[#allocation2 + $0x8] sm:$0xff] %vm36_vm0, %v2604_v32 }
0x1529   :  { %v2568_v45 = vsel %vm2567_vm8, %v2549_v35, %v2566_v20 }
0x152a   :  { %v3250_v23 = vpop.eup %3249  ;;  %v2571_v13 = vsel %vm2569_vm9, %v2570_v21, %v2568_v45  ;;  %v2603_v9 = vadd.f32 %v2602_v61, %v2592_v56 }
0x152b   :  { %v2589_v2 = vadd.f32 1e-06, %v2571_v13  ;;  %v2573_v7 = vmul.f32 %v3250_v23, %v2550_v27 }
0x152c   :  { %2607 = vst.msk [vmem:[#allocation2] sm:$0xff] %vm36_vm0, %v2603_v9 }
0x152d   :  { %3251 = vrcp.f32 %v2589_v2  ;;  %v2575_v28 = vsel %vm2574_vm10, %v2550_v27, %v2573_v7 }
0x152e   :  { %v2578_v18 = vsel %vm2576_vm1, %v2577_v17, %v2575_v28 }
0x152f   :  { %v2590_v6 = vadd.f32 1e-06, %v2578_v18 }
0x1531   :  { %3253 = vrcp.f32 %v2590_v6 }
0x153a   :  { %v3252_v5 = vpop.eup %3251 }
0x153b   :  { %v2596_v41 = vmul.f32 %v3252_v5, %v2585_v43 }
0x153d   :  { %v2605_v52 = vadd.f32 %v2602_v61, %v2596_v41 }
0x153e   :  { %v3254_v29 = vpop.eup %3253 }
0x153f   :  { %v2598_v31 = vmul.f32 %v3254_v29, %v2586_v40  ;;  %2609 = vst.msk [vmem:[#allocation2 + $0x10] sm:$0xff] %vm36_vm0, %v2605_v52 }
0x1541   :  { %v2606_v57 = vadd.f32 %v2602_v61, %v2598_v31 }
0x1543   :  { %2610 = vst.msk [vmem:[#allocation2 + $0x18] sm:$0xff] %vm36_vm0, %v2606_v57 }
0x1544   :  { %3284 = shalt.err (!%p3281_p4)
}
0x1545   :  { %s3305_s18 = smov 128  }
0x1546   :  { %2622 = dma.vmem_to_hbm [thread:$0]  %s2617_s10, 512, %s4334_s4, [#allocation3], %s3305_s18, %s3305_s18, %s3301_s22  }
0x1547   :  { %3293 = dma.done.wait [#allocation3], 512  }
0x1548   :  { %3294 = vsyncadd [#allocation3], 4294966784 }
0x1549   :  { %2626 = vsyncpa [#allocation3], 1 }

</bundles_post_ra>
